<compile_context>
chip_gen: v7x
topology: tpu7x:2x2x1
jax: 0.10.0
libtpu: 0.0.40
codegen_flags: <defaults>
</compile_context>

<pallas_src>
import functools

import jax
import jax.numpy as jnp
from jax.experimental import pallas as pl
from jax.experimental.pallas import tpu as pltpu


def _round_up(n, m):
    return ((n + m - 1) // m) * m


# ----------------------------- fused LSTM kernel ------------------------------

def _fused_lstm_kernel(x_ref, wih0_ref, wihu_ref, whh_ref, b_ref, hlast_ref,
                       h_scr, c_scr, hseq_scr, proj_scr, *,
                       num_layers, hidden_pad, t_blk, seq_len, feat_pad,
                       batch_pad, unroll):
    L = num_layers
    Hp = hidden_pad
    F = feat_pad
    Bp = batch_pad

    tb = pl.program_id(0)
    n_blk = pl.num_programs(0)
    needs_mask = (seq_len % t_blk) != 0

    @pl.when(tb == 0)
    def _():
        h_scr[...] = jnp.zeros_like(h_scr)
        c_scr[...] = jnp.zeros_like(c_scr)

    def _sigmoid(v):
        # one EUP push (tanh) instead of exp + divide
        return 0.5 * jnp.tanh(0.5 * v) + 0.5

    for l in range(L):
        # ---- batched input projection for the whole time block (large-M matmul)
        if l == 0:
            inp2d = x_ref[...].reshape(t_blk * Bp, F)          # bf16
            wih = wih0_ref[...]                                 # (F, 4Hp) bf16
        else:
            inp2d = hseq_scr[...].reshape(t_blk * Bp, Hp)       # bf16, prev layer out
            wih = wihu_ref[l - 1]                               # (Hp, 4Hp) bf16
        proj2d = jnp.dot(inp2d, wih, preferred_element_type=jnp.float32)
        # bias folded in once per layer per block (not per step)
        proj_scr[...] = (proj2d + b_ref[l]).reshape(t_blk, Bp, 4 * Hp)

        # ---- serial recurrence: only the (Bp,Hp)x(Hp,4Hp) W_hh matmul per step
        whh_l = whh_ref[l]                                      # (Hp, 4Hp) bf16
        write_seq = l < L - 1

        def step(t, carry, _write_seq=write_seq):
            h_bf, c = carry                                     # bf16, f32
            gates = proj_scr[t] + jnp.dot(h_bf, whh_l,
                                          preferred_element_type=jnp.float32)
            # gate order i, f, g, o (PyTorch), each on a 128-aligned Hp slot
            i_g = _sigmoid(gates[:, 0:Hp])
            f_g = _sigmoid(gates[:, Hp:2 * Hp])
            g_g = jnp.tanh(gates[:, 2 * Hp:3 * Hp])
            o_g = _sigmoid(gates[:, 3 * Hp:4 * Hp])
            c_new = f_g * c + i_g * g_g
            h_new = o_g * jnp.tanh(c_new)
            h_bf_new = h_new.astype(jnp.bfloat16)               # single cast / step
            if needs_mask:
                keep = (tb * t_blk + t) < seq_len               # hold state on pad
                c_new = jnp.where(keep, c_new, c)
                h_bf_new = jnp.where(keep, h_bf_new, h_bf)
            if _write_seq:
                hseq_scr[t] = h_bf_new                          # next layer's input
            return h_bf_new, c_new

        h_fin, c_fin = jax.lax.fori_loop(0, t_blk, step,
                                         (h_scr[l], c_scr[l]), unroll=unroll)

        # persist recurrent state for the next time block
        h_scr[l] = h_fin
        c_scr[l] = c_fin

        if l == L - 1:
            @pl.when(tb == n_blk - 1)
            def _():
                hlast_ref[...] = h_fin.astype(jnp.float32)


_BUFFERED = getattr(pl, "Buffered", None)


def _resident_spec(shape):
    """BlockSpec for a weight that is identical for every grid step: constant
    index_map + single buffering (no pointless double-buffer of resident data)."""
    idx = lambda tb: (0,) * len(shape)
    if _BUFFERED is not None:
        try:
            return pl.BlockSpec(shape, idx, pipeline_mode=_BUFFERED(1))
        except TypeError:           # older BlockSpec signature: default buffering
            pass
    return pl.BlockSpec(shape, idx)


def fused_lstm(x_tmajor, wih0, wihu, whh, b, *, num_layers, hidden_pad,
               feat_pad, batch_pad, t_blk, seq_len, unroll):
    """x_tmajor: (S_pad, Bp, F) bf16 time-major padded input.
    Returns the last layer's final hidden state, shape (Bp, Hp) f32."""
    S_pad = x_tmajor.shape[0]
    n_blk = S_pad // t_blk
    L, Hp, F, Bp = num_layers, hidden_pad, feat_pad, batch_pad
    Lu = wihu.shape[0]

    kernel = functools.partial(
        _fused_lstm_kernel, num_layers=L, hidden_pad=Hp, t_blk=t_blk,
        seq_len=seq_len, feat_pad=F, batch_pad=Bp, unroll=unroll)

    # ---- generation-aware VMEM budget (leave headroom for Pallas internals)
    bf16_b, f32_b = 2, 4
    vmem_est = (
        2 * t_blk * Bp * F * bf16_b                # x block (double-buffered)
        + F * 4 * Hp * bf16_b                      # W_ih layer 0   (Buffered(1))
        + Lu * Hp * 4 * Hp * bf16_b                # W_ih layers>=1 (Buffered(1))
        + L * Hp * 4 * Hp * bf16_b                 # W_hh           (Buffered(1))
        + L * 4 * Hp * f32_b                       # bias
        + 2 * Bp * Hp * f32_b                      # h_last output
        + L * Bp * Hp * (bf16_b + f32_b)           # persistent h / c state
        + t_blk * Bp * Hp * bf16_b                 # per-layer h sequence scratch
        + t_blk * Bp * 4 * Hp * f32_b              # block input-projection scratch
        + (unroll + 2) * Bp * 4 * Hp * f32_b       # live gate temporaries
    )
    try:
        vmem_cap = int(pltpu.get_tpu_info().vmem_capacity_bytes)
    except Exception:                               # no query available: assume v7x
        vmem_cap = 64 * 1024 * 1024
    headroom = 12 * 1024 * 1024
    vmem_limit = int(min(max(2 * vmem_est, 32 * 1024 * 1024),
                         max(vmem_cap - headroom, 16 * 1024 * 1024)))

    return pl.pallas_call(
        kernel,
        out_shape=jax.ShapeDtypeStruct((Bp, Hp), jnp.float32),
        grid_spec=pltpu.PrefetchScalarGridSpec(
            num_scalar_prefetch=0,
            grid=(n_blk,),
            in_specs=[
                pl.BlockSpec((t_blk, Bp, F), lambda tb: (tb, 0, 0)),  # x time block
                _resident_spec((F, 4 * Hp)),                          # W_ih layer 0
                _resident_spec((Lu, Hp, 4 * Hp)),                     # W_ih layers>=1
                _resident_spec((L, Hp, 4 * Hp)),                      # W_hh (stacked)
                _resident_spec((L, 1, 4 * Hp)),                       # bias (stacked)
            ],
            out_specs=pl.BlockSpec((Bp, Hp), lambda tb: (0, 0)),      # resident h_last
            scratch_shapes=[
                pltpu.VMEM((L, Bp, Hp), jnp.bfloat16),                # h state / layer
                pltpu.VMEM((L, Bp, Hp), jnp.float32),                 # c state / layer
                pltpu.VMEM((t_blk, Bp, Hp), jnp.bfloat16),            # layer h sequence
                pltpu.VMEM((t_blk, Bp, 4 * Hp), jnp.float32),         # input projection
            ],
        ),
        compiler_params=pltpu.CompilerParams(
            dimension_semantics=("arbitrary",),
            vmem_limit_bytes=vmem_limit),
    )(x_tmajor, wih0, wihu, whh, b)


# ------------------------------ params & packing ------------------------------

def init_params(key, input_size, hidden_size, num_layers):
    """PyTorch-layout params: LSTM/Linear uniform(-1/sqrt(H), 1/sqrt(H))."""
    k = 1.0 / jnp.sqrt(jnp.float32(hidden_size))
    layers = []
    for layer in range(num_layers):
        in_dim = input_size if layer == 0 else hidden_size
        key, k1, k2, k3, k4 = jax.random.split(key, 5)
        layers.append(dict(
            w_ih=jax.random.uniform(k1, (4 * hidden_size, in_dim), jnp.float32, -k, k),
            w_hh=jax.random.uniform(k2, (4 * hidden_size, hidden_size), jnp.float32, -k, k),
            b_ih=jax.random.uniform(k3, (4 * hidden_size,), jnp.float32, -k, k),
            b_hh=jax.random.uniform(k4, (4 * hidden_size,), jnp.float32, -k, k)))
    key, k5, k6 = jax.random.split(key, 3)
    fc_w = jax.random.uniform(k5, (1, hidden_size), jnp.float32, -k, k)
    fc_b = jax.random.uniform(k6, (1,), jnp.float32, -k, k)
    return dict(layers=layers, fc_w=fc_w, fc_b=fc_b)


def pack_params(params, input_size, hidden_size):
    """Pad/stack weights for the fused kernel.  Layer-0 W_ih is kept separate
    (F = padded input_size wide); upper-layer W_ih are Hp wide (no zero K rows).
    Gates are scattered onto Hp-aligned 128-lane slots; matmul operands -> bf16."""
    H = hidden_size
    Hp = _round_up(H, 128)
    F = _round_up(input_size, 128)
    L = len(params["layers"])
    Lu = max(L - 1, 1)

    wih0 = jnp.zeros((F, 4 * Hp), jnp.float32)
    wihu = jnp.zeros((Lu, Hp, 4 * Hp), jnp.float32)
    whh = jnp.zeros((L, Hp, 4 * Hp), jnp.float32)
    b = jnp.zeros((L, 1, 4 * Hp), jnp.float32)
    for l, lp in enumerate(params["layers"]):
        in_dim = lp["w_ih"].shape[1]
        wiT = lp["w_ih"].T                       # (in_dim, 4H), gate order i,f,g,o
        whT = lp["w_hh"].T                       # (H, 4H)
        bias = lp["b_ih"] + lp["b_hh"]           # (4H,)
        for g in range(4):
            col = slice(g * Hp, g * Hp + H)
            src = slice(g * H, (g + 1) * H)
            if l == 0:
                wih0 = wih0.at[:in_dim, col].set(wiT[:, src])
            else:
                wihu = wihu.at[l - 1, :in_dim, col].set(wiT[:, src])
            whh = whh.at[l, :H, col].set(whT[:, src])
            b = b.at[l, 0, col].set(bias[src])

    return dict(w_ih0=wih0.astype(jnp.bfloat16),
                w_ih_up=wihu.astype(jnp.bfloat16),
                w_hh=whh.astype(jnp.bfloat16),
                b=b,
                fc_w=params["fc_w"].T,           # (H, 1)
                fc_b=params["fc_b"],             # (1,)
                hidden=H, hidden_pad=Hp, feat_pad=F, num_layers=L)


# --------------------------------- full model ---------------------------------

def audio_rnn_binary_forward(x, packed):
    """x: (batch, seq, input_size), batch_first like the PyTorch module.
    Returns (batch,) probabilities."""
    B, S, D = x.shape
    H = packed["hidden"]
    Hp = packed["hidden_pad"]
    F = packed["feat_pad"]
    L = packed["num_layers"]
    Bp = _round_up(B, 16)                        # bf16 packs 16 rows / sublane group

    t_blk = max(1, min(S, 128))                  # amortize ~0.35us/grid-step overhead
    n_blk = pl.cdiv(S, t_blk)
    S_pad = n_blk * t_blk
    unroll = int(min(t_blk, 8 if (Hp <= 128 and L <= 2) else 4))  # vreg pressure

    # time-major, padded, bf16 (halves x DMA; MXU-ready).
    xt = jnp.transpose(x, (1, 0, 2))
    xt = jnp.pad(xt, ((0, S_pad - S), (0, Bp - B), (0, F - D))).astype(jnp.bfloat16)

    h_last = fused_lstm(xt, packed["w_ih0"], packed["w_ih_up"], packed["w_hh"],
                        packed["b"], num_layers=L, hidden_pad=Hp, feat_pad=F,
                        batch_pad=Bp, t_blk=t_blk, seq_len=S, unroll=unroll)

    h = h_last[:B, :H]                           # drop batch/lane padding
    # Linear(H,1) + Sigmoid: trivially small -> plain XLA (a dedicated Pallas
    # kernel here would be pure launch overhead with a masked 1-lane store).
    logits = h @ packed["fc_w"] + packed["fc_b"]
    return jax.nn.sigmoid(logits)[:, 0]          # .squeeze(dim=1)


# ------------------------------ pure-JAX reference -----------------------------

def _reference_forward(x, params):
    B, S, _ = x.shape
    inp = x
    h = None
    for lp in params["layers"]:
        H = lp["w_hh"].shape[1]
        h = jnp.zeros((B, H), jnp.float32)
        c = jnp.zeros((B, H), jnp.float32)
        outs = []
        for t in range(S):
            gates = inp[:, t, :] @ lp["w_ih"].T + h @ lp["w_hh"].T + lp["b_ih"] + lp["b_hh"]
            i_g = jax.nn.sigmoid(gates[:, :H])
            f_g = jax.nn.sigmoid(gates[:, H:2 * H])
            g_g = jnp.tanh(gates[:, 2 * H:3 * H])
            o_g = jax.nn.sigmoid(gates[:, 3 * H:])
            c = f_g * c + i_g * g_g
            h = o_g * jnp.tanh(c)
            outs.append(h)
        inp = jnp.stack(outs, axis=1)
    logits = h @ params["fc_w"].T + params["fc_b"]
    return jax.nn.sigmoid(logits)[:, 0]


if __name__ == "__main__":
    batch, seq, input_size, hidden_size, num_layers = 2, 8, 16, 32, 2

    key = jax.random.PRNGKey(0)
    key, xk = jax.random.split(key)
    x = jax.random.normal(xk, (batch, seq, input_size), jnp.float32)

    params = init_params(key, input_size, hidden_size, num_layers)
    packed = pack_params(params, input_size, hidden_size)

    out = jax.block_until_ready(audio_rnn_binary_forward(x, packed))
    ref = jax.block_until_ready(_reference_forward(x, params))

    assert out.shape == (batch,)
    # bf16 MXU operands (f32 accumulation) => small numeric drift vs f32 reference
    assert jnp.allclose(out, ref, atol=2e-2, rtol=2e-2), (out, ref)

    print("KERNEL_OK")
</pallas_src>

<mosaic_0001>
module attributes {stable_mosaic.version = 11 : i64} {
  func.func @_fused_lstm_kernel(%arg0: i32, %arg1: memref<8x16x128xbf16, #tpu.memory_space<vmem>>, %arg2: memref<128x512xbf16, #tpu.memory_space<vmem>>, %arg3: memref<1x128x512xbf16, #tpu.memory_space<vmem>>, %arg4: memref<2x128x512xbf16, #tpu.memory_space<vmem>>, %arg5: memref<2x1x512xf32, #tpu.memory_space<vmem>>, %arg6: memref<16x128xf32, #tpu.memory_space<vmem>>, %arg7: memref<2x16x128xbf16, #tpu.memory_space<vmem>>, %arg8: memref<2x16x128xf32, #tpu.memory_space<vmem>>, %arg9: memref<8x16x128xbf16, #tpu.memory_space<vmem>>, %arg10: memref<8x16x512xf32, #tpu.memory_space<vmem>>) attributes {dimension_semantics = [#tpu.dimension_semantics<arbitrary>], iteration_bounds = array<i64: 1>, scalar_prefetch = 0 : i64, scratch_operands = 4 : i64, tpu.core_type = #tpu.core_type<tc>, window_params = [{transform_indices = @transform_0, window_bounds = array<i64: 8, 16, 128>}, {pipeline_mode = #tpu.pipeline_mode<synchronous>, transform_indices = @transform_1, window_bounds = array<i64: 128, 512>}, {pipeline_mode = #tpu.pipeline_mode<synchronous>, transform_indices = @transform_2, window_bounds = array<i64: 1, 128, 512>}, {pipeline_mode = #tpu.pipeline_mode<synchronous>, transform_indices = @transform_3, window_bounds = array<i64: 2, 128, 512>}, {pipeline_mode = #tpu.pipeline_mode<synchronous>, transform_indices = @transform_4, window_bounds = array<i64: 2, 1, 512>}, {pipeline_mode = #tpu.pipeline_mode<synchronous>, transform_indices = @transform_5, window_bounds = array<i64: 16, 128>}]} {
    %c0_i32 = arith.constant 0 : i32
    %0 = arith.cmpi eq, %arg0, %c0_i32 : i32
    %1 = arith.extui %0 : i1 to i32
    %c0_i32_0 = arith.constant 0 : i32
    %2 = arith.cmpi ne, %1, %c0_i32_0 : i32
    scf.if %2 {
      %cst_273 = arith.constant 0.000000e+00 : bf16
      %675 = vector.broadcast %cst_273 : bf16 to vector<2x16x128xbf16>
      %c0_274 = arith.constant 0 : index
      %c0_275 = arith.constant 0 : index
      %c0_276 = arith.constant 0 : index
      %676 = vector.load %arg7[%c0_274, %c0_275, %c0_276] : memref<2x16x128xbf16, #tpu.memory_space<vmem>>, vector<2x16x128xbf16>
      tpu.vector_store %arg7[%c0_274, %c0_275, %c0_276], %675 {strides = array<i32>} : memref<2x16x128xbf16, #tpu.memory_space<vmem>>, vector<2x16x128xbf16>,
      %cst_277 = arith.constant 0.000000e+00 : f32
      %677 = vector.broadcast %cst_277 : f32 to vector<2x16x128xf32>
      %c0_278 = arith.constant 0 : index
      %c0_279 = arith.constant 0 : index
      %c0_280 = arith.constant 0 : index
      %678 = vector.load %arg8[%c0_278, %c0_279, %c0_280] : memref<2x16x128xf32, #tpu.memory_space<vmem>>, vector<2x16x128xf32>
      tpu.vector_store %arg8[%c0_278, %c0_279, %c0_280], %677 {strides = array<i32>} : memref<2x16x128xf32, #tpu.memory_space<vmem>>, vector<2x16x128xf32>,
    } else {
    }
    %c0 = arith.constant 0 : index
    %c0_1 = arith.constant 0 : index
    %c0_2 = arith.constant 0 : index
    %3 = vector.load %arg1[%c0, %c0_1, %c0_2] : memref<8x16x128xbf16, #tpu.memory_space<vmem>>, vector<8x16x128xbf16>
    %4 = vector.shape_cast %3 : vector<8x16x128xbf16> to vector<128x128xbf16>
    %c0_3 = arith.constant 0 : index
    %c0_4 = arith.constant 0 : index
    %5 = vector.load %arg2[%c0_3, %c0_4] : memref<128x512xbf16, #tpu.memory_space<vmem>>, vector<128x512xbf16>
    %cst = arith.constant dense<0.000000e+00> : vector<128x512xf32>
    %6 = tpu.matmul %4, %5, %cst {dimension_numbers = #tpu.dot_dimension_numbers<[1], [0], [0], [1], [0, 0, 1, 1], [], []>} : vector<128x128xbf16>, vector<128x512xbf16>, vector<128x512xf32> -> vector<128x512xf32>
    %c0_5 = arith.constant 0 : index
    %c0_6 = arith.constant 0 : index
    %c0_7 = arith.constant 0 : index
    %7 = vector.load %arg5[%c0_5, %c0_6, %c0_7] : memref<2x1x512xf32, #tpu.memory_space<vmem>>, vector<1x1x512xf32>
    %8 = vector.shape_cast %7 : vector<1x1x512xf32> to vector<1x512xf32>
    %9 = vector.broadcast %8 : vector<1x512xf32> to vector<128x512xf32>
    %10 = arith.addf %6, %9 : vector<128x512xf32>
    %11 = vector.shape_cast %10 : vector<128x512xf32> to vector<8x16x512xf32>
    %c0_8 = arith.constant 0 : index
    %c0_9 = arith.constant 0 : index
    %c0_10 = arith.constant 0 : index
    %12 = vector.load %arg10[%c0_8, %c0_9, %c0_10] : memref<8x16x512xf32, #tpu.memory_space<vmem>>, vector<8x16x512xf32>
    tpu.vector_store %arg10[%c0_8, %c0_9, %c0_10], %11 {strides = array<i32>} : memref<8x16x512xf32, #tpu.memory_space<vmem>>, vector<8x16x512xf32>,
    %c0_11 = arith.constant 0 : index
    %c0_12 = arith.constant 0 : index
    %c0_13 = arith.constant 0 : index
    %13 = vector.load %arg4[%c0_11, %c0_12, %c0_13] : memref<2x128x512xbf16, #tpu.memory_space<vmem>>, vector<1x128x512xbf16>
    %14 = vector.shape_cast %13 : vector<1x128x512xbf16> to vector<128x512xbf16>
    %c0_14 = arith.constant 0 : index
    %c0_15 = arith.constant 0 : index
    %c0_16 = arith.constant 0 : index
    %15 = vector.load %arg7[%c0_14, %c0_15, %c0_16] : memref<2x16x128xbf16, #tpu.memory_space<vmem>>, vector<1x16x128xbf16>
    %16 = vector.shape_cast %15 : vector<1x16x128xbf16> to vector<16x128xbf16>
    %c0_17 = arith.constant 0 : index
    %c0_18 = arith.constant 0 : index
    %c0_19 = arith.constant 0 : index
    %17 = vector.load %arg8[%c0_17, %c0_18, %c0_19] : memref<2x16x128xf32, #tpu.memory_space<vmem>>, vector<1x16x128xf32>
    %18 = vector.shape_cast %17 : vector<1x16x128xf32> to vector<16x128xf32>
    %c0_i32_20 = arith.constant 0 : i32
    %19 = arith.index_cast %c0_i32_20 : i32 to index
    %c0_21 = arith.constant 0 : index
    %c0_22 = arith.constant 0 : index
    %20 = vector.load %arg10[%19, %c0_21, %c0_22] : memref<8x16x512xf32, #tpu.memory_space<vmem>>, vector<1x16x512xf32>
    %21 = vector.shape_cast %20 : vector<1x16x512xf32> to vector<16x512xf32>
    %cst_23 = arith.constant dense<0.000000e+00> : vector<16x512xf32>
    %22 = tpu.matmul %16, %14, %cst_23 {dimension_numbers = #tpu.dot_dimension_numbers<[1], [0], [0], [1], [0, 0, 1, 1], [], []>} : vector<16x128xbf16>, vector<128x512xbf16>, vector<16x512xf32> -> vector<16x512xf32>
    %23 = arith.addf %21, %22 : vector<16x512xf32>
    %24 = vector.extract_strided_slice %23 {offsets = [0, 0], sizes = [16, 128], strides = [1, 1]} : vector<16x512xf32> to vector<16x128xf32>
    %cst_24 = arith.constant 5.000000e-01 : f32
    %25 = vector.broadcast %cst_24 : f32 to vector<16x128xf32>
    %26 = arith.mulf %25, %24 : vector<16x128xf32>
    %27 = math.tanh %26 : vector<16x128xf32>
    %cst_25 = arith.constant 5.000000e-01 : f32
    %28 = vector.broadcast %cst_25 : f32 to vector<16x128xf32>
    %29 = arith.mulf %28, %27 : vector<16x128xf32>
    %cst_26 = arith.constant 5.000000e-01 : f32
    %30 = vector.broadcast %cst_26 : f32 to vector<16x128xf32>
    %31 = arith.addf %29, %30 : vector<16x128xf32>
    %32 = vector.extract_strided_slice %23 {offsets = [0, 128], sizes = [16, 128], strides = [1, 1]} : vector<16x512xf32> to vector<16x128xf32>
    %cst_27 = arith.constant 5.000000e-01 : f32
    %33 = vector.broadcast %cst_27 : f32 to vector<16x128xf32>
    %34 = arith.mulf %33, %32 : vector<16x128xf32>
    %35 = math.tanh %34 : vector<16x128xf32>
    %cst_28 = arith.constant 5.000000e-01 : f32
    %36 = vector.broadcast %cst_28 : f32 to vector<16x128xf32>
    %37 = arith.mulf %36, %35 : vector<16x128xf32>
    %cst_29 = arith.constant 5.000000e-01 : f32
    %38 = vector.broadcast %cst_29 : f32 to vector<16x128xf32>
    %39 = arith.addf %37, %38 : vector<16x128xf32>
    %40 = vector.extract_strided_slice %23 {offsets = [0, 256], sizes = [16, 128], strides = [1, 1]} : vector<16x512xf32> to vector<16x128xf32>
    %41 = math.tanh %40 : vector<16x128xf32>
    %42 = vector.extract_strided_slice %23 {offsets = [0, 384], sizes = [16, 128], strides = [1, 1]} : vector<16x512xf32> to vector<16x128xf32>
    %cst_30 = arith.constant 5.000000e-01 : f32
    %43 = vector.broadcast %cst_30 : f32 to vector<16x128xf32>
    %44 = arith.mulf %43, %42 : vector<16x128xf32>
    %45 = math.tanh %44 : vector<16x128xf32>
    %cst_31 = arith.constant 5.000000e-01 : f32
    %46 = vector.broadcast %cst_31 : f32 to vector<16x128xf32>
    %47 = arith.mulf %46, %45 : vector<16x128xf32>
    %cst_32 = arith.constant 5.000000e-01 : f32
    %48 = vector.broadcast %cst_32 : f32 to vector<16x128xf32>
    %49 = arith.addf %47, %48 : vector<16x128xf32>
    %50 = arith.mulf %39, %18 : vector<16x128xf32>
    %51 = arith.mulf %31, %41 : vector<16x128xf32>
    %52 = arith.addf %50, %51 : vector<16x128xf32>
    %53 = math.tanh %52 : vector<16x128xf32>
    %54 = arith.mulf %49, %53 : vector<16x128xf32>
    %55 = arith.truncf %54 : vector<16x128xf32> to vector<16x128xbf16>
    %56 = arith.index_cast %c0_i32_20 : i32 to index
    %c0_33 = arith.constant 0 : index
    %c0_34 = arith.constant 0 : index
    %57 = vector.load %arg9[%56, %c0_33, %c0_34] : memref<8x16x128xbf16, #tpu.memory_space<vmem>>, vector<1x16x128xbf16>
    %58 = vector.shape_cast %57 : vector<1x16x128xbf16> to vector<16x128xbf16>
    %59 = vector.shape_cast %55 : vector<16x128xbf16> to vector<1x16x128xbf16>
    tpu.vector_store %arg9[%56, %c0_33, %c0_34], %59 {strides = array<i32>} : memref<8x16x128xbf16, #tpu.memory_space<vmem>>, vector<1x16x128xbf16>,
    %c1_i32 = arith.constant 1 : i32
    %60 = arith.index_cast %c1_i32 : i32 to index
    %c0_35 = arith.constant 0 : index
    %c0_36 = arith.constant 0 : index
    %61 = vector.load %arg10[%60, %c0_35, %c0_36] : memref<8x16x512xf32, #tpu.memory_space<vmem>>, vector<1x16x512xf32>
    %62 = vector.shape_cast %61 : vector<1x16x512xf32> to vector<16x512xf32>
    %cst_37 = arith.constant dense<0.000000e+00> : vector<16x512xf32>
    %63 = tpu.matmul %55, %14, %cst_37 {dimension_numbers = #tpu.dot_dimension_numbers<[1], [0], [0], [1], [0, 0, 1, 1], [], []>} : vector<16x128xbf16>, vector<128x512xbf16>, vector<16x512xf32> -> vector<16x512xf32>
    %64 = arith.addf %62, %63 : vector<16x512xf32>
    %65 = vector.extract_strided_slice %64 {offsets = [0, 0], sizes = [16, 128], strides = [1, 1]} : vector<16x512xf32> to vector<16x128xf32>
    %cst_38 = arith.constant 5.000000e-01 : f32
    %66 = vector.broadcast %cst_38 : f32 to vector<16x128xf32>
    %67 = arith.mulf %66, %65 : vector<16x128xf32>
    %68 = math.tanh %67 : vector<16x128xf32>
    %cst_39 = arith.constant 5.000000e-01 : f32
    %69 = vector.broadcast %cst_39 : f32 to vector<16x128xf32>
    %70 = arith.mulf %69, %68 : vector<16x128xf32>
    %cst_40 = arith.constant 5.000000e-01 : f32
    %71 = vector.broadcast %cst_40 : f32 to vector<16x128xf32>
    %72 = arith.addf %70, %71 : vector<16x128xf32>
    %73 = vector.extract_strided_slice %64 {offsets = [0, 128], sizes = [16, 128], strides = [1, 1]} : vector<16x512xf32> to vector<16x128xf32>
    %cst_41 = arith.constant 5.000000e-01 : f32
    %74 = vector.broadcast %cst_41 : f32 to vector<16x128xf32>
    %75 = arith.mulf %74, %73 : vector<16x128xf32>
    %76 = math.tanh %75 : vector<16x128xf32>
    %cst_42 = arith.constant 5.000000e-01 : f32
    %77 = vector.broadcast %cst_42 : f32 to vector<16x128xf32>
    %78 = arith.mulf %77, %76 : vector<16x128xf32>
    %cst_43 = arith.constant 5.000000e-01 : f32
    %79 = vector.broadcast %cst_43 : f32 to vector<16x128xf32>
    %80 = arith.addf %78, %79 : vector<16x128xf32>
    %81 = vector.extract_strided_slice %64 {offsets = [0, 256], sizes = [16, 128], strides = [1, 1]} : vector<16x512xf32> to vector<16x128xf32>
    %82 = math.tanh %81 : vector<16x128xf32>
    %83 = vector.extract_strided_slice %64 {offsets = [0, 384], sizes = [16, 128], strides = [1, 1]} : vector<16x512xf32> to vector<16x128xf32>
    %cst_44 = arith.constant 5.000000e-01 : f32
    %84 = vector.broadcast %cst_44 : f32 to vector<16x128xf32>
    %85 = arith.mulf %84, %83 : vector<16x128xf32>
    %86 = math.tanh %85 : vector<16x128xf32>
    %cst_45 = arith.constant 5.000000e-01 : f32
    %87 = vector.broadcast %cst_45 : f32 to vector<16x128xf32>
    %88 = arith.mulf %87, %86 : vector<16x128xf32>
    %cst_46 = arith.constant 5.000000e-01 : f32
    %89 = vector.broadcast %cst_46 : f32 to vector<16x128xf32>
    %90 = arith.addf %88, %89 : vector<16x128xf32>
    %91 = arith.mulf %80, %52 : vector<16x128xf32>
    %92 = arith.mulf %72, %82 : vector<16x128xf32>
    %93 = arith.addf %91, %92 : vector<16x128xf32>
    %94 = math.tanh %93 : vector<16x128xf32>
    %95 = arith.mulf %90, %94 : vector<16x128xf32>
    %96 = arith.truncf %95 : vector<16x128xf32> to vector<16x128xbf16>
    %97 = arith.index_cast %c1_i32 : i32 to index
    %c0_47 = arith.constant 0 : index
    %c0_48 = arith.constant 0 : index
    %98 = vector.load %arg9[%97, %c0_47, %c0_48] : memref<8x16x128xbf16, #tpu.memory_space<vmem>>, vector<1x16x128xbf16>
    %99 = vector.shape_cast %98 : vector<1x16x128xbf16> to vector<16x128xbf16>
    %100 = vector.shape_cast %96 : vector<16x128xbf16> to vector<1x16x128xbf16>
    tpu.vector_store %arg9[%97, %c0_47, %c0_48], %100 {strides = array<i32>} : memref<8x16x128xbf16, #tpu.memory_space<vmem>>, vector<1x16x128xbf16>,
    %c2_i32 = arith.constant 2 : i32
    %101 = arith.index_cast %c2_i32 : i32 to index
    %c0_49 = arith.constant 0 : index
    %c0_50 = arith.constant 0 : index
    %102 = vector.load %arg10[%101, %c0_49, %c0_50] : memref<8x16x512xf32, #tpu.memory_space<vmem>>, vector<1x16x512xf32>
    %103 = vector.shape_cast %102 : vector<1x16x512xf32> to vector<16x512xf32>
    %cst_51 = arith.constant dense<0.000000e+00> : vector<16x512xf32>
    %104 = tpu.matmul %96, %14, %cst_51 {dimension_numbers = #tpu.dot_dimension_numbers<[1], [0], [0], [1], [0, 0, 1, 1], [], []>} : vector<16x128xbf16>, vector<128x512xbf16>, vector<16x512xf32> -> vector<16x512xf32>
    %105 = arith.addf %103, %104 : vector<16x512xf32>
    %106 = vector.extract_strided_slice %105 {offsets = [0, 0], sizes = [16, 128], strides = [1, 1]} : vector<16x512xf32> to vector<16x128xf32>
    %cst_52 = arith.constant 5.000000e-01 : f32
    %107 = vector.broadcast %cst_52 : f32 to vector<16x128xf32>
    %108 = arith.mulf %107, %106 : vector<16x128xf32>
    %109 = math.tanh %108 : vector<16x128xf32>
    %cst_53 = arith.constant 5.000000e-01 : f32
    %110 = vector.broadcast %cst_53 : f32 to vector<16x128xf32>
    %111 = arith.mulf %110, %109 : vector<16x128xf32>
    %cst_54 = arith.constant 5.000000e-01 : f32
    %112 = vector.broadcast %cst_54 : f32 to vector<16x128xf32>
    %113 = arith.addf %111, %112 : vector<16x128xf32>
    %114 = vector.extract_strided_slice %105 {offsets = [0, 128], sizes = [16, 128], strides = [1, 1]} : vector<16x512xf32> to vector<16x128xf32>
    %cst_55 = arith.constant 5.000000e-01 : f32
    %115 = vector.broadcast %cst_55 : f32 to vector<16x128xf32>
    %116 = arith.mulf %115, %114 : vector<16x128xf32>
    %117 = math.tanh %116 : vector<16x128xf32>
    %cst_56 = arith.constant 5.000000e-01 : f32
    %118 = vector.broadcast %cst_56 : f32 to vector<16x128xf32>
    %119 = arith.mulf %118, %117 : vector<16x128xf32>
    %cst_57 = arith.constant 5.000000e-01 : f32
    %120 = vector.broadcast %cst_57 : f32 to vector<16x128xf32>
    %121 = arith.addf %119, %120 : vector<16x128xf32>
    %122 = vector.extract_strided_slice %105 {offsets = [0, 256], sizes = [16, 128], strides = [1, 1]} : vector<16x512xf32> to vector<16x128xf32>
    %123 = math.tanh %122 : vector<16x128xf32>
    %124 = vector.extract_strided_slice %105 {offsets = [0, 384], sizes = [16, 128], strides = [1, 1]} : vector<16x512xf32> to vector<16x128xf32>
    %cst_58 = arith.constant 5.000000e-01 : f32
    %125 = vector.broadcast %cst_58 : f32 to vector<16x128xf32>
    %126 = arith.mulf %125, %124 : vector<16x128xf32>
    %127 = math.tanh %126 : vector<16x128xf32>
    %cst_59 = arith.constant 5.000000e-01 : f32
    %128 = vector.broadcast %cst_59 : f32 to vector<16x128xf32>
    %129 = arith.mulf %128, %127 : vector<16x128xf32>
    %cst_60 = arith.constant 5.000000e-01 : f32
    %130 = vector.broadcast %cst_60 : f32 to vector<16x128xf32>
    %131 = arith.addf %129, %130 : vector<16x128xf32>
    %132 = arith.mulf %121, %93 : vector<16x128xf32>
    %133 = arith.mulf %113, %123 : vector<16x128xf32>
    %134 = arith.addf %132, %133 : vector<16x128xf32>
    %135 = math.tanh %134 : vector<16x128xf32>
    %136 = arith.mulf %131, %135 : vector<16x128xf32>
    %137 = arith.truncf %136 : vector<16x128xf32> to vector<16x128xbf16>
    %138 = arith.index_cast %c2_i32 : i32 to index
    %c0_61 = arith.constant 0 : index
    %c0_62 = arith.constant 0 : index
    %139 = vector.load %arg9[%138, %c0_61, %c0_62] : memref<8x16x128xbf16, #tpu.memory_space<vmem>>, vector<1x16x128xbf16>
    %140 = vector.shape_cast %139 : vector<1x16x128xbf16> to vector<16x128xbf16>
    %141 = vector.shape_cast %137 : vector<16x128xbf16> to vector<1x16x128xbf16>
    tpu.vector_store %arg9[%138, %c0_61, %c0_62], %141 {strides = array<i32>} : memref<8x16x128xbf16, #tpu.memory_space<vmem>>, vector<1x16x128xbf16>,
    %c3_i32 = arith.constant 3 : i32
    %142 = arith.index_cast %c3_i32 : i32 to index
    %c0_63 = arith.constant 0 : index
    %c0_64 = arith.constant 0 : index
    %143 = vector.load %arg10[%142, %c0_63, %c0_64] : memref<8x16x512xf32, #tpu.memory_space<vmem>>, vector<1x16x512xf32>
    %144 = vector.shape_cast %143 : vector<1x16x512xf32> to vector<16x512xf32>
    %cst_65 = arith.constant dense<0.000000e+00> : vector<16x512xf32>
    %145 = tpu.matmul %137, %14, %cst_65 {dimension_numbers = #tpu.dot_dimension_numbers<[1], [0], [0], [1], [0, 0, 1, 1], [], []>} : vector<16x128xbf16>, vector<128x512xbf16>, vector<16x512xf32> -> vector<16x512xf32>
    %146 = arith.addf %144, %145 : vector<16x512xf32>
    %147 = vector.extract_strided_slice %146 {offsets = [0, 0], sizes = [16, 128], strides = [1, 1]} : vector<16x512xf32> to vector<16x128xf32>
    %cst_66 = arith.constant 5.000000e-01 : f32
    %148 = vector.broadcast %cst_66 : f32 to vector<16x128xf32>
    %149 = arith.mulf %148, %147 : vector<16x128xf32>
    %150 = math.tanh %149 : vector<16x128xf32>
    %cst_67 = arith.constant 5.000000e-01 : f32
    %151 = vector.broadcast %cst_67 : f32 to vector<16x128xf32>
    %152 = arith.mulf %151, %150 : vector<16x128xf32>
    %cst_68 = arith.constant 5.000000e-01 : f32
    %153 = vector.broadcast %cst_68 : f32 to vector<16x128xf32>
    %154 = arith.addf %152, %153 : vector<16x128xf32>
    %155 = vector.extract_strided_slice %146 {offsets = [0, 128], sizes = [16, 128], strides = [1, 1]} : vector<16x512xf32> to vector<16x128xf32>
    %cst_69 = arith.constant 5.000000e-01 : f32
    %156 = vector.broadcast %cst_69 : f32 to vector<16x128xf32>
    %157 = arith.mulf %156, %155 : vector<16x128xf32>
    %158 = math.tanh %157 : vector<16x128xf32>
    %cst_70 = arith.constant 5.000000e-01 : f32
    %159 = vector.broadcast %cst_70 : f32 to vector<16x128xf32>
    %160 = arith.mulf %159, %158 : vector<16x128xf32>
    %cst_71 = arith.constant 5.000000e-01 : f32
    %161 = vector.broadcast %cst_71 : f32 to vector<16x128xf32>
    %162 = arith.addf %160, %161 : vector<16x128xf32>
    %163 = vector.extract_strided_slice %146 {offsets = [0, 256], sizes = [16, 128], strides = [1, 1]} : vector<16x512xf32> to vector<16x128xf32>
    %164 = math.tanh %163 : vector<16x128xf32>
    %165 = vector.extract_strided_slice %146 {offsets = [0, 384], sizes = [16, 128], strides = [1, 1]} : vector<16x512xf32> to vector<16x128xf32>
    %cst_72 = arith.constant 5.000000e-01 : f32
    %166 = vector.broadcast %cst_72 : f32 to vector<16x128xf32>
    %167 = arith.mulf %166, %165 : vector<16x128xf32>
    %168 = math.tanh %167 : vector<16x128xf32>
    %cst_73 = arith.constant 5.000000e-01 : f32
    %169 = vector.broadcast %cst_73 : f32 to vector<16x128xf32>
    %170 = arith.mulf %169, %168 : vector<16x128xf32>
    %cst_74 = arith.constant 5.000000e-01 : f32
    %171 = vector.broadcast %cst_74 : f32 to vector<16x128xf32>
    %172 = arith.addf %170, %171 : vector<16x128xf32>
    %173 = arith.mulf %162, %134 : vector<16x128xf32>
    %174 = arith.mulf %154, %164 : vector<16x128xf32>
    %175 = arith.addf %173, %174 : vector<16x128xf32>
    %176 = math.tanh %175 : vector<16x128xf32>
    %177 = arith.mulf %172, %176 : vector<16x128xf32>
    %178 = arith.truncf %177 : vector<16x128xf32> to vector<16x128xbf16>
    %179 = arith.index_cast %c3_i32 : i32 to index
    %c0_75 = arith.constant 0 : index
    %c0_76 = arith.constant 0 : index
    %180 = vector.load %arg9[%179, %c0_75, %c0_76] : memref<8x16x128xbf16, #tpu.memory_space<vmem>>, vector<1x16x128xbf16>
    %181 = vector.shape_cast %180 : vector<1x16x128xbf16> to vector<16x128xbf16>
    %182 = vector.shape_cast %178 : vector<16x128xbf16> to vector<1x16x128xbf16>
    tpu.vector_store %arg9[%179, %c0_75, %c0_76], %182 {strides = array<i32>} : memref<8x16x128xbf16, #tpu.memory_space<vmem>>, vector<1x16x128xbf16>,
    %c4_i32 = arith.constant 4 : i32
    %183 = arith.index_cast %c4_i32 : i32 to index
    %c0_77 = arith.constant 0 : index
    %c0_78 = arith.constant 0 : index
    %184 = vector.load %arg10[%183, %c0_77, %c0_78] : memref<8x16x512xf32, #tpu.memory_space<vmem>>, vector<1x16x512xf32>
    %185 = vector.shape_cast %184 : vector<1x16x512xf32> to vector<16x512xf32>
    %cst_79 = arith.constant dense<0.000000e+00> : vector<16x512xf32>
    %186 = tpu.matmul %178, %14, %cst_79 {dimension_numbers = #tpu.dot_dimension_numbers<[1], [0], [0], [1], [0, 0, 1, 1], [], []>} : vector<16x128xbf16>, vector<128x512xbf16>, vector<16x512xf32> -> vector<16x512xf32>
    %187 = arith.addf %185, %186 : vector<16x512xf32>
    %188 = vector.extract_strided_slice %187 {offsets = [0, 0], sizes = [16, 128], strides = [1, 1]} : vector<16x512xf32> to vector<16x128xf32>
    %cst_80 = arith.constant 5.000000e-01 : f32
    %189 = vector.broadcast %cst_80 : f32 to vector<16x128xf32>
    %190 = arith.mulf %189, %188 : vector<16x128xf32>
    %191 = math.tanh %190 : vector<16x128xf32>
    %cst_81 = arith.constant 5.000000e-01 : f32
    %192 = vector.broadcast %cst_81 : f32 to vector<16x128xf32>
    %193 = arith.mulf %192, %191 : vector<16x128xf32>
    %cst_82 = arith.constant 5.000000e-01 : f32
    %194 = vector.broadcast %cst_82 : f32 to vector<16x128xf32>
    %195 = arith.addf %193, %194 : vector<16x128xf32>
    %196 = vector.extract_strided_slice %187 {offsets = [0, 128], sizes = [16, 128], strides = [1, 1]} : vector<16x512xf32> to vector<16x128xf32>
    %cst_83 = arith.constant 5.000000e-01 : f32
    %197 = vector.broadcast %cst_83 : f32 to vector<16x128xf32>
    %198 = arith.mulf %197, %196 : vector<16x128xf32>
    %199 = math.tanh %198 : vector<16x128xf32>
    %cst_84 = arith.constant 5.000000e-01 : f32
    %200 = vector.broadcast %cst_84 : f32 to vector<16x128xf32>
    %201 = arith.mulf %200, %199 : vector<16x128xf32>
    %cst_85 = arith.constant 5.000000e-01 : f32
    %202 = vector.broadcast %cst_85 : f32 to vector<16x128xf32>
    %203 = arith.addf %201, %202 : vector<16x128xf32>
    %204 = vector.extract_strided_slice %187 {offsets = [0, 256], sizes = [16, 128], strides = [1, 1]} : vector<16x512xf32> to vector<16x128xf32>
    %205 = math.tanh %204 : vector<16x128xf32>
    %206 = vector.extract_strided_slice %187 {offsets = [0, 384], sizes = [16, 128], strides = [1, 1]} : vector<16x512xf32> to vector<16x128xf32>
    %cst_86 = arith.constant 5.000000e-01 : f32
    %207 = vector.broadcast %cst_86 : f32 to vector<16x128xf32>
    %208 = arith.mulf %207, %206 : vector<16x128xf32>
    %209 = math.tanh %208 : vector<16x128xf32>
    %cst_87 = arith.constant 5.000000e-01 : f32
    %210 = vector.broadcast %cst_87 : f32 to vector<16x128xf32>
    %211 = arith.mulf %210, %209 : vector<16x128xf32>
    %cst_88 = arith.constant 5.000000e-01 : f32
    %212 = vector.broadcast %cst_88 : f32 to vector<16x128xf32>
    %213 = arith.addf %211, %212 : vector<16x128xf32>
    %214 = arith.mulf %203, %175 : vector<16x128xf32>
    %215 = arith.mulf %195, %205 : vector<16x128xf32>
    %216 = arith.addf %214, %215 : vector<16x128xf32>
    %217 = math.tanh %216 : vector<16x128xf32>
    %218 = arith.mulf %213, %217 : vector<16x128xf32>
    %219 = arith.truncf %218 : vector<16x128xf32> to vector<16x128xbf16>
    %220 = arith.index_cast %c4_i32 : i32 to index
    %c0_89 = arith.constant 0 : index
    %c0_90 = arith.constant 0 : index
    %221 = vector.load %arg9[%220, %c0_89, %c0_90] : memref<8x16x128xbf16, #tpu.memory_space<vmem>>, vector<1x16x128xbf16>
    %222 = vector.shape_cast %221 : vector<1x16x128xbf16> to vector<16x128xbf16>
    %223 = vector.shape_cast %219 : vector<16x128xbf16> to vector<1x16x128xbf16>
    tpu.vector_store %arg9[%220, %c0_89, %c0_90], %223 {strides = array<i32>} : memref<8x16x128xbf16, #tpu.memory_space<vmem>>, vector<1x16x128xbf16>,
    %c5_i32 = arith.constant 5 : i32
    %224 = arith.index_cast %c5_i32 : i32 to index
    %c0_91 = arith.constant 0 : index
    %c0_92 = arith.constant 0 : index
    %225 = vector.load %arg10[%224, %c0_91, %c0_92] : memref<8x16x512xf32, #tpu.memory_space<vmem>>, vector<1x16x512xf32>
    %226 = vector.shape_cast %225 : vector<1x16x512xf32> to vector<16x512xf32>
    %cst_93 = arith.constant dense<0.000000e+00> : vector<16x512xf32>
    %227 = tpu.matmul %219, %14, %cst_93 {dimension_numbers = #tpu.dot_dimension_numbers<[1], [0], [0], [1], [0, 0, 1, 1], [], []>} : vector<16x128xbf16>, vector<128x512xbf16>, vector<16x512xf32> -> vector<16x512xf32>
    %228 = arith.addf %226, %227 : vector<16x512xf32>
    %229 = vector.extract_strided_slice %228 {offsets = [0, 0], sizes = [16, 128], strides = [1, 1]} : vector<16x512xf32> to vector<16x128xf32>
    %cst_94 = arith.constant 5.000000e-01 : f32
    %230 = vector.broadcast %cst_94 : f32 to vector<16x128xf32>
    %231 = arith.mulf %230, %229 : vector<16x128xf32>
    %232 = math.tanh %231 : vector<16x128xf32>
    %cst_95 = arith.constant 5.000000e-01 : f32
    %233 = vector.broadcast %cst_95 : f32 to vector<16x128xf32>
    %234 = arith.mulf %233, %232 : vector<16x128xf32>
    %cst_96 = arith.constant 5.000000e-01 : f32
    %235 = vector.broadcast %cst_96 : f32 to vector<16x128xf32>
    %236 = arith.addf %234, %235 : vector<16x128xf32>
    %237 = vector.extract_strided_slice %228 {offsets = [0, 128], sizes = [16, 128], strides = [1, 1]} : vector<16x512xf32> to vector<16x128xf32>
    %cst_97 = arith.constant 5.000000e-01 : f32
    %238 = vector.broadcast %cst_97 : f32 to vector<16x128xf32>
    %239 = arith.mulf %238, %237 : vector<16x128xf32>
    %240 = math.tanh %239 : vector<16x128xf32>
    %cst_98 = arith.constant 5.000000e-01 : f32
    %241 = vector.broadcast %cst_98 : f32 to vector<16x128xf32>
    %242 = arith.mulf %241, %240 : vector<16x128xf32>
    %cst_99 = arith.constant 5.000000e-01 : f32
    %243 = vector.broadcast %cst_99 : f32 to vector<16x128xf32>
    %244 = arith.addf %242, %243 : vector<16x128xf32>
    %245 = vector.extract_strided_slice %228 {offsets = [0, 256], sizes = [16, 128], strides = [1, 1]} : vector<16x512xf32> to vector<16x128xf32>
    %246 = math.tanh %245 : vector<16x128xf32>
    %247 = vector.extract_strided_slice %228 {offsets = [0, 384], sizes = [16, 128], strides = [1, 1]} : vector<16x512xf32> to vector<16x128xf32>
    %cst_100 = arith.constant 5.000000e-01 : f32
    %248 = vector.broadcast %cst_100 : f32 to vector<16x128xf32>
    %249 = arith.mulf %248, %247 : vector<16x128xf32>
    %250 = math.tanh %249 : vector<16x128xf32>
    %cst_101 = arith.constant 5.000000e-01 : f32
    %251 = vector.broadcast %cst_101 : f32 to vector<16x128xf32>
    %252 = arith.mulf %251, %250 : vector<16x128xf32>
    %cst_102 = arith.constant 5.000000e-01 : f32
    %253 = vector.broadcast %cst_102 : f32 to vector<16x128xf32>
    %254 = arith.addf %252, %253 : vector<16x128xf32>
    %255 = arith.mulf %244, %216 : vector<16x128xf32>
    %256 = arith.mulf %236, %246 : vector<16x128xf32>
    %257 = arith.addf %255, %256 : vector<16x128xf32>
    %258 = math.tanh %257 : vector<16x128xf32>
    %259 = arith.mulf %254, %258 : vector<16x128xf32>
    %260 = arith.truncf %259 : vector<16x128xf32> to vector<16x128xbf16>
    %261 = arith.index_cast %c5_i32 : i32 to index
    %c0_103 = arith.constant 0 : index
    %c0_104 = arith.constant 0 : index
    %262 = vector.load %arg9[%261, %c0_103, %c0_104] : memref<8x16x128xbf16, #tpu.memory_space<vmem>>, vector<1x16x128xbf16>
    %263 = vector.shape_cast %262 : vector<1x16x128xbf16> to vector<16x128xbf16>
    %264 = vector.shape_cast %260 : vector<16x128xbf16> to vector<1x16x128xbf16>
    tpu.vector_store %arg9[%261, %c0_103, %c0_104], %264 {strides = array<i32>} : memref<8x16x128xbf16, #tpu.memory_space<vmem>>, vector<1x16x128xbf16>,
    %c6_i32 = arith.constant 6 : i32
    %265 = arith.index_cast %c6_i32 : i32 to index
    %c0_105 = arith.constant 0 : index
    %c0_106 = arith.constant 0 : index
    %266 = vector.load %arg10[%265, %c0_105, %c0_106] : memref<8x16x512xf32, #tpu.memory_space<vmem>>, vector<1x16x512xf32>
    %267 = vector.shape_cast %266 : vector<1x16x512xf32> to vector<16x512xf32>
    %cst_107 = arith.constant dense<0.000000e+00> : vector<16x512xf32>
    %268 = tpu.matmul %260, %14, %cst_107 {dimension_numbers = #tpu.dot_dimension_numbers<[1], [0], [0], [1], [0, 0, 1, 1], [], []>} : vector<16x128xbf16>, vector<128x512xbf16>, vector<16x512xf32> -> vector<16x512xf32>
    %269 = arith.addf %267, %268 : vector<16x512xf32>
    %270 = vector.extract_strided_slice %269 {offsets = [0, 0], sizes = [16, 128], strides = [1, 1]} : vector<16x512xf32> to vector<16x128xf32>
    %cst_108 = arith.constant 5.000000e-01 : f32
    %271 = vector.broadcast %cst_108 : f32 to vector<16x128xf32>
    %272 = arith.mulf %271, %270 : vector<16x128xf32>
    %273 = math.tanh %272 : vector<16x128xf32>
    %cst_109 = arith.constant 5.000000e-01 : f32
    %274 = vector.broadcast %cst_109 : f32 to vector<16x128xf32>
    %275 = arith.mulf %274, %273 : vector<16x128xf32>
    %cst_110 = arith.constant 5.000000e-01 : f32
    %276 = vector.broadcast %cst_110 : f32 to vector<16x128xf32>
    %277 = arith.addf %275, %276 : vector<16x128xf32>
    %278 = vector.extract_strided_slice %269 {offsets = [0, 128], sizes = [16, 128], strides = [1, 1]} : vector<16x512xf32> to vector<16x128xf32>
    %cst_111 = arith.constant 5.000000e-01 : f32
    %279 = vector.broadcast %cst_111 : f32 to vector<16x128xf32>
    %280 = arith.mulf %279, %278 : vector<16x128xf32>
    %281 = math.tanh %280 : vector<16x128xf32>
    %cst_112 = arith.constant 5.000000e-01 : f32
    %282 = vector.broadcast %cst_112 : f32 to vector<16x128xf32>
    %283 = arith.mulf %282, %281 : vector<16x128xf32>
    %cst_113 = arith.constant 5.000000e-01 : f32
    %284 = vector.broadcast %cst_113 : f32 to vector<16x128xf32>
    %285 = arith.addf %283, %284 : vector<16x128xf32>
    %286 = vector.extract_strided_slice %269 {offsets = [0, 256], sizes = [16, 128], strides = [1, 1]} : vector<16x512xf32> to vector<16x128xf32>
    %287 = math.tanh %286 : vector<16x128xf32>
    %288 = vector.extract_strided_slice %269 {offsets = [0, 384], sizes = [16, 128], strides = [1, 1]} : vector<16x512xf32> to vector<16x128xf32>
    %cst_114 = arith.constant 5.000000e-01 : f32
    %289 = vector.broadcast %cst_114 : f32 to vector<16x128xf32>
    %290 = arith.mulf %289, %288 : vector<16x128xf32>
    %291 = math.tanh %290 : vector<16x128xf32>
    %cst_115 = arith.constant 5.000000e-01 : f32
    %292 = vector.broadcast %cst_115 : f32 to vector<16x128xf32>
    %293 = arith.mulf %292, %291 : vector<16x128xf32>
    %cst_116 = arith.constant 5.000000e-01 : f32
    %294 = vector.broadcast %cst_116 : f32 to vector<16x128xf32>
    %295 = arith.addf %293, %294 : vector<16x128xf32>
    %296 = arith.mulf %285, %257 : vector<16x128xf32>
    %297 = arith.mulf %277, %287 : vector<16x128xf32>
    %298 = arith.addf %296, %297 : vector<16x128xf32>
    %299 = math.tanh %298 : vector<16x128xf32>
    %300 = arith.mulf %295, %299 : vector<16x128xf32>
    %301 = arith.truncf %300 : vector<16x128xf32> to vector<16x128xbf16>
    %302 = arith.index_cast %c6_i32 : i32 to index
    %c0_117 = arith.constant 0 : index
    %c0_118 = arith.constant 0 : index
    %303 = vector.load %arg9[%302, %c0_117, %c0_118] : memref<8x16x128xbf16, #tpu.memory_space<vmem>>, vector<1x16x128xbf16>
    %304 = vector.shape_cast %303 : vector<1x16x128xbf16> to vector<16x128xbf16>
    %305 = vector.shape_cast %301 : vector<16x128xbf16> to vector<1x16x128xbf16>
    tpu.vector_store %arg9[%302, %c0_117, %c0_118], %305 {strides = array<i32>} : memref<8x16x128xbf16, #tpu.memory_space<vmem>>, vector<1x16x128xbf16>,
    %c7_i32 = arith.constant 7 : i32
    %306 = arith.index_cast %c7_i32 : i32 to index
    %c0_119 = arith.constant 0 : index
    %c0_120 = arith.constant 0 : index
    %307 = vector.load %arg10[%306, %c0_119, %c0_120] : memref<8x16x512xf32, #tpu.memory_space<vmem>>, vector<1x16x512xf32>
    %308 = vector.shape_cast %307 : vector<1x16x512xf32> to vector<16x512xf32>
    %cst_121 = arith.constant dense<0.000000e+00> : vector<16x512xf32>
    %309 = tpu.matmul %301, %14, %cst_121 {dimension_numbers = #tpu.dot_dimension_numbers<[1], [0], [0], [1], [0, 0, 1, 1], [], []>} : vector<16x128xbf16>, vector<128x512xbf16>, vector<16x512xf32> -> vector<16x512xf32>
    %310 = arith.addf %308, %309 : vector<16x512xf32>
    %311 = vector.extract_strided_slice %310 {offsets = [0, 0], sizes = [16, 128], strides = [1, 1]} : vector<16x512xf32> to vector<16x128xf32>
    %cst_122 = arith.constant 5.000000e-01 : f32
    %312 = vector.broadcast %cst_122 : f32 to vector<16x128xf32>
    %313 = arith.mulf %312, %311 : vector<16x128xf32>
    %314 = math.tanh %313 : vector<16x128xf32>
    %cst_123 = arith.constant 5.000000e-01 : f32
    %315 = vector.broadcast %cst_123 : f32 to vector<16x128xf32>
    %316 = arith.mulf %315, %314 : vector<16x128xf32>
    %cst_124 = arith.constant 5.000000e-01 : f32
    %317 = vector.broadcast %cst_124 : f32 to vector<16x128xf32>
    %318 = arith.addf %316, %317 : vector<16x128xf32>
    %319 = vector.extract_strided_slice %310 {offsets = [0, 128], sizes = [16, 128], strides = [1, 1]} : vector<16x512xf32> to vector<16x128xf32>
    %cst_125 = arith.constant 5.000000e-01 : f32
    %320 = vector.broadcast %cst_125 : f32 to vector<16x128xf32>
    %321 = arith.mulf %320, %319 : vector<16x128xf32>
    %322 = math.tanh %321 : vector<16x128xf32>
    %cst_126 = arith.constant 5.000000e-01 : f32
    %323 = vector.broadcast %cst_126 : f32 to vector<16x128xf32>
    %324 = arith.mulf %323, %322 : vector<16x128xf32>
    %cst_127 = arith.constant 5.000000e-01 : f32
    %325 = vector.broadcast %cst_127 : f32 to vector<16x128xf32>
    %326 = arith.addf %324, %325 : vector<16x128xf32>
    %327 = vector.extract_strided_slice %310 {offsets = [0, 256], sizes = [16, 128], strides = [1, 1]} : vector<16x512xf32> to vector<16x128xf32>
    %328 = math.tanh %327 : vector<16x128xf32>
    %329 = vector.extract_strided_slice %310 {offsets = [0, 384], sizes = [16, 128], strides = [1, 1]} : vector<16x512xf32> to vector<16x128xf32>
    %cst_128 = arith.constant 5.000000e-01 : f32
    %330 = vector.broadcast %cst_128 : f32 to vector<16x128xf32>
    %331 = arith.mulf %330, %329 : vector<16x128xf32>
    %332 = math.tanh %331 : vector<16x128xf32>
    %cst_129 = arith.constant 5.000000e-01 : f32
    %333 = vector.broadcast %cst_129 : f32 to vector<16x128xf32>
    %334 = arith.mulf %333, %332 : vector<16x128xf32>
    %cst_130 = arith.constant 5.000000e-01 : f32
    %335 = vector.broadcast %cst_130 : f32 to vector<16x128xf32>
    %336 = arith.addf %334, %335 : vector<16x128xf32>
    %337 = arith.mulf %326, %298 : vector<16x128xf32>
    %338 = arith.mulf %318, %328 : vector<16x128xf32>
    %339 = arith.addf %337, %338 : vector<16x128xf32>
    %340 = math.tanh %339 : vector<16x128xf32>
    %341 = arith.mulf %336, %340 : vector<16x128xf32>
    %342 = arith.truncf %341 : vector<16x128xf32> to vector<16x128xbf16>
    %343 = arith.index_cast %c7_i32 : i32 to index
    %c0_131 = arith.constant 0 : index
    %c0_132 = arith.constant 0 : index
    %344 = vector.load %arg9[%343, %c0_131, %c0_132] : memref<8x16x128xbf16, #tpu.memory_space<vmem>>, vector<1x16x128xbf16>
    %345 = vector.shape_cast %344 : vector<1x16x128xbf16> to vector<16x128xbf16>
    %346 = vector.shape_cast %342 : vector<16x128xbf16> to vector<1x16x128xbf16>
    tpu.vector_store %arg9[%343, %c0_131, %c0_132], %346 {strides = array<i32>} : memref<8x16x128xbf16, #tpu.memory_space<vmem>>, vector<1x16x128xbf16>,
    %c8_i32 = arith.constant 8 : i32
    %c0_133 = arith.constant 0 : index
    %c0_134 = arith.constant 0 : index
    %c0_135 = arith.constant 0 : index
    %347 = vector.load %arg7[%c0_133, %c0_134, %c0_135] : memref<2x16x128xbf16, #tpu.memory_space<vmem>>, vector<1x16x128xbf16>
    %348 = vector.shape_cast %347 : vector<1x16x128xbf16> to vector<16x128xbf16>
    %349 = vector.shape_cast %342 : vector<16x128xbf16> to vector<1x16x128xbf16>
    tpu.vector_store %arg7[%c0_133, %c0_134, %c0_135], %349 {strides = array<i32>} : memref<2x16x128xbf16, #tpu.memory_space<vmem>>, vector<1x16x128xbf16>,
    %c0_136 = arith.constant 0 : index
    %c0_137 = arith.constant 0 : index
    %c0_138 = arith.constant 0 : index
    %350 = vector.load %arg8[%c0_136, %c0_137, %c0_138] : memref<2x16x128xf32, #tpu.memory_space<vmem>>, vector<1x16x128xf32>
    %351 = vector.shape_cast %350 : vector<1x16x128xf32> to vector<16x128xf32>
    %352 = vector.shape_cast %339 : vector<16x128xf32> to vector<1x16x128xf32>
    tpu.vector_store %arg8[%c0_136, %c0_137, %c0_138], %352 {strides = array<i32>} : memref<2x16x128xf32, #tpu.memory_space<vmem>>, vector<1x16x128xf32>,
    %c0_139 = arith.constant 0 : index
    %c0_140 = arith.constant 0 : index
    %c0_141 = arith.constant 0 : index
    %353 = vector.load %arg9[%c0_139, %c0_140, %c0_141] : memref<8x16x128xbf16, #tpu.memory_space<vmem>>, vector<8x16x128xbf16>
    %354 = vector.shape_cast %353 : vector<8x16x128xbf16> to vector<128x128xbf16>
    %c0_142 = arith.constant 0 : index
    %c0_143 = arith.constant 0 : index
    %c0_144 = arith.constant 0 : index
    %355 = vector.load %arg3[%c0_142, %c0_143, %c0_144] : memref<1x128x512xbf16, #tpu.memory_space<vmem>>, vector<1x128x512xbf16>
    %356 = vector.shape_cast %355 : vector<1x128x512xbf16> to vector<128x512xbf16>
    %cst_145 = arith.constant dense<0.000000e+00> : vector<128x512xf32>
    %357 = tpu.matmul %354, %356, %cst_145 {dimension_numbers = #tpu.dot_dimension_numbers<[1], [0], [0], [1], [0, 0, 1, 1], [], []>} : vector<128x128xbf16>, vector<128x512xbf16>, vector<128x512xf32> -> vector<128x512xf32>
    %c1 = arith.constant 1 : index
    %c0_146 = arith.constant 0 : index
    %c0_147 = arith.constant 0 : index
    %358 = vector.load %arg5[%c1, %c0_146, %c0_147] : memref<2x1x512xf32, #tpu.memory_space<vmem>>, vector<1x1x512xf32>
    %359 = vector.shape_cast %358 : vector<1x1x512xf32> to vector<1x512xf32>
    %360 = vector.broadcast %359 : vector<1x512xf32> to vector<128x512xf32>
    %361 = arith.addf %357, %360 : vector<128x512xf32>
    %362 = vector.shape_cast %361 : vector<128x512xf32> to vector<8x16x512xf32>
    %c0_148 = arith.constant 0 : index
    %c0_149 = arith.constant 0 : index
    %c0_150 = arith.constant 0 : index
    %363 = vector.load %arg10[%c0_148, %c0_149, %c0_150] : memref<8x16x512xf32, #tpu.memory_space<vmem>>, vector<8x16x512xf32>
    tpu.vector_store %arg10[%c0_148, %c0_149, %c0_150], %362 {strides = array<i32>} : memref<8x16x512xf32, #tpu.memory_space<vmem>>, vector<8x16x512xf32>,
    %c1_151 = arith.constant 1 : index
    %c0_152 = arith.constant 0 : index
    %c0_153 = arith.constant 0 : index
    %364 = vector.load %arg4[%c1_151, %c0_152, %c0_153] : memref<2x128x512xbf16, #tpu.memory_space<vmem>>, vector<1x128x512xbf16>
    %365 = vector.shape_cast %364 : vector<1x128x512xbf16> to vector<128x512xbf16>
    %c1_154 = arith.constant 1 : index
    %c0_155 = arith.constant 0 : index
    %c0_156 = arith.constant 0 : index
    %366 = vector.load %arg7[%c1_154, %c0_155, %c0_156] : memref<2x16x128xbf16, #tpu.memory_space<vmem>>, vector<1x16x128xbf16>
    %367 = vector.shape_cast %366 : vector<1x16x128xbf16> to vector<16x128xbf16>
    %c1_157 = arith.constant 1 : index
    %c0_158 = arith.constant 0 : index
    %c0_159 = arith.constant 0 : index
    %368 = vector.load %arg8[%c1_157, %c0_158, %c0_159] : memref<2x16x128xf32, #tpu.memory_space<vmem>>, vector<1x16x128xf32>
    %369 = vector.shape_cast %368 : vector<1x16x128xf32> to vector<16x128xf32>
    %c0_i32_160 = arith.constant 0 : i32
    %370 = arith.index_cast %c0_i32_160 : i32 to index
    %c0_161 = arith.constant 0 : index
    %c0_162 = arith.constant 0 : index
    %371 = vector.load %arg10[%370, %c0_161, %c0_162] : memref<8x16x512xf32, #tpu.memory_space<vmem>>, vector<1x16x512xf32>
    %372 = vector.shape_cast %371 : vector<1x16x512xf32> to vector<16x512xf32>
    %cst_163 = arith.constant dense<0.000000e+00> : vector<16x512xf32>
    %373 = tpu.matmul %367, %365, %cst_163 {dimension_numbers = #tpu.dot_dimension_numbers<[1], [0], [0], [1], [0, 0, 1, 1], [], []>} : vector<16x128xbf16>, vector<128x512xbf16>, vector<16x512xf32> -> vector<16x512xf32>
    %374 = arith.addf %372, %373 : vector<16x512xf32>
    %375 = vector.extract_strided_slice %374 {offsets = [0, 0], sizes = [16, 128], strides = [1, 1]} : vector<16x512xf32> to vector<16x128xf32>
    %cst_164 = arith.constant 5.000000e-01 : f32
    %376 = vector.broadcast %cst_164 : f32 to vector<16x128xf32>
    %377 = arith.mulf %376, %375 : vector<16x128xf32>
    %378 = math.tanh %377 : vector<16x128xf32>
    %cst_165 = arith.constant 5.000000e-01 : f32
    %379 = vector.broadcast %cst_165 : f32 to vector<16x128xf32>
    %380 = arith.mulf %379, %378 : vector<16x128xf32>
    %cst_166 = arith.constant 5.000000e-01 : f32
    %381 = vector.broadcast %cst_166 : f32 to vector<16x128xf32>
    %382 = arith.addf %380, %381 : vector<16x128xf32>
    %383 = vector.extract_strided_slice %374 {offsets = [0, 128], sizes = [16, 128], strides = [1, 1]} : vector<16x512xf32> to vector<16x128xf32>
    %cst_167 = arith.constant 5.000000e-01 : f32
    %384 = vector.broadcast %cst_167 : f32 to vector<16x128xf32>
    %385 = arith.mulf %384, %383 : vector<16x128xf32>
    %386 = math.tanh %385 : vector<16x128xf32>
    %cst_168 = arith.constant 5.000000e-01 : f32
    %387 = vector.broadcast %cst_168 : f32 to vector<16x128xf32>
    %388 = arith.mulf %387, %386 : vector<16x128xf32>
    %cst_169 = arith.constant 5.000000e-01 : f32
    %389 = vector.broadcast %cst_169 : f32 to vector<16x128xf32>
    %390 = arith.addf %388, %389 : vector<16x128xf32>
    %391 = vector.extract_strided_slice %374 {offsets = [0, 256], sizes = [16, 128], strides = [1, 1]} : vector<16x512xf32> to vector<16x128xf32>
    %392 = math.tanh %391 : vector<16x128xf32>
    %393 = vector.extract_strided_slice %374 {offsets = [0, 384], sizes = [16, 128], strides = [1, 1]} : vector<16x512xf32> to vector<16x128xf32>
    %cst_170 = arith.constant 5.000000e-01 : f32
    %394 = vector.broadcast %cst_170 : f32 to vector<16x128xf32>
    %395 = arith.mulf %394, %393 : vector<16x128xf32>
    %396 = math.tanh %395 : vector<16x128xf32>
    %cst_171 = arith.constant 5.000000e-01 : f32
    %397 = vector.broadcast %cst_171 : f32 to vector<16x128xf32>
    %398 = arith.mulf %397, %396 : vector<16x128xf32>
    %cst_172 = arith.constant 5.000000e-01 : f32
    %399 = vector.broadcast %cst_172 : f32 to vector<16x128xf32>
    %400 = arith.addf %398, %399 : vector<16x128xf32>
    %401 = arith.mulf %390, %369 : vector<16x128xf32>
    %402 = arith.mulf %382, %392 : vector<16x128xf32>
    %403 = arith.addf %401, %402 : vector<16x128xf32>
    %404 = math.tanh %403 : vector<16x128xf32>
    %405 = arith.mulf %400, %404 : vector<16x128xf32>
    %406 = arith.truncf %405 : vector<16x128xf32> to vector<16x128xbf16>
    %c1_i32_173 = arith.constant 1 : i32
    %407 = arith.index_cast %c1_i32_173 : i32 to index
    %c0_174 = arith.constant 0 : index
    %c0_175 = arith.constant 0 : index
    %408 = vector.load %arg10[%407, %c0_174, %c0_175] : memref<8x16x512xf32, #tpu.memory_space<vmem>>, vector<1x16x512xf32>
    %409 = vector.shape_cast %408 : vector<1x16x512xf32> to vector<16x512xf32>
    %cst_176 = arith.constant dense<0.000000e+00> : vector<16x512xf32>
    %410 = tpu.matmul %406, %365, %cst_176 {dimension_numbers = #tpu.dot_dimension_numbers<[1], [0], [0], [1], [0, 0, 1, 1], [], []>} : vector<16x128xbf16>, vector<128x512xbf16>, vector<16x512xf32> -> vector<16x512xf32>
    %411 = arith.addf %409, %410 : vector<16x512xf32>
    %412 = vector.extract_strided_slice %411 {offsets = [0, 0], sizes = [16, 128], strides = [1, 1]} : vector<16x512xf32> to vector<16x128xf32>
    %cst_177 = arith.constant 5.000000e-01 : f32
    %413 = vector.broadcast %cst_177 : f32 to vector<16x128xf32>
    %414 = arith.mulf %413, %412 : vector<16x128xf32>
    %415 = math.tanh %414 : vector<16x128xf32>
    %cst_178 = arith.constant 5.000000e-01 : f32
    %416 = vector.broadcast %cst_178 : f32 to vector<16x128xf32>
    %417 = arith.mulf %416, %415 : vector<16x128xf32>
    %cst_179 = arith.constant 5.000000e-01 : f32
    %418 = vector.broadcast %cst_179 : f32 to vector<16x128xf32>
    %419 = arith.addf %417, %418 : vector<16x128xf32>
    %420 = vector.extract_strided_slice %411 {offsets = [0, 128], sizes = [16, 128], strides = [1, 1]} : vector<16x512xf32> to vector<16x128xf32>
    %cst_180 = arith.constant 5.000000e-01 : f32
    %421 = vector.broadcast %cst_180 : f32 to vector<16x128xf32>
    %422 = arith.mulf %421, %420 : vector<16x128xf32>
    %423 = math.tanh %422 : vector<16x128xf32>
    %cst_181 = arith.constant 5.000000e-01 : f32
    %424 = vector.broadcast %cst_181 : f32 to vector<16x128xf32>
    %425 = arith.mulf %424, %423 : vector<16x128xf32>
    %cst_182 = arith.constant 5.000000e-01 : f32
    %426 = vector.broadcast %cst_182 : f32 to vector<16x128xf32>
    %427 = arith.addf %425, %426 : vector<16x128xf32>
    %428 = vector.extract_strided_slice %411 {offsets = [0, 256], sizes = [16, 128], strides = [1, 1]} : vector<16x512xf32> to vector<16x128xf32>
    %429 = math.tanh %428 : vector<16x128xf32>
    %430 = vector.extract_strided_slice %411 {offsets = [0, 384], sizes = [16, 128], strides = [1, 1]} : vector<16x512xf32> to vector<16x128xf32>
    %cst_183 = arith.constant 5.000000e-01 : f32
    %431 = vector.broadcast %cst_183 : f32 to vector<16x128xf32>
    %432 = arith.mulf %431, %430 : vector<16x128xf32>
    %433 = math.tanh %432 : vector<16x128xf32>
    %cst_184 = arith.constant 5.000000e-01 : f32
    %434 = vector.broadcast %cst_184 : f32 to vector<16x128xf32>
    %435 = arith.mulf %434, %433 : vector<16x128xf32>
    %cst_185 = arith.constant 5.000000e-01 : f32
    %436 = vector.broadcast %cst_185 : f32 to vector<16x128xf32>
    %437 = arith.addf %435, %436 : vector<16x128xf32>
    %438 = arith.mulf %427, %403 : vector<16x128xf32>
    %439 = arith.mulf %419, %429 : vector<16x128xf32>
    %440 = arith.addf %438, %439 : vector<16x128xf32>
    %441 = math.tanh %440 : vector<16x128xf32>
    %442 = arith.mulf %437, %441 : vector<16x128xf32>
    %443 = arith.truncf %442 : vector<16x128xf32> to vector<16x128xbf16>
    %c2_i32_186 = arith.constant 2 : i32
    %444 = arith.index_cast %c2_i32_186 : i32 to index
    %c0_187 = arith.constant 0 : index
    %c0_188 = arith.constant 0 : index
    %445 = vector.load %arg10[%444, %c0_187, %c0_188] : memref<8x16x512xf32, #tpu.memory_space<vmem>>, vector<1x16x512xf32>
    %446 = vector.shape_cast %445 : vector<1x16x512xf32> to vector<16x512xf32>
    %cst_189 = arith.constant dense<0.000000e+00> : vector<16x512xf32>
    %447 = tpu.matmul %443, %365, %cst_189 {dimension_numbers = #tpu.dot_dimension_numbers<[1], [0], [0], [1], [0, 0, 1, 1], [], []>} : vector<16x128xbf16>, vector<128x512xbf16>, vector<16x512xf32> -> vector<16x512xf32>
    %448 = arith.addf %446, %447 : vector<16x512xf32>
    %449 = vector.extract_strided_slice %448 {offsets = [0, 0], sizes = [16, 128], strides = [1, 1]} : vector<16x512xf32> to vector<16x128xf32>
    %cst_190 = arith.constant 5.000000e-01 : f32
    %450 = vector.broadcast %cst_190 : f32 to vector<16x128xf32>
    %451 = arith.mulf %450, %449 : vector<16x128xf32>
    %452 = math.tanh %451 : vector<16x128xf32>
    %cst_191 = arith.constant 5.000000e-01 : f32
    %453 = vector.broadcast %cst_191 : f32 to vector<16x128xf32>
    %454 = arith.mulf %453, %452 : vector<16x128xf32>
    %cst_192 = arith.constant 5.000000e-01 : f32
    %455 = vector.broadcast %cst_192 : f32 to vector<16x128xf32>
    %456 = arith.addf %454, %455 : vector<16x128xf32>
    %457 = vector.extract_strided_slice %448 {offsets = [0, 128], sizes = [16, 128], strides = [1, 1]} : vector<16x512xf32> to vector<16x128xf32>
    %cst_193 = arith.constant 5.000000e-01 : f32
    %458 = vector.broadcast %cst_193 : f32 to vector<16x128xf32>
    %459 = arith.mulf %458, %457 : vector<16x128xf32>
    %460 = math.tanh %459 : vector<16x128xf32>
    %cst_194 = arith.constant 5.000000e-01 : f32
    %461 = vector.broadcast %cst_194 : f32 to vector<16x128xf32>
    %462 = arith.mulf %461, %460 : vector<16x128xf32>
    %cst_195 = arith.constant 5.000000e-01 : f32
    %463 = vector.broadcast %cst_195 : f32 to vector<16x128xf32>
    %464 = arith.addf %462, %463 : vector<16x128xf32>
    %465 = vector.extract_strided_slice %448 {offsets = [0, 256], sizes = [16, 128], strides = [1, 1]} : vector<16x512xf32> to vector<16x128xf32>
    %466 = math.tanh %465 : vector<16x128xf32>
    %467 = vector.extract_strided_slice %448 {offsets = [0, 384], sizes = [16, 128], strides = [1, 1]} : vector<16x512xf32> to vector<16x128xf32>
    %cst_196 = arith.constant 5.000000e-01 : f32
    %468 = vector.broadcast %cst_196 : f32 to vector<16x128xf32>
    %469 = arith.mulf %468, %467 : vector<16x128xf32>
    %470 = math.tanh %469 : vector<16x128xf32>
    %cst_197 = arith.constant 5.000000e-01 : f32
    %471 = vector.broadcast %cst_197 : f32 to vector<16x128xf32>
    %472 = arith.mulf %471, %470 : vector<16x128xf32>
    %cst_198 = arith.constant 5.000000e-01 : f32
    %473 = vector.broadcast %cst_198 : f32 to vector<16x128xf32>
    %474 = arith.addf %472, %473 : vector<16x128xf32>
    %475 = arith.mulf %464, %440 : vector<16x128xf32>
    %476 = arith.mulf %456, %466 : vector<16x128xf32>
    %477 = arith.addf %475, %476 : vector<16x128xf32>
    %478 = math.tanh %477 : vector<16x128xf32>
    %479 = arith.mulf %474, %478 : vector<16x128xf32>
    %480 = arith.truncf %479 : vector<16x128xf32> to vector<16x128xbf16>
    %c3_i32_199 = arith.constant 3 : i32
    %481 = arith.index_cast %c3_i32_199 : i32 to index
    %c0_200 = arith.constant 0 : index
    %c0_201 = arith.constant 0 : index
    %482 = vector.load %arg10[%481, %c0_200, %c0_201] : memref<8x16x512xf32, #tpu.memory_space<vmem>>, vector<1x16x512xf32>
    %483 = vector.shape_cast %482 : vector<1x16x512xf32> to vector<16x512xf32>
    %cst_202 = arith.constant dense<0.000000e+00> : vector<16x512xf32>
    %484 = tpu.matmul %480, %365, %cst_202 {dimension_numbers = #tpu.dot_dimension_numbers<[1], [0], [0], [1], [0, 0, 1, 1], [], []>} : vector<16x128xbf16>, vector<128x512xbf16>, vector<16x512xf32> -> vector<16x512xf32>
    %485 = arith.addf %483, %484 : vector<16x512xf32>
    %486 = vector.extract_strided_slice %485 {offsets = [0, 0], sizes = [16, 128], strides = [1, 1]} : vector<16x512xf32> to vector<16x128xf32>
    %cst_203 = arith.constant 5.000000e-01 : f32
    %487 = vector.broadcast %cst_203 : f32 to vector<16x128xf32>
    %488 = arith.mulf %487, %486 : vector<16x128xf32>
    %489 = math.tanh %488 : vector<16x128xf32>
    %cst_204 = arith.constant 5.000000e-01 : f32
    %490 = vector.broadcast %cst_204 : f32 to vector<16x128xf32>
    %491 = arith.mulf %490, %489 : vector<16x128xf32>
    %cst_205 = arith.constant 5.000000e-01 : f32
    %492 = vector.broadcast %cst_205 : f32 to vector<16x128xf32>
    %493 = arith.addf %491, %492 : vector<16x128xf32>
    %494 = vector.extract_strided_slice %485 {offsets = [0, 128], sizes = [16, 128], strides = [1, 1]} : vector<16x512xf32> to vector<16x128xf32>
    %cst_206 = arith.constant 5.000000e-01 : f32
    %495 = vector.broadcast %cst_206 : f32 to vector<16x128xf32>
    %496 = arith.mulf %495, %494 : vector<16x128xf32>
    %497 = math.tanh %496 : vector<16x128xf32>
    %cst_207 = arith.constant 5.000000e-01 : f32
    %498 = vector.broadcast %cst_207 : f32 to vector<16x128xf32>
    %499 = arith.mulf %498, %497 : vector<16x128xf32>
    %cst_208 = arith.constant 5.000000e-01 : f32
    %500 = vector.broadcast %cst_208 : f32 to vector<16x128xf32>
    %501 = arith.addf %499, %500 : vector<16x128xf32>
    %502 = vector.extract_strided_slice %485 {offsets = [0, 256], sizes = [16, 128], strides = [1, 1]} : vector<16x512xf32> to vector<16x128xf32>
    %503 = math.tanh %502 : vector<16x128xf32>
    %504 = vector.extract_strided_slice %485 {offsets = [0, 384], sizes = [16, 128], strides = [1, 1]} : vector<16x512xf32> to vector<16x128xf32>
    %cst_209 = arith.constant 5.000000e-01 : f32
    %505 = vector.broadcast %cst_209 : f32 to vector<16x128xf32>
    %506 = arith.mulf %505, %504 : vector<16x128xf32>
    %507 = math.tanh %506 : vector<16x128xf32>
    %cst_210 = arith.constant 5.000000e-01 : f32
    %508 = vector.broadcast %cst_210 : f32 to vector<16x128xf32>
    %509 = arith.mulf %508, %507 : vector<16x128xf32>
    %cst_211 = arith.constant 5.000000e-01 : f32
    %510 = vector.broadcast %cst_211 : f32 to vector<16x128xf32>
    %511 = arith.addf %509, %510 : vector<16x128xf32>
    %512 = arith.mulf %501, %477 : vector<16x128xf32>
    %513 = arith.mulf %493, %503 : vector<16x128xf32>
    %514 = arith.addf %512, %513 : vector<16x128xf32>
    %515 = math.tanh %514 : vector<16x128xf32>
    %516 = arith.mulf %511, %515 : vector<16x128xf32>
    %517 = arith.truncf %516 : vector<16x128xf32> to vector<16x128xbf16>
    %c4_i32_212 = arith.constant 4 : i32
    %518 = arith.index_cast %c4_i32_212 : i32 to index
    %c0_213 = arith.constant 0 : index
    %c0_214 = arith.constant 0 : index
    %519 = vector.load %arg10[%518, %c0_213, %c0_214] : memref<8x16x512xf32, #tpu.memory_space<vmem>>, vector<1x16x512xf32>
    %520 = vector.shape_cast %519 : vector<1x16x512xf32> to vector<16x512xf32>
    %cst_215 = arith.constant dense<0.000000e+00> : vector<16x512xf32>
    %521 = tpu.matmul %517, %365, %cst_215 {dimension_numbers = #tpu.dot_dimension_numbers<[1], [0], [0], [1], [0, 0, 1, 1], [], []>} : vector<16x128xbf16>, vector<128x512xbf16>, vector<16x512xf32> -> vector<16x512xf32>
    %522 = arith.addf %520, %521 : vector<16x512xf32>
    %523 = vector.extract_strided_slice %522 {offsets = [0, 0], sizes = [16, 128], strides = [1, 1]} : vector<16x512xf32> to vector<16x128xf32>
    %cst_216 = arith.constant 5.000000e-01 : f32
    %524 = vector.broadcast %cst_216 : f32 to vector<16x128xf32>
    %525 = arith.mulf %524, %523 : vector<16x128xf32>
    %526 = math.tanh %525 : vector<16x128xf32>
    %cst_217 = arith.constant 5.000000e-01 : f32
    %527 = vector.broadcast %cst_217 : f32 to vector<16x128xf32>
    %528 = arith.mulf %527, %526 : vector<16x128xf32>
    %cst_218 = arith.constant 5.000000e-01 : f32
    %529 = vector.broadcast %cst_218 : f32 to vector<16x128xf32>
    %530 = arith.addf %528, %529 : vector<16x128xf32>
    %531 = vector.extract_strided_slice %522 {offsets = [0, 128], sizes = [16, 128], strides = [1, 1]} : vector<16x512xf32> to vector<16x128xf32>
    %cst_219 = arith.constant 5.000000e-01 : f32
    %532 = vector.broadcast %cst_219 : f32 to vector<16x128xf32>
    %533 = arith.mulf %532, %531 : vector<16x128xf32>
    %534 = math.tanh %533 : vector<16x128xf32>
    %cst_220 = arith.constant 5.000000e-01 : f32
    %535 = vector.broadcast %cst_220 : f32 to vector<16x128xf32>
    %536 = arith.mulf %535, %534 : vector<16x128xf32>
    %cst_221 = arith.constant 5.000000e-01 : f32
    %537 = vector.broadcast %cst_221 : f32 to vector<16x128xf32>
    %538 = arith.addf %536, %537 : vector<16x128xf32>
    %539 = vector.extract_strided_slice %522 {offsets = [0, 256], sizes = [16, 128], strides = [1, 1]} : vector<16x512xf32> to vector<16x128xf32>
    %540 = math.tanh %539 : vector<16x128xf32>
    %541 = vector.extract_strided_slice %522 {offsets = [0, 384], sizes = [16, 128], strides = [1, 1]} : vector<16x512xf32> to vector<16x128xf32>
    %cst_222 = arith.constant 5.000000e-01 : f32
    %542 = vector.broadcast %cst_222 : f32 to vector<16x128xf32>
    %543 = arith.mulf %542, %541 : vector<16x128xf32>
    %544 = math.tanh %543 : vector<16x128xf32>
    %cst_223 = arith.constant 5.000000e-01 : f32
    %545 = vector.broadcast %cst_223 : f32 to vector<16x128xf32>
    %546 = arith.mulf %545, %544 : vector<16x128xf32>
    %cst_224 = arith.constant 5.000000e-01 : f32
    %547 = vector.broadcast %cst_224 : f32 to vector<16x128xf32>
    %548 = arith.addf %546, %547 : vector<16x128xf32>
    %549 = arith.mulf %538, %514 : vector<16x128xf32>
    %550 = arith.mulf %530, %540 : vector<16x128xf32>
    %551 = arith.addf %549, %550 : vector<16x128xf32>
    %552 = math.tanh %551 : vector<16x128xf32>
    %553 = arith.mulf %548, %552 : vector<16x128xf32>
    %554 = arith.truncf %553 : vector<16x128xf32> to vector<16x128xbf16>
    %c5_i32_225 = arith.constant 5 : i32
    %555 = arith.index_cast %c5_i32_225 : i32 to index
    %c0_226 = arith.constant 0 : index
    %c0_227 = arith.constant 0 : index
    %556 = vector.load %arg10[%555, %c0_226, %c0_227] : memref<8x16x512xf32, #tpu.memory_space<vmem>>, vector<1x16x512xf32>
    %557 = vector.shape_cast %556 : vector<1x16x512xf32> to vector<16x512xf32>
    %cst_228 = arith.constant dense<0.000000e+00> : vector<16x512xf32>
    %558 = tpu.matmul %554, %365, %cst_228 {dimension_numbers = #tpu.dot_dimension_numbers<[1], [0], [0], [1], [0, 0, 1, 1], [], []>} : vector<16x128xbf16>, vector<128x512xbf16>, vector<16x512xf32> -> vector<16x512xf32>
    %559 = arith.addf %557, %558 : vector<16x512xf32>
    %560 = vector.extract_strided_slice %559 {offsets = [0, 0], sizes = [16, 128], strides = [1, 1]} : vector<16x512xf32> to vector<16x128xf32>
    %cst_229 = arith.constant 5.000000e-01 : f32
    %561 = vector.broadcast %cst_229 : f32 to vector<16x128xf32>
    %562 = arith.mulf %561, %560 : vector<16x128xf32>
    %563 = math.tanh %562 : vector<16x128xf32>
    %cst_230 = arith.constant 5.000000e-01 : f32
    %564 = vector.broadcast %cst_230 : f32 to vector<16x128xf32>
    %565 = arith.mulf %564, %563 : vector<16x128xf32>
    %cst_231 = arith.constant 5.000000e-01 : f32
    %566 = vector.broadcast %cst_231 : f32 to vector<16x128xf32>
    %567 = arith.addf %565, %566 : vector<16x128xf32>
    %568 = vector.extract_strided_slice %559 {offsets = [0, 128], sizes = [16, 128], strides = [1, 1]} : vector<16x512xf32> to vector<16x128xf32>
    %cst_232 = arith.constant 5.000000e-01 : f32
    %569 = vector.broadcast %cst_232 : f32 to vector<16x128xf32>
    %570 = arith.mulf %569, %568 : vector<16x128xf32>
    %571 = math.tanh %570 : vector<16x128xf32>
    %cst_233 = arith.constant 5.000000e-01 : f32
    %572 = vector.broadcast %cst_233 : f32 to vector<16x128xf32>
    %573 = arith.mulf %572, %571 : vector<16x128xf32>
    %cst_234 = arith.constant 5.000000e-01 : f32
    %574 = vector.broadcast %cst_234 : f32 to vector<16x128xf32>
    %575 = arith.addf %573, %574 : vector<16x128xf32>
    %576 = vector.extract_strided_slice %559 {offsets = [0, 256], sizes = [16, 128], strides = [1, 1]} : vector<16x512xf32> to vector<16x128xf32>
    %577 = math.tanh %576 : vector<16x128xf32>
    %578 = vector.extract_strided_slice %559 {offsets = [0, 384], sizes = [16, 128], strides = [1, 1]} : vector<16x512xf32> to vector<16x128xf32>
    %cst_235 = arith.constant 5.000000e-01 : f32
    %579 = vector.broadcast %cst_235 : f32 to vector<16x128xf32>
    %580 = arith.mulf %579, %578 : vector<16x128xf32>
    %581 = math.tanh %580 : vector<16x128xf32>
    %cst_236 = arith.constant 5.000000e-01 : f32
    %582 = vector.broadcast %cst_236 : f32 to vector<16x128xf32>
    %583 = arith.mulf %582, %581 : vector<16x128xf32>
    %cst_237 = arith.constant 5.000000e-01 : f32
    %584 = vector.broadcast %cst_237 : f32 to vector<16x128xf32>
    %585 = arith.addf %583, %584 : vector<16x128xf32>
    %586 = arith.mulf %575, %551 : vector<16x128xf32>
    %587 = arith.mulf %567, %577 : vector<16x128xf32>
    %588 = arith.addf %586, %587 : vector<16x128xf32>
    %589 = math.tanh %588 : vector<16x128xf32>
    %590 = arith.mulf %585, %589 : vector<16x128xf32>
    %591 = arith.truncf %590 : vector<16x128xf32> to vector<16x128xbf16>
    %c6_i32_238 = arith.constant 6 : i32
    %592 = arith.index_cast %c6_i32_238 : i32 to index
    %c0_239 = arith.constant 0 : index
    %c0_240 = arith.constant 0 : index
    %593 = vector.load %arg10[%592, %c0_239, %c0_240] : memref<8x16x512xf32, #tpu.memory_space<vmem>>, vector<1x16x512xf32>
    %594 = vector.shape_cast %593 : vector<1x16x512xf32> to vector<16x512xf32>
    %cst_241 = arith.constant dense<0.000000e+00> : vector<16x512xf32>
    %595 = tpu.matmul %591, %365, %cst_241 {dimension_numbers = #tpu.dot_dimension_numbers<[1], [0], [0], [1], [0, 0, 1, 1], [], []>} : vector<16x128xbf16>, vector<128x512xbf16>, vector<16x512xf32> -> vector<16x512xf32>
    %596 = arith.addf %594, %595 : vector<16x512xf32>
    %597 = vector.extract_strided_slice %596 {offsets = [0, 0], sizes = [16, 128], strides = [1, 1]} : vector<16x512xf32> to vector<16x128xf32>
    %cst_242 = arith.constant 5.000000e-01 : f32
    %598 = vector.broadcast %cst_242 : f32 to vector<16x128xf32>
    %599 = arith.mulf %598, %597 : vector<16x128xf32>
    %600 = math.tanh %599 : vector<16x128xf32>
    %cst_243 = arith.constant 5.000000e-01 : f32
    %601 = vector.broadcast %cst_243 : f32 to vector<16x128xf32>
    %602 = arith.mulf %601, %600 : vector<16x128xf32>
    %cst_244 = arith.constant 5.000000e-01 : f32
    %603 = vector.broadcast %cst_244 : f32 to vector<16x128xf32>
    %604 = arith.addf %602, %603 : vector<16x128xf32>
    %605 = vector.extract_strided_slice %596 {offsets = [0, 128], sizes = [16, 128], strides = [1, 1]} : vector<16x512xf32> to vector<16x128xf32>
    %cst_245 = arith.constant 5.000000e-01 : f32
    %606 = vector.broadcast %cst_245 : f32 to vector<16x128xf32>
    %607 = arith.mulf %606, %605 : vector<16x128xf32>
    %608 = math.tanh %607 : vector<16x128xf32>
    %cst_246 = arith.constant 5.000000e-01 : f32
    %609 = vector.broadcast %cst_246 : f32 to vector<16x128xf32>
    %610 = arith.mulf %609, %608 : vector<16x128xf32>
    %cst_247 = arith.constant 5.000000e-01 : f32
    %611 = vector.broadcast %cst_247 : f32 to vector<16x128xf32>
    %612 = arith.addf %610, %611 : vector<16x128xf32>
    %613 = vector.extract_strided_slice %596 {offsets = [0, 256], sizes = [16, 128], strides = [1, 1]} : vector<16x512xf32> to vector<16x128xf32>
    %614 = math.tanh %613 : vector<16x128xf32>
    %615 = vector.extract_strided_slice %596 {offsets = [0, 384], sizes = [16, 128], strides = [1, 1]} : vector<16x512xf32> to vector<16x128xf32>
    %cst_248 = arith.constant 5.000000e-01 : f32
    %616 = vector.broadcast %cst_248 : f32 to vector<16x128xf32>
    %617 = arith.mulf %616, %615 : vector<16x128xf32>
    %618 = math.tanh %617 : vector<16x128xf32>
    %cst_249 = arith.constant 5.000000e-01 : f32
    %619 = vector.broadcast %cst_249 : f32 to vector<16x128xf32>
    %620 = arith.mulf %619, %618 : vector<16x128xf32>
    %cst_250 = arith.constant 5.000000e-01 : f32
    %621 = vector.broadcast %cst_250 : f32 to vector<16x128xf32>
    %622 = arith.addf %620, %621 : vector<16x128xf32>
    %623 = arith.mulf %612, %588 : vector<16x128xf32>
    %624 = arith.mulf %604, %614 : vector<16x128xf32>
    %625 = arith.addf %623, %624 : vector<16x128xf32>
    %626 = math.tanh %625 : vector<16x128xf32>
    %627 = arith.mulf %622, %626 : vector<16x128xf32>
    %628 = arith.truncf %627 : vector<16x128xf32> to vector<16x128xbf16>
    %c7_i32_251 = arith.constant 7 : i32
    %629 = arith.index_cast %c7_i32_251 : i32 to index
    %c0_252 = arith.constant 0 : index
    %c0_253 = arith.constant 0 : index
    %630 = vector.load %arg10[%629, %c0_252, %c0_253] : memref<8x16x512xf32, #tpu.memory_space<vmem>>, vector<1x16x512xf32>
    %631 = vector.shape_cast %630 : vector<1x16x512xf32> to vector<16x512xf32>
    %cst_254 = arith.constant dense<0.000000e+00> : vector<16x512xf32>
    %632 = tpu.matmul %628, %365, %cst_254 {dimension_numbers = #tpu.dot_dimension_numbers<[1], [0], [0], [1], [0, 0, 1, 1], [], []>} : vector<16x128xbf16>, vector<128x512xbf16>, vector<16x512xf32> -> vector<16x512xf32>
    %633 = arith.addf %631, %632 : vector<16x512xf32>
    %634 = vector.extract_strided_slice %633 {offsets = [0, 0], sizes = [16, 128], strides = [1, 1]} : vector<16x512xf32> to vector<16x128xf32>
    %cst_255 = arith.constant 5.000000e-01 : f32
    %635 = vector.broadcast %cst_255 : f32 to vector<16x128xf32>
    %636 = arith.mulf %635, %634 : vector<16x128xf32>
    %637 = math.tanh %636 : vector<16x128xf32>
    %cst_256 = arith.constant 5.000000e-01 : f32
    %638 = vector.broadcast %cst_256 : f32 to vector<16x128xf32>
    %639 = arith.mulf %638, %637 : vector<16x128xf32>
    %cst_257 = arith.constant 5.000000e-01 : f32
    %640 = vector.broadcast %cst_257 : f32 to vector<16x128xf32>
    %641 = arith.addf %639, %640 : vector<16x128xf32>
    %642 = vector.extract_strided_slice %633 {offsets = [0, 128], sizes = [16, 128], strides = [1, 1]} : vector<16x512xf32> to vector<16x128xf32>
    %cst_258 = arith.constant 5.000000e-01 : f32
    %643 = vector.broadcast %cst_258 : f32 to vector<16x128xf32>
    %644 = arith.mulf %643, %642 : vector<16x128xf32>
    %645 = math.tanh %644 : vector<16x128xf32>
    %cst_259 = arith.constant 5.000000e-01 : f32
    %646 = vector.broadcast %cst_259 : f32 to vector<16x128xf32>
    %647 = arith.mulf %646, %645 : vector<16x128xf32>
    %cst_260 = arith.constant 5.000000e-01 : f32
    %648 = vector.broadcast %cst_260 : f32 to vector<16x128xf32>
    %649 = arith.addf %647, %648 : vector<16x128xf32>
    %650 = vector.extract_strided_slice %633 {offsets = [0, 256], sizes = [16, 128], strides = [1, 1]} : vector<16x512xf32> to vector<16x128xf32>
    %651 = math.tanh %650 : vector<16x128xf32>
    %652 = vector.extract_strided_slice %633 {offsets = [0, 384], sizes = [16, 128], strides = [1, 1]} : vector<16x512xf32> to vector<16x128xf32>
    %cst_261 = arith.constant 5.000000e-01 : f32
    %653 = vector.broadcast %cst_261 : f32 to vector<16x128xf32>
    %654 = arith.mulf %653, %652 : vector<16x128xf32>
    %655 = math.tanh %654 : vector<16x128xf32>
    %cst_262 = arith.constant 5.000000e-01 : f32
    %656 = vector.broadcast %cst_262 : f32 to vector<16x128xf32>
    %657 = arith.mulf %656, %655 : vector<16x128xf32>
    %cst_263 = arith.constant 5.000000e-01 : f32
    %658 = vector.broadcast %cst_263 : f32 to vector<16x128xf32>
    %659 = arith.addf %657, %658 : vector<16x128xf32>
    %660 = arith.mulf %649, %625 : vector<16x128xf32>
    %661 = arith.mulf %641, %651 : vector<16x128xf32>
    %662 = arith.addf %660, %661 : vector<16x128xf32>
    %663 = math.tanh %662 : vector<16x128xf32>
    %664 = arith.mulf %659, %663 : vector<16x128xf32>
    %665 = arith.truncf %664 : vector<16x128xf32> to vector<16x128xbf16>
    %c8_i32_264 = arith.constant 8 : i32
    %c1_265 = arith.constant 1 : index
    %c0_266 = arith.constant 0 : index
    %c0_267 = arith.constant 0 : index
    %666 = vector.load %arg7[%c1_265, %c0_266, %c0_267] : memref<2x16x128xbf16, #tpu.memory_space<vmem>>, vector<1x16x128xbf16>
    %667 = vector.shape_cast %666 : vector<1x16x128xbf16> to vector<16x128xbf16>
    %668 = vector.shape_cast %665 : vector<16x128xbf16> to vector<1x16x128xbf16>
    tpu.vector_store %arg7[%c1_265, %c0_266, %c0_267], %668 {strides = array<i32>} : memref<2x16x128xbf16, #tpu.memory_space<vmem>>, vector<1x16x128xbf16>,
    %c1_268 = arith.constant 1 : index
    %c0_269 = arith.constant 0 : index
    %c0_270 = arith.constant 0 : index
    %669 = vector.load %arg8[%c1_268, %c0_269, %c0_270] : memref<2x16x128xf32, #tpu.memory_space<vmem>>, vector<1x16x128xf32>
    %670 = vector.shape_cast %669 : vector<1x16x128xf32> to vector<16x128xf32>
    %671 = vector.shape_cast %662 : vector<16x128xf32> to vector<1x16x128xf32>
    tpu.vector_store %arg8[%c1_268, %c0_269, %c0_270], %671 {strides = array<i32>} : memref<2x16x128xf32, #tpu.memory_space<vmem>>, vector<1x16x128xf32>,
    %c0_i32_271 = arith.constant 0 : i32
    %672 = arith.cmpi eq, %arg0, %c0_i32_271 : i32
    %673 = arith.extui %672 : i1 to i32
    %c0_i32_272 = arith.constant 0 : i32
    %674 = arith.cmpi ne, %673, %c0_i32_272 : i32
    scf.if %674 {
      %675 = arith.extf %665 : vector<16x128xbf16> to vector<16x128xf32>
      %c0_273 = arith.constant 0 : index
      %c0_274 = arith.constant 0 : index
      %676 = vector.load %arg6[%c0_273, %c0_274] : memref<16x128xf32, #tpu.memory_space<vmem>>, vector<16x128xf32>
      tpu.vector_store %arg6[%c0_273, %c0_274], %675 {strides = array<i32>} : memref<16x128xf32, #tpu.memory_space<vmem>>, vector<16x128xf32>,
    } else {
    }
    return
  }
  func.func @transform_0(%arg0: i32) -> (i32, i32, i32) {
    %c0_i32 = arith.constant 0 : i32
    %c0_i32_0 = arith.constant 0 : i32
    %c0_i32_1 = arith.constant 0 : i32
    return %arg0, %c0_i32, %c0_i32_0 : i32, i32, i32
  }
  func.func @transform_1(%arg0: i32) -> (i32, i32) {
    %c0_i32 = arith.constant 0 : i32
    %c0_i32_0 = arith.constant 0 : i32
    %c0_i32_1 = arith.constant 0 : i32
    return %c0_i32, %c0_i32_0 : i32, i32
  }
  func.func @transform_2(%arg0: i32) -> (i32, i32, i32) {
    %c0_i32 = arith.constant 0 : i32
    %c0_i32_0 = arith.constant 0 : i32
    %c0_i32_1 = arith.constant 0 : i32
    %c0_i32_2 = arith.constant 0 : i32
    return %c0_i32, %c0_i32_0, %c0_i32_1 : i32, i32, i32
  }
  func.func @transform_3(%arg0: i32) -> (i32, i32, i32) {
    %c0_i32 = arith.constant 0 : i32
    %c0_i32_0 = arith.constant 0 : i32
    %c0_i32_1 = arith.constant 0 : i32
    %c0_i32_2 = arith.constant 0 : i32
    return %c0_i32, %c0_i32_0, %c0_i32_1 : i32, i32, i32
  }
  func.func @transform_4(%arg0: i32) -> (i32, i32, i32) {
    %c0_i32 = arith.constant 0 : i32
    %c0_i32_0 = arith.constant 0 : i32
    %c0_i32_1 = arith.constant 0 : i32
    %c0_i32_2 = arith.constant 0 : i32
    return %c0_i32, %c0_i32_0, %c0_i32_1 : i32, i32, i32
  }
  func.func @transform_5(%arg0: i32) -> (i32, i32) {
    %c0_i32 = arith.constant 0 : i32
    %c0_i32_0 = arith.constant 0 : i32
    %c0_i32_1 = arith.constant 0 : i32
    return %c0_i32, %c0_i32_0 : i32, i32
  }
}

</mosaic_0001>

<bundles_post_ra>
// kernel: tpu_custom_call.1
= control target key start
LH: loop header
LB: loop body
LE: loop exit
PB: predicated region body
PF: predicated region fallthrough
CT: control target
= control target key end

     0   :  { %10 = vsyncpa [#allocation7], 0  ;;  %s6222_s0 = inlined_call_operand.hbm [shape: bf16[8,16,128], index: 0, kind: input, shape index: {}]   ;;  %s6223_s1 = inlined_call_operand.hbm [shape: bf16[128,512], index: 1, kind: input, shape index: {}]   ;;  %s6224_s2 = inlined_call_operand.hbm [shape: bf16[1,128,512], index: 2, kind: input, shape index: {}]   ;;  %s6225_s3 = inlined_call_operand.hbm [shape: bf16[2,128,512], index: 3, kind: input, shape index: {}]   ;;  %s6226_s4 = inlined_call_operand.vmem [shape: f32[2,1,512], index: 4, kind: input, shape index: {}]   ;;  %s6227_s5 = inlined_call_operand.hbm [shape: f32[16,128], index: 5, kind: output, shape index: {}]  }
   0x1   :  { %11 = vsyncpa [#allocation10], 0 }
   0x2   :  { %12 = vsyncpa [#allocation13], 0 }
   0x3   :  { %13 = vsyncpa [#allocation8], 0  ;;  %s4946_s18 = smov [#allocation9]   ;;  %s4828_s22 = scalar_lea.hbm %s6223_s1, 4096 }
   0x4   :  { %s31_s19 = sshll.u32 %s4946_s18, 4  ;;  %p4829_p0 = scmp.ne.s32.totalorder %s6223_s1, %s4828_s22  ;;  %s32_s19 = int_to_ptr.vmem [resolvable:$true] %s31_s19 }
   0x5   :  { %p4832_p1 = scmp.lt.u32.totalorder %s4828_s22, %s6223_s1 }
   0x7   :  { %p4834_p2 = pnand %p4832_p1, %p4829_p0 }
   0x9   :  { %4837 = shalt.err (!%p4834_p2)
}
   0xa   :  { %s4838_s27 = scalar_lea.vmem %s32_s19, 4096  ;;  %p4843_p4 = scmp.lt.s32.totalorder %s32_s19, %s32_s19 }
   0xb   :  { %p4839_p3 = scmp.ne.s32.totalorder %s32_s19, %s4838_s27  ;;  %p4844_p5 = scmp.lt.s32.totalorder %s4838_s27, %s4838_s27 }
   0xd   :  { %p4845_p6 = por %p4844_p5, %p4843_p4 }
   0xf   :  { %p4846_p7 = pnand %p4845_p6, %p4839_p3 }
  0x11   :  { %4849 = shalt.err (!%p4846_p7)
}
  0x12   :  { %s4947_s28 = smov 256   ;;  %s4948_s29 = smov 16  }
  0x13   :  { %37 = dma.hbm_to_vmem [thread:$0]  %s6223_s1, 4096, %s32_s19, [#allocation10], %s4947_s28, %s4947_s28, %s4948_s29  }
  0x14   :  { %s4949_s7 = smov [#allocation6]   ;;  %s4850_s11 = scalar_lea.hbm %s6222_s0, 1024 }
  0x15   :  { %s19_s8 = sshll.u32 %s4949_s7, 4  ;;  %p4851_p8 = scmp.ne.s32.totalorder %s6222_s0, %s4850_s11  ;;  %s20_s8 = int_to_ptr.vmem [resolvable:$true] %s19_s8 }
  0x16   :  { %p4854_p9 = scmp.lt.u32.totalorder %s4850_s11, %s6222_s0 }
  0x18   :  { %p4856_p10 = pnand %p4854_p9, %p4851_p8 }
  0x1a   :  { %4859 = shalt.err (!%p4856_p10)
}
  0x1b   :  { %s4860_s16 = scalar_lea.vmem %s20_s8, 1024  ;;  %p4865_p12 = scmp.lt.s32.totalorder %s20_s8, %s20_s8 }
  0x1c   :  { %p4861_p11 = scmp.ne.s32.totalorder %s20_s8, %s4860_s16  ;;  %p4866_p13 = scmp.lt.s32.totalorder %s4860_s16, %s4860_s16 }
  0x1e   :  { %p4867_p0 = por %p4866_p13, %p4865_p12 }
  0x20   :  { %p4868_p1 = pnand %p4867_p0, %p4861_p11 }
  0x22   :  { %4871 = shalt.err (!%p4868_p1)
}
  0x23   :  { %s4950_s1 = smov 64   ;;  %s4951_s17 = smov 4  }
  0x24   :  { %25 = dma.hbm_to_vmem [thread:$0]  %s6222_s0, 1024, %s20_s8, [#allocation7], %s4950_s1, %s4950_s1, %s4951_s17  }
  0x25   :  { %s4952_s20 = smov [#allocation11]   ;;  %s4953_s22 = smov [#allocation12]  }
  0x26   :  { %s43_s21 = sshll.u32 %s4952_s20, 4  ;;  %s55_s23 = sshll.u32 %s4953_s22, 4  ;;  %s44_s21 = int_to_ptr.vmem [resolvable:$true] %s43_s21  ;;  %s5015_s23 = int_to_ptr.vmem [resolvable:$true] %s55_s23 }
  0x27   :  { %s4872_s26 = scalar_lea.hbm %s6224_s2, 4096 }
  0x28   :  { %p4873_p2 = scmp.ne.s32.totalorder %s6224_s2, %s4872_s26  ;;  %p4876_p3 = scmp.lt.u32.totalorder %s4872_s26, %s6224_s2 }
  0x2a   :  { %p4878_p4 = pnand %p4876_p3, %p4873_p2 }
  0x2c   :  { %4881 = shalt.err (!%p4878_p4)
}
  0x2d   :  { %s4882_s0 = scalar_lea.vmem %s44_s21, 4096  ;;  %p4887_p6 = scmp.lt.s32.totalorder %s44_s21, %s44_s21 }
  0x2e   :  { %p4883_p5 = scmp.ne.s32.totalorder %s44_s21, %s4882_s0  ;;  %p4888_p7 = scmp.lt.s32.totalorder %s4882_s0, %s4882_s0 }
  0x30   :  { %p4889_p8 = por %p4888_p7, %p4887_p6 }
  0x32   :  { %p4890_p9 = pnand %p4889_p8, %p4883_p5 }
  0x34   :  { %4893 = shalt.err (!%p4890_p9)
}
  0x35   :  { %49 = dma.hbm_to_vmem [thread:$0]  %s6224_s2, 4096, %s44_s21, [#allocation10], %s4947_s28, %s4947_s28, %s4948_s29  }
  0x36   :  { %s4894_s12 = scalar_lea.hbm %s6225_s3, 8192 }
  0x37   :  { %p4895_p10 = scmp.ne.s32.totalorder %s6225_s3, %s4894_s12  ;;  %p4898_p11 = scmp.lt.u32.totalorder %s4894_s12, %s6225_s3 }
  0x39   :  { %p4900_p12 = pnand %p4898_p11, %p4895_p10 }
  0x3b   :  { %4903 = shalt.err (!%p4900_p12)
}
  0x3c   :  { %s4904_s1 = scalar_lea.vmem %s5015_s23, 8192  ;;  %p4909_p0 = scmp.lt.s32.totalorder %s5015_s23, %s5015_s23 }
  0x3d   :  { %p4905_p13 = scmp.ne.s32.totalorder %s5015_s23, %s4904_s1  ;;  %p4910_p1 = scmp.lt.s32.totalorder %s4904_s1, %s4904_s1 }
  0x3f   :  { %p4911_p2 = por %p4910_p1, %p4909_p0 }
  0x41   :  { %p4912_p3 = pnand %p4911_p2, %p4905_p13 }
  0x43   :  { %4915 = shalt.err (!%p4912_p3)
}
  0x44   :  { %61 = dma.hbm_to_vmem [thread:$0]  %s6225_s3, 8192, %s5015_s23, [#allocation13], %s4947_s28, %s4947_s28, %s4948_s29  }
  0x45   :  { %4938 = dma.done.wait [#allocation7], 1024  }
  0x46   :  { %4939 = vsyncadd [#allocation7], 4294966272 }
  0x47   :  { %4940 = dma.done.wait [#allocation10], 8192  }
  0x48   :  { %4941 = vsyncadd [#allocation10], 4294959104 }
  0x49   :  { %4942 = dma.done.wait [#allocation13], 8192  }
  0x4a   :  { %4943 = vsyncadd [#allocation13], 4294959104  ;;  %v4954_v0 = vmov 0   ;;  %v4244_v1 = vld [vmem:[#allocation9 + $0x4] ss:$16 sps:$4 sm:$0xff]   ;;  %v4298_v43 = vld [vmem:[#allocation6 + $0x8] sm:$0xff]  }
  0x4b   :  { %397 = vmatprep.mubr.bf16.mxu0 %v4954_v0  ;;  %510 = vmatprep.mubr.bf16.mxu1 %v4954_v0  ;;  %v4246_v2 = vld [vmem:[#allocation9 + $0xc] ss:$16 sps:$4 sm:$0xff]   ;;  %v4248_v3 = vld [vmem:[#allocation9] ss:$16 sps:$4 sm:$0xff]   ;;  %v4249_v4 = vld [vmem:[#allocation9 + $0x8] ss:$16 sps:$4 sm:$0xff]  }
  0x4c   :  { %365 = vmatprep.subr.bf16.mxu0 %v4244_v1  ;;  %478 = vmatprep.subr.bf16.mxu1 %v4246_v2  ;;  %v4250_v5 = vld [vmem:[#allocation9 + $0x24] ss:$16 sps:$4 sm:$0xff]   ;;  %v4252_v6 = vld [vmem:[#allocation9 + $0x2c] ss:$16 sps:$4 sm:$0xff]   ;;  %v4254_v7 = vld [vmem:[#allocation9 + $0x20] ss:$16 sps:$4 sm:$0xff]  }
  0x4d   :  { %366 = vmatpush1.bf16.msra.mxu0 %v4248_v3  ;;  %479 = vmatpush1.bf16.msra.mxu1 %v4249_v4  ;;  %v4255_v8 = vld [vmem:[#allocation9 + $0x28] ss:$16 sps:$4 sm:$0xff]   ;;  %v4256_v9 = vld [vmem:[#allocation9 + $0x44] ss:$16 sps:$4 sm:$0xff]   ;;  %v4258_v10 = vld [vmem:[#allocation9 + $0x4c] ss:$16 sps:$4 sm:$0xff]  }
  0x4e   :  { %367 = vmatprep.subr.bf16.mxu0 %v4250_v5  ;;  %480 = vmatprep.subr.bf16.mxu1 %v4252_v6  ;;  %v4260_v11 = vld [vmem:[#allocation9 + $0x40] ss:$16 sps:$4 sm:$0xff]   ;;  %v4261_v12 = vld [vmem:[#allocation9 + $0x48] ss:$16 sps:$4 sm:$0xff]   ;;  %v4262_v13 = vld [vmem:[#allocation9 + $0x64] ss:$16 sps:$4 sm:$0xff]  }
  0x4f   :  { %v4264_v14 = vld [vmem:[#allocation9 + $0x6c] ss:$16 sps:$4 sm:$0xff]   ;;  %v4266_v15 = vld [vmem:[#allocation9 + $0x60] ss:$16 sps:$4 sm:$0xff]   ;;  %v4267_v16 = vld [vmem:[#allocation9 + $0x68] ss:$16 sps:$4 sm:$0xff]  }
  0x50   :  { %v4268_v17 = vld [vmem:[#allocation9 + $0x84] ss:$16 sps:$4 sm:$0xff]   ;;  %v4270_v18 = vld [vmem:[#allocation9 + $0x8c] ss:$16 sps:$4 sm:$0xff]   ;;  %v4272_v19 = vld [vmem:[#allocation9 + $0x80] ss:$16 sps:$4 sm:$0xff]  }
  0x51   :  { %368 = vmatpush1.bf16.msra.mxu0 %v4254_v7  ;;  %481 = vmatpush1.bf16.msra.mxu1 %v4255_v8  ;;  %v4273_v20 = vld [vmem:[#allocation9 + $0x88] ss:$16 sps:$4 sm:$0xff]   ;;  %v4274_v21 = vld [vmem:[#allocation9 + $0xa4] ss:$16 sps:$4 sm:$0xff]   ;;  %v4276_v22 = vld [vmem:[#allocation9 + $0xac] ss:$16 sps:$4 sm:$0xff]  }
  0x52   :  { %369 = vmatprep.subr.bf16.mxu0 %v4256_v9  ;;  %482 = vmatprep.subr.bf16.mxu1 %v4258_v10  ;;  %v4278_v23 = vld [vmem:[#allocation9 + $0xa0] ss:$16 sps:$4 sm:$0xff]   ;;  %v4279_v24 = vld [vmem:[#allocation9 + $0xa8] ss:$16 sps:$4 sm:$0xff]   ;;  %v4280_v25 = vld [vmem:[#allocation9 + $0xc4] ss:$16 sps:$4 sm:$0xff]   ;;  %v137_v10 = vlaneseq }
  0x53   :  { %v4282_v26 = vld [vmem:[#allocation9 + $0xcc] ss:$16 sps:$4 sm:$0xff]   ;;  %v4284_v27 = vld [vmem:[#allocation9 + $0xc0] ss:$16 sps:$4 sm:$0xff]   ;;  %v4285_v28 = vld [vmem:[#allocation9 + $0xc8] ss:$16 sps:$4 sm:$0xff]  }
  0x54   :  { %v4286_v29 = vld [vmem:[#allocation9 + $0xe4] ss:$16 sps:$4 sm:$0xff]   ;;  %v4288_v30 = vld [vmem:[#allocation9 + $0xec] ss:$16 sps:$4 sm:$0xff]   ;;  %v4290_v31 = vld [vmem:[#allocation9 + $0xe0] ss:$16 sps:$4 sm:$0xff]  }
  0x55   :  { %370 = vmatpush1.bf16.msra.mxu0 %v4260_v11  ;;  %483 = vmatpush1.bf16.msra.mxu1 %v4261_v12  ;;  %v4291_v32 = vld [vmem:[#allocation9 + $0xe8] ss:$16 sps:$4 sm:$0xff]   ;;  %v5054_v33 = vld [vmem:[#allocation12 + $0x4] ss:$16 sps:$4 sm:$0xff]   ;;  %v5056_v34 = vld [vmem:[#allocation12 + $0xc] ss:$16 sps:$4 sm:$0xff]  }
  0x56   :  { %371 = vmatprep.subr.bf16.mxu0 %v4262_v13  ;;  %484 = vmatprep.subr.bf16.mxu1 %v4264_v14  ;;  %v4292_v35 = vld [vmem:[#allocation6] sm:$0xff]   ;;  %v5064_v38 = vld [vmem:[#allocation12 + $0x8] ss:$16 sps:$4 sm:$0xff]   ;;  %v5066_v39 = vld [vmem:[#allocation12 + $0x2c] ss:$16 sps:$4 sm:$0xff]   ;;  %v5204_v11 = vshrl.u32 %v137_v10, 7 }
  0x57   :  { %v5058_v36 = vld [vmem:[#allocation12] ss:$16 sps:$4 sm:$0xff]   ;;  %v5062_v37 = vld [vmem:[#allocation12 + $0x24] ss:$16 sps:$4 sm:$0xff]   ;;  %v5077_v42 = vld [vmem:[#allocation12 + $0x28] ss:$16 sps:$4 sm:$0xff]  }
  0x58   :  { %v5070_v40 = vld [vmem:[#allocation12 + $0x20] ss:$16 sps:$4 sm:$0xff]   ;;  %v5074_v41 = vld [vmem:[#allocation12 + $0x44] ss:$16 sps:$4 sm:$0xff]   ;;  %v5084_v45 = vld [vmem:[#allocation12 + $0x4c] ss:$16 sps:$4 sm:$0xff]  }
  0x59   :  { %372 = vmatpush1.bf16.msra.mxu0 %v4266_v15  ;;  %485 = vmatpush1.bf16.msra.mxu1 %v4267_v16  ;;  %v5082_v44 = vld [vmem:[#allocation12 + $0x40] ss:$16 sps:$4 sm:$0xff]   ;;  %v5086_v46 = vld [vmem:[#allocation12 + $0x64] ss:$16 sps:$4 sm:$0xff]   ;;  %v5089_v47 = vld [vmem:[#allocation12 + $0x48] ss:$16 sps:$4 sm:$0xff]  }
  0x5a   :  { %373 = vmatprep.subr.bf16.mxu0 %v4268_v17  ;;  %486 = vmatprep.subr.bf16.mxu1 %v4270_v18  ;;  %v5091_v48 = vld [vmem:[#allocation12 + $0x6c] ss:$16 sps:$4 sm:$0xff]   ;;  %v5097_v49 = vld [vmem:[#allocation12 + $0x60] ss:$16 sps:$4 sm:$0xff]   ;;  %v5099_v50 = vld [vmem:[#allocation12 + $0x84] ss:$16 sps:$4 sm:$0xff]  }
  0x5b   :  { %v5103_v51 = vld [vmem:[#allocation12 + $0x68] ss:$16 sps:$4 sm:$0xff]   ;;  %v4305_v52 = vld [vmem:[#allocation6 + $0x10] sm:$0xff]   ;;  %v5109_v54 = vld [vmem:[#allocation12 + $0x8c] ss:$16 sps:$4 sm:$0xff]   ;;  %v139_v12 = vsub.s32 0, %v5204_v11 }
  0x5c   :  { %v5106_v53 = vld [vmem:[#allocation12 + $0x80] ss:$16 sps:$4 sm:$0xff]   ;;  %v5113_v55 = vld [vmem:[#allocation12 + $0xa4] ss:$16 sps:$4 sm:$0xff]   ;;  %v5115_v56 = vld [vmem:[#allocation12 + $0x88] ss:$16 sps:$4 sm:$0xff]  }
  0x5d   :  { %374 = vmatpush1.bf16.msra.mxu0 %v4272_v19  ;;  %487 = vmatpush1.bf16.msra.mxu1 %v4273_v20  ;;  %v5117_v57 = vld [vmem:[#allocation12 + $0xac] ss:$16 sps:$4 sm:$0xff]   ;;  %v5119_v58 = vld [vmem:[#allocation12 + $0xa0] ss:$16 sps:$4 sm:$0xff]   ;;  %v5123_v59 = vld [vmem:[#allocation12 + $0xc4] ss:$16 sps:$4 sm:$0xff]  }
  0x5e   :  { %375 = vmatprep.subr.bf16.mxu0 %v4274_v21  ;;  %488 = vmatprep.subr.bf16.mxu1 %v4276_v22  ;;  %v5125_v60 = vld [vmem:[#allocation12 + $0xa8] ss:$16 sps:$4 sm:$0xff]   ;;  %v5132_v62 = vld [vmem:[#allocation12 + $0xc0] ss:$16 sps:$4 sm:$0xff]   ;;  %v5134_v63 = vld [vmem:[#allocation12 + $0xcc] ss:$16 sps:$4 sm:$0xff]  }
  0x5f   :  { %v4312_v61 = vld [vmem:[#allocation6 + $0x18] sm:$0xff]   ;;  %v5136_v1 = vld [vmem:[#allocation12 + $0xe4] ss:$16 sps:$4 sm:$0xff]   ;;  %v5145_v4 = vld [vmem:[#allocation12 + $0xe0] ss:$16 sps:$4 sm:$0xff]   ;;  %v6230_v14 = vsub.s32 1, %v5204_v11 }
  0x60   :  { %v5138_v2 = vld [vmem:[#allocation12 + $0xc8] ss:$16 sps:$4 sm:$0xff]   ;;  %v5141_v3 = vld [vmem:[#allocation12 + $0xec] ss:$16 sps:$4 sm:$0xff]   ;;  %v4319_v6 = vld [vmem:[#allocation6 + $0x20] sm:$0xff]   ;;  %v6229_v16 = vsub.s32 2, %v5204_v11 }
  0x61   :  { %376 = vmatpush1.bf16.msra.mxu0 %v4278_v23  ;;  %489 = vmatpush1.bf16.msra.mxu1 %v4279_v24  ;;  %v5149_v5 = vld [vmem:[#allocation12 + $0xe8] ss:$16 sps:$4 sm:$0xff]   ;;  %v4333_v8 = vld [vmem:[#allocation6 + $0x30] sm:$0xff]   ;;  %v135_v13 = vld [vmem:[%s6226_s4] sm:$0xf] }
  0x62   :  { %377 = vmatprep.subr.bf16.mxu0 %v4280_v25  ;;  %490 = vmatprep.subr.bf16.mxu1 %v4282_v26  ;;  %v4326_v7 = vld [vmem:[#allocation6 + $0x28] sm:$0xff]   ;;  %v4340_v9 = vld [vmem:[#allocation6 + $0x38] sm:$0xff]   ;;  %v5213_v15 = vrot.slane %v135_v13, %v139_v12  ;;  %v5218_v17 = vrot.slane %v135_v13, %v6230_v14  ;;  %v5223_v21 = vrot.slane %v135_v13, %v6229_v16 }
  0x65   :  { %378 = vmatpush1.bf16.msra.mxu0 %v4284_v27  ;;  %491 = vmatpush1.bf16.msra.mxu1 %v4285_v28 }
  0x66   :  { %379 = vmatprep.subr.bf16.mxu0 %v4286_v29  ;;  %492 = vmatprep.subr.bf16.mxu1 %v4288_v30 }
  0x69   :  { %380 = vmatpush1.bf16.msra.mxu0 %v4290_v31  ;;  %493 = vmatpush1.bf16.msra.mxu1 %v4291_v32  ;;  %v6228_v32 = vsub.s32 3, %v5204_v11 }
  0x6a   :  { %858 = vmatprep.subr.bf16.mxu0 %v5054_v33  ;;  %901 = vmatprep.subr.bf16.mxu1 %v5056_v34 }
  0x6c   :  { %398 = vmatmul.mubr.bf16.vlgmr.msra.gmra.mrb[0].mxu0 %v4292_v35  ;;  %511 = vmatmul.mubr.bf16.vlgmr.msra.gmra.mrb[0].mxu1 %v4292_v35 }
  0x6d   :  { %859 = vmatpush1.bf16.msra.mxu0 %v5058_v36  ;;  %407 = vmatprep.mubr.bf16.mxu0 %v4954_v0 }
  0x6e   :  { %520 = vmatprep.mubr.bf16.mxu1 %v4954_v0  ;;  %860 = vmatprep.subr.bf16.mxu0 %v5062_v37 }
  0x6f   :  { %902 = vmatpush1.bf16.msra.mxu1 %v5064_v38 }
  0x70   :  { %903 = vmatprep.subr.bf16.mxu1 %v5066_v39 }
  0x71   :  { %861 = vmatpush1.bf16.msra.mxu0 %v5070_v40 }
  0x72   :  { %862 = vmatprep.subr.bf16.mxu0 %v5074_v41 }
  0x73   :  { %904 = vmatpush1.bf16.msra.mxu1 %v5077_v42 }
  0x74   :  { %408 = vmatmul.mubr.bf16.gmra.mrb[4].mxu0 %v4298_v43  ;;  %521 = vmatmul.mubr.bf16.gmra.mrb[4].mxu1 %v4298_v43 }
  0x75   :  { %417 = vmatprep.mubr.bf16.mxu0 %v4954_v0  ;;  %530 = vmatprep.mubr.bf16.mxu1 %v4954_v0 }
  0x76   :  { %863 = vmatpush1.bf16.msra.mxu0 %v5082_v44  ;;  %905 = vmatprep.subr.bf16.mxu1 %v5084_v45 }
  0x77   :  { %864 = vmatprep.subr.bf16.mxu0 %v5086_v46  ;;  %906 = vmatpush1.bf16.msra.mxu1 %v5089_v47 }
  0x78   :  { %907 = vmatprep.subr.bf16.mxu1 %v5091_v48 }
  0x7a   :  { %865 = vmatpush1.bf16.msra.mxu0 %v5097_v49 }
  0x7b   :  { %866 = vmatprep.subr.bf16.mxu0 %v5099_v50  ;;  %908 = vmatpush1.bf16.msra.mxu1 %v5103_v51 }
  0x7c   :  { %418 = vmatmul.mubr.bf16.gmra.mrb[8].mxu0 %v4305_v52  ;;  %531 = vmatmul.mubr.bf16.gmra.mrb[8].mxu1 %v4305_v52 }
  0x7d   :  { %427 = vmatprep.mubr.bf16.mxu0 %v4954_v0  ;;  %540 = vmatprep.mubr.bf16.mxu1 %v4954_v0 }
  0x7e   :  { %867 = vmatpush1.bf16.msra.mxu0 %v5106_v53  ;;  %909 = vmatprep.subr.bf16.mxu1 %v5109_v54 }
  0x7f   :  { %868 = vmatprep.subr.bf16.mxu0 %v5113_v55  ;;  %910 = vmatpush1.bf16.msra.mxu1 %v5115_v56 }
  0x80   :  { %911 = vmatprep.subr.bf16.mxu1 %v5117_v57 }
  0x82   :  { %869 = vmatpush1.bf16.msra.mxu0 %v5119_v58 }
  0x83   :  { %870 = vmatprep.subr.bf16.mxu0 %v5123_v59  ;;  %912 = vmatpush1.bf16.msra.mxu1 %v5125_v60 }
  0x84   :  { %428 = vmatmul.mubr.bf16.gmra.mrb[12].mxu0 %v4312_v61  ;;  %541 = vmatmul.mubr.bf16.gmra.mrb[12].mxu1 %v4312_v61 }
  0x85   :  { %437 = vmatprep.mubr.bf16.mxu0 %v4954_v0  ;;  %550 = vmatprep.mubr.bf16.mxu1 %v4954_v0 }
  0x86   :  { %871 = vmatpush1.bf16.msra.mxu0 %v5132_v62  ;;  %913 = vmatprep.subr.bf16.mxu1 %v5134_v63 }
  0x87   :  { %872 = vmatprep.subr.bf16.mxu0 %v5136_v1  ;;  %914 = vmatpush1.bf16.msra.mxu1 %v5138_v2 }
  0x88   :  { %915 = vmatprep.subr.bf16.mxu1 %v5141_v3 }
  0x8a   :  { %873 = vmatpush1.bf16.msra.mxu0 %v5145_v4 }
  0x8b   :  { %916 = vmatpush1.bf16.msra.mxu1 %v5149_v5  ;;  %999 = vmatprep.subr.bf16.mxu0 %v5054_v33 }
  0x8c   :  { %438 = vmatmul.mubr.bf16.gmra.mrb[16].mxu0 %v4319_v6  ;;  %551 = vmatmul.mubr.bf16.gmra.mrb[16].mxu1 %v4319_v6  ;;  %v5232_v6 = vrot.slane %v135_v13, %v6228_v32 }
  0x8d   :  { %447 = vmatprep.mubr.bf16.mxu0 %v4954_v0  ;;  %560 = vmatprep.mubr.bf16.mxu1 %v4954_v0 }
  0x8e   :  { %1042 = vmatprep.subr.bf16.mxu1 %v5056_v34 }
  0x94   :  { %448 = vmatmul.mubr.bf16.gmra.mrb[20].mxu0 %v4326_v7  ;;  %561 = vmatmul.mubr.bf16.gmra.mrb[20].mxu1 %v4326_v7 }
  0x95   :  { %457 = vmatprep.mubr.bf16.mxu0 %v4954_v0  ;;  %570 = vmatprep.mubr.bf16.mxu1 %v4954_v0 }
  0x9c   :  { %458 = vmatmul.mubr.bf16.gmra.mrb[24].mxu0 %v4333_v8  ;;  %571 = vmatmul.mubr.bf16.gmra.mrb[24].mxu1 %v4333_v8 }
  0x9d   :  { %467 = vmatprep.mubr.bf16.mxu0 %v4954_v0  ;;  %580 = vmatprep.mubr.bf16.mxu1 %v4954_v0 }
  0xa4   :  { %468 = vmatmul.mubr.bf16.gmra.mrb[28].mxu0 %v4340_v9  ;;  %581 = vmatmul.mubr.bf16.gmra.mrb[28].mxu1 %v4340_v9 }
  0xa5   :  { %890 = vmatprep.mubr.bf16.mxu0 %v4954_v0  ;;  %933 = vmatprep.mubr.bf16.mxu1 %v4954_v0 }
  0xac   :  { %891 = vmatmul.mubr.bf16.vlgmr.msra.gmra.mrb[0].mxu0 %v4954_v0  ;;  %934 = vmatmul.mubr.bf16.vlgmr.msra.gmra.mrb[0].mxu1 %v4954_v0 }
  0xad   :  { %1000 = vmatpush1.bf16.msra.mxu0 %v5058_v36  ;;  %1043 = vmatpush1.bf16.msra.mxu1 %v5064_v38 }
  0xae   :  { %1001 = vmatprep.subr.bf16.mxu0 %v5062_v37  ;;  %1044 = vmatprep.subr.bf16.mxu1 %v5066_v39 }
  0xaf   :  { %1031 = vmatprep.mubr.bf16.mxu0 %v4954_v0  ;;  %1074 = vmatprep.mubr.bf16.mxu1 %v4954_v0 }
  0xb1   :  { %1002 = vmatpush1.bf16.msra.mxu0 %v5070_v40  ;;  %1045 = vmatpush1.bf16.msra.mxu1 %v5077_v42 }
  0xb2   :  { %1003 = vmatprep.subr.bf16.mxu0 %v5074_v41  ;;  %1046 = vmatprep.subr.bf16.mxu1 %v5084_v45 }
  0xb5   :  { %1004 = vmatpush1.bf16.msra.mxu0 %v5082_v44  ;;  %1047 = vmatpush1.bf16.msra.mxu1 %v5089_v47 }
  0xb6   :  { %1005 = vmatprep.subr.bf16.mxu0 %v5086_v46  ;;  %1048 = vmatprep.subr.bf16.mxu1 %v5091_v48 }
  0xb9   :  { %1006 = vmatpush1.bf16.msra.mxu0 %v5097_v49  ;;  %1049 = vmatpush1.bf16.msra.mxu1 %v5103_v51 }
  0xba   :  { %1007 = vmatprep.subr.bf16.mxu0 %v5099_v50  ;;  %1050 = vmatprep.subr.bf16.mxu1 %v5109_v54 }
  0xbd   :  { %1008 = vmatpush1.bf16.msra.mxu0 %v5106_v53  ;;  %1051 = vmatpush1.bf16.msra.mxu1 %v5115_v56 }
  0xbe   :  { %1009 = vmatprep.subr.bf16.mxu0 %v5113_v55  ;;  %1052 = vmatprep.subr.bf16.mxu1 %v5117_v57 }
  0xc1   :  { %1010 = vmatpush1.bf16.msra.mxu0 %v5119_v58  ;;  %1053 = vmatpush1.bf16.msra.mxu1 %v5125_v60 }
  0xc2   :  { %1011 = vmatprep.subr.bf16.mxu0 %v5123_v59  ;;  %1054 = vmatprep.subr.bf16.mxu1 %v5134_v63 }
  0xc5   :  { %1012 = vmatpush1.bf16.msra.mxu0 %v5132_v62  ;;  %1055 = vmatpush1.bf16.msra.mxu1 %v5138_v2 }
  0xc6   :  { %1013 = vmatprep.subr.bf16.mxu0 %v5136_v1  ;;  %1056 = vmatprep.subr.bf16.mxu1 %v5141_v3 }
  0xc9   :  { %1014 = vmatpush1.bf16.msra.mxu0 %v5145_v4  ;;  %1057 = vmatpush1.bf16.msra.mxu1 %v5149_v5 }
  0xca   :  { %1141 = vmatprep.subr.bf16.mxu0 %v5054_v33  ;;  %1184 = vmatprep.subr.bf16.mxu1 %v5056_v34 }
 0x17f   :  { %v892_v18 = vpop.f32.mrb[0].mxu0  ;;  %v935_v19 = vpop.f32.mrb[0].mxu1 }
 0x180   :  { %v3976_v20 = vadd.f32 %v892_v18, %v5213_v15  ;;  %v894_v22 = vpop.f32.mrb[1].mxu0  ;;  %v937_v23 = vpop.f32.mrb[1].mxu1  ;;  %v4008_v43 = vadd.f32 %v935_v19, %v5223_v21 }
 0x181   :  { %v3977_v24 = vadd.f32 %v894_v22, %v5218_v17  ;;  %v896_v25 = vpop.f32.mrb[2].mxu0  ;;  %v939_v26 = vpop.f32.mrb[2].mxu1  ;;  %v4009_v8 = vadd.f32 %v937_v23, %v5232_v6 }
 0x182   :  { %v952_v27 = vmul.f32 0.5, %v3976_v20  ;;  %v3978_v28 = vadd.f32 %v896_v25, %v5213_v15  ;;  %v898_v29 = vpop.f32.mrb[3].mxu0  ;;  %v941_v30 = vpop.f32.mrb[3].mxu1  ;;  %v4010_v7 = vadd.f32 %v939_v26, %v5223_v21 }
 0x183   :  { %v960_v31 = vmul.f32 0.5, %v3977_v24  ;;  %v3979_v35 = vadd.f32 %v898_v29, %v5218_v17  ;;  %v4011_v9 = vadd.f32 %v941_v30, %v5232_v6  ;;  %v970_v20 = vmul.f32 0.5, %v4009_v8 }
 0x184   :  { %4444 = vtanh.f32 %v952_v27  ;;  %v953_v52 = vmul.f32 0.5, %v3978_v28 }
 0x185   :  { %4446 = vtanh.f32 %v960_v31  ;;  %v961_v61 = vmul.f32 0.5, %v3979_v35  ;;  %v971_v24 = vmul.f32 0.5, %v4011_v9 }
 0x186   :  { %4448 = vtanh.f32 %v953_v52 }
 0x187   :  { %4450 = vtanh.f32 %v4008_v43 }
 0x188   :  { %4452 = vtanh.f32 %v961_v61 }
 0x189   :  { %4454 = vtanh.f32 %v4010_v7 }
 0x18a   :  { %4456 = vtanh.f32 %v970_v20 }
 0x18b   :  { %4458 = vtanh.f32 %v971_v24 }
 0x18e   :  { %v4445_v10 = vpop.eup %4444 }
 0x18f   :  { %v4447_v18 = vpop.eup %4446  ;;  %v956_v19 = vmul.f32 0.5, %v4445_v10 }
 0x190   :  { %v964_v22 = vmul.f32 0.5, %v4447_v18  ;;  %v4449_v25 = vpop.eup %4448 }
 0x191   :  { %v958_v27 = vadd.f32 0.5, %v956_v19  ;;  %v4451_v13 = vpop.eup %4450  ;;  %v957_v29 = vmul.f32 0.5, %v4449_v25 }
 0x192   :  { %v966_v28 = vadd.f32 0.5, %v964_v22  ;;  %v4453_v31 = vpop.eup %4452 }
 0x193   :  { %v980_v26 = vmul.f32 %v4451_v13, %v958_v27  ;;  %v959_v43 = vadd.f32 0.5, %v957_v29  ;;  %v965_v23 = vmul.f32 0.5, %v4453_v31  ;;  %v4455_v52 = vpop.eup %4454 }
 0x194   :  { %v978_v35 = vmul.f32 0.0, %v966_v28  ;;  %v4457_v10 = vpop.eup %4456 }
 0x195   :  { %v967_v61 = vadd.f32 0.5, %v965_v23  ;;  %v981_v7 = vmul.f32 %v4455_v52, %v959_v43  ;;  %v4459_v18 = vpop.eup %4458  ;;  %v974_v19 = vmul.f32 0.5, %v4457_v10 }
 0x196   :  { %v5237_v30 = vadd.f32 %v980_v26, %v978_v35  ;;  %v975_v20 = vmul.f32 0.5, %v4459_v18 }
 0x197   :  { %v979_v8 = vmul.f32 0.0, %v967_v61  ;;  %v976_v25 = vadd.f32 0.5, %v974_v19 }
 0x198   :  { %4460 = vtanh.f32 %v5237_v30  ;;  %v977_v27 = vadd.f32 0.5, %v975_v20 }
 0x199   :  { %v5240_v9 = vadd.f32 %v981_v7, %v979_v8 }
 0x19b   :  { %4462 = vtanh.f32 %v5240_v9 }
 0x1a2   :  { %v4461_v22 = vpop.eup %4460 }
 0x1a3   :  { %v986_v13 = vmul.f32 %v4461_v22, %v976_v25 }
 0x1a5   :  { %v4463_v24 = vpop.eup %4462 }
 0x1a6   :  { %v987_v28 = vmul.f32 %v4463_v24, %v977_v27 }
 0x1a8   :  { %v5243_v29 = vpack.c.bf16 %v987_v28, %v986_v13 }
 0x1aa   :  { %1032 = vmatmul.mubr.bf16.vlgmr.msra.gmra.mrb[4].mxu0 %v5243_v29  ;;  %1075 = vmatmul.mubr.bf16.vlgmr.msra.gmra.mrb[4].mxu1 %v5243_v29 }
 0x1ab   :  { %1142 = vmatpush1.bf16.msra.mxu0 %v5058_v36  ;;  %1185 = vmatpush1.bf16.msra.mxu1 %v5064_v38 }
 0x1ac   :  { %1143 = vmatprep.subr.bf16.mxu0 %v5062_v37  ;;  %1186 = vmatprep.subr.bf16.mxu1 %v5066_v39 }
 0x1ad   :  { %1173 = vmatprep.mubr.bf16.mxu0 %v4954_v0  ;;  %1216 = vmatprep.mubr.bf16.mxu1 %v4954_v0 }
 0x1af   :  { %1144 = vmatpush1.bf16.msra.mxu0 %v5070_v40  ;;  %1187 = vmatpush1.bf16.msra.mxu1 %v5077_v42 }
 0x1b0   :  { %1145 = vmatprep.subr.bf16.mxu0 %v5074_v41  ;;  %1188 = vmatprep.subr.bf16.mxu1 %v5084_v45 }
 0x1b3   :  { %1146 = vmatpush1.bf16.msra.mxu0 %v5082_v44  ;;  %1189 = vmatpush1.bf16.msra.mxu1 %v5089_v47 }
 0x1b4   :  { %1147 = vmatprep.subr.bf16.mxu0 %v5086_v46  ;;  %1190 = vmatprep.subr.bf16.mxu1 %v5091_v48 }
 0x1b7   :  { %1148 = vmatpush1.bf16.msra.mxu0 %v5097_v49  ;;  %1191 = vmatpush1.bf16.msra.mxu1 %v5103_v51 }
 0x1b8   :  { %1149 = vmatprep.subr.bf16.mxu0 %v5099_v50  ;;  %1192 = vmatprep.subr.bf16.mxu1 %v5109_v54 }
 0x1bb   :  { %1150 = vmatpush1.bf16.msra.mxu0 %v5106_v53  ;;  %1193 = vmatpush1.bf16.msra.mxu1 %v5115_v56 }
 0x1bc   :  { %1151 = vmatprep.subr.bf16.mxu0 %v5113_v55  ;;  %1194 = vmatprep.subr.bf16.mxu1 %v5117_v57 }
 0x1bf   :  { %1152 = vmatpush1.bf16.msra.mxu0 %v5119_v58  ;;  %1195 = vmatpush1.bf16.msra.mxu1 %v5125_v60 }
 0x1c0   :  { %1153 = vmatprep.subr.bf16.mxu0 %v5123_v59  ;;  %1196 = vmatprep.subr.bf16.mxu1 %v5134_v63 }
 0x1c3   :  { %1154 = vmatpush1.bf16.msra.mxu0 %v5132_v62  ;;  %1197 = vmatpush1.bf16.msra.mxu1 %v5138_v2 }
 0x1c4   :  { %1155 = vmatprep.subr.bf16.mxu0 %v5136_v1  ;;  %1198 = vmatprep.subr.bf16.mxu1 %v5141_v3 }
 0x1c7   :  { %1156 = vmatpush1.bf16.msra.mxu0 %v5145_v4  ;;  %1199 = vmatpush1.bf16.msra.mxu1 %v5149_v5 }
 0x1c8   :  { %1283 = vmatprep.subr.bf16.mxu0 %v5054_v33  ;;  %1326 = vmatprep.subr.bf16.mxu1 %v5056_v34 }
 0x27d   :  { %v1033_v31 = vpop.f32.mrb[4].mxu0  ;;  %v1076_v26 = vpop.f32.mrb[4].mxu1 }
 0x27e   :  { %v3980_v35 = vadd.f32 %v1033_v31, %v5213_v15  ;;  %v1035_v43 = vpop.f32.mrb[5].mxu0  ;;  %v1078_v23 = vpop.f32.mrb[5].mxu1  ;;  %v4012_v25 = vadd.f32 %v1076_v26, %v5223_v21 }
 0x27f   :  { %v3981_v52 = vadd.f32 %v1035_v43, %v5218_v17  ;;  %v1037_v61 = vpop.f32.mrb[6].mxu0  ;;  %v1080_v7 = vpop.f32.mrb[6].mxu1  ;;  %v4013_v28 = vadd.f32 %v1078_v23, %v5232_v6 }
 0x280   :  { %v1093_v8 = vmul.f32 0.5, %v3980_v35  ;;  %v3982_v10 = vadd.f32 %v1037_v61, %v5213_v15  ;;  %v1039_v18 = vpop.f32.mrb[7].mxu0  ;;  %v1082_v19 = vpop.f32.mrb[7].mxu1  ;;  %v4014_v13 = vadd.f32 %v1080_v7, %v5223_v21 }
 0x281   :  { %v1101_v20 = vmul.f32 0.5, %v3981_v52  ;;  %v3983_v22 = vadd.f32 %v1039_v18, %v5218_v17  ;;  %v4015_v31 = vadd.f32 %v1082_v19, %v5232_v6  ;;  %v1111_v61 = vmul.f32 0.5, %v4013_v28 }
 0x282   :  { %4464 = vtanh.f32 %v1093_v8  ;;  %v1094_v27 = vmul.f32 0.5, %v3982_v10 }
 0x283   :  { %4466 = vtanh.f32 %v1101_v20  ;;  %v1102_v24 = vmul.f32 0.5, %v3983_v22  ;;  %v1112_v18 = vmul.f32 0.5, %v4015_v31 }
 0x284   :  { %4468 = vtanh.f32 %v1094_v27 }
 0x285   :  { %4470 = vtanh.f32 %v4012_v25 }
 0x286   :  { %4472 = vtanh.f32 %v1102_v24 }
 0x287   :  { %4474 = vtanh.f32 %v4014_v13 }
 0x288   :  { %4476 = vtanh.f32 %v1111_v61 }
 0x289   :  { %4478 = vtanh.f32 %v1112_v18 }
 0x28c   :  { %v4465_v35 = vpop.eup %4464 }
 0x28d   :  { %v4467_v43 = vpop.eup %4466  ;;  %v1097_v52 = vmul.f32 0.5, %v4465_v35 }
 0x28e   :  { %v1105_v8 = vmul.f32 0.5, %v4467_v43  ;;  %v4469_v26 = vpop.eup %4468 }
 0x28f   :  { %v1099_v10 = vadd.f32 0.5, %v1097_v52  ;;  %v4471_v20 = vpop.eup %4470  ;;  %v1098_v27 = vmul.f32 0.5, %v4469_v26 }
 0x290   :  { %v1107_v22 = vadd.f32 0.5, %v1105_v8  ;;  %v4473_v32 = vpop.eup %4472 }
 0x291   :  { %v1121_v7 = vmul.f32 %v4471_v20, %v1099_v10  ;;  %v1100_v23 = vadd.f32 0.5, %v1098_v27  ;;  %v1106_v24 = vmul.f32 0.5, %v4473_v32  ;;  %v4475_v19 = vpop.eup %4474 }
 0x292   :  { %v1119_v25 = vmul.f32 %v1107_v22, %v5237_v30  ;;  %v4477_v52 = vpop.eup %4476 }
 0x293   :  { %v1108_v35 = vadd.f32 0.5, %v1106_v24  ;;  %v1122_v28 = vmul.f32 %v4475_v19, %v1100_v23  ;;  %v4479_v61 = vpop.eup %4478  ;;  %v1115_v8 = vmul.f32 0.5, %v4477_v52 }
 0x294   :  { %v5290_v13 = vadd.f32 %v1121_v7, %v1119_v25  ;;  %v1116_v30 = vmul.f32 0.5, %v4479_v61 }
 0x295   :  { %v1120_v31 = vmul.f32 %v1108_v35, %v5240_v9  ;;  %v1117_v32 = vadd.f32 0.5, %v1115_v8 }
 0x296   :  { %4480 = vtanh.f32 %v5290_v13  ;;  %v1118_v18 = vadd.f32 0.5, %v1116_v30 }
 0x297   :  { %v5294_v43 = vadd.f32 %v1122_v28, %v1120_v31 }
 0x299   :  { %4482 = vtanh.f32 %v5294_v43 }
 0x2a0   :  { %v4481_v26 = vpop.eup %4480 }
 0x2a1   :  { %v1127_v20 = vmul.f32 %v4481_v26, %v1117_v32 }
 0x2a3   :  { %v4483_v10 = vpop.eup %4482 }
 0x2a4   :  { %v1128_v22 = vmul.f32 %v4483_v10, %v1118_v18 }
 0x2a6   :  { %v5297_v27 = vpack.c.bf16 %v1128_v22, %v1127_v20 }
 0x2a8   :  { %1174 = vmatmul.mubr.bf16.vlgmr.msra.gmra.mrb[8].mxu0 %v5297_v27  ;;  %1217 = vmatmul.mubr.bf16.vlgmr.msra.gmra.mrb[8].mxu1 %v5297_v27 }
 0x2a9   :  { %1284 = vmatpush1.bf16.msra.mxu0 %v5058_v36  ;;  %1327 = vmatpush1.bf16.msra.mxu1 %v5064_v38 }
 0x2aa   :  { %1285 = vmatprep.subr.bf16.mxu0 %v5062_v37  ;;  %1328 = vmatprep.subr.bf16.mxu1 %v5066_v39 }
 0x2ab   :  { %1315 = vmatprep.mubr.bf16.mxu0 %v4954_v0  ;;  %1358 = vmatprep.mubr.bf16.mxu1 %v4954_v0 }
 0x2ad   :  { %1286 = vmatpush1.bf16.msra.mxu0 %v5070_v40  ;;  %1329 = vmatpush1.bf16.msra.mxu1 %v5077_v42 }
 0x2ae   :  { %1287 = vmatprep.subr.bf16.mxu0 %v5074_v41  ;;  %1330 = vmatprep.subr.bf16.mxu1 %v5084_v45 }
 0x2b1   :  { %1288 = vmatpush1.bf16.msra.mxu0 %v5082_v44  ;;  %1331 = vmatpush1.bf16.msra.mxu1 %v5089_v47 }
 0x2b2   :  { %1289 = vmatprep.subr.bf16.mxu0 %v5086_v46  ;;  %1332 = vmatprep.subr.bf16.mxu1 %v5091_v48 }
 0x2b5   :  { %1290 = vmatpush1.bf16.msra.mxu0 %v5097_v49  ;;  %1333 = vmatpush1.bf16.msra.mxu1 %v5103_v51 }
 0x2b6   :  { %1291 = vmatprep.subr.bf16.mxu0 %v5099_v50  ;;  %1334 = vmatprep.subr.bf16.mxu1 %v5109_v54 }
 0x2b9   :  { %1292 = vmatpush1.bf16.msra.mxu0 %v5106_v53  ;;  %1335 = vmatpush1.bf16.msra.mxu1 %v5115_v56 }
 0x2ba   :  { %1293 = vmatprep.subr.bf16.mxu0 %v5113_v55  ;;  %1336 = vmatprep.subr.bf16.mxu1 %v5117_v57 }
 0x2bd   :  { %1294 = vmatpush1.bf16.msra.mxu0 %v5119_v58  ;;  %1337 = vmatpush1.bf16.msra.mxu1 %v5125_v60 }
 0x2be   :  { %1295 = vmatprep.subr.bf16.mxu0 %v5123_v59  ;;  %1338 = vmatprep.subr.bf16.mxu1 %v5134_v63 }
 0x2c1   :  { %1296 = vmatpush1.bf16.msra.mxu0 %v5132_v62  ;;  %1339 = vmatpush1.bf16.msra.mxu1 %v5138_v2 }
 0x2c2   :  { %1297 = vmatprep.subr.bf16.mxu0 %v5136_v1  ;;  %1340 = vmatprep.subr.bf16.mxu1 %v5141_v3 }
 0x2c5   :  { %1298 = vmatpush1.bf16.msra.mxu0 %v5145_v4  ;;  %1341 = vmatpush1.bf16.msra.mxu1 %v5149_v5 }
 0x2c6   :  { %1425 = vmatprep.subr.bf16.mxu0 %v5054_v33  ;;  %1468 = vmatprep.subr.bf16.mxu1 %v5056_v34 }
 0x37b   :  { %v1175_v9 = vpop.f32.mrb[8].mxu0  ;;  %v1218_v7 = vpop.f32.mrb[8].mxu1 }
 0x37c   :  { %v3984_v25 = vadd.f32 %v1175_v9, %v5213_v15  ;;  %v1177_v23 = vpop.f32.mrb[9].mxu0  ;;  %v1220_v24 = vpop.f32.mrb[9].mxu1  ;;  %v4016_v34 = vadd.f32 %v1218_v7, %v5223_v21 }
 0x37d   :  { %v3985_v19 = vadd.f32 %v1177_v23, %v5218_v17  ;;  %v1179_v35 = vpop.f32.mrb[10].mxu0  ;;  %v1222_v28 = vpop.f32.mrb[10].mxu1  ;;  %v4017_v10 = vadd.f32 %v1220_v24, %v5232_v6 }
 0x37e   :  { %v1235_v31 = vmul.f32 0.5, %v3984_v25  ;;  %v3986_v52 = vadd.f32 %v1179_v35, %v5213_v15  ;;  %v1181_v61 = vpop.f32.mrb[11].mxu0  ;;  %v1224_v8 = vpop.f32.mrb[11].mxu1  ;;  %v4018_v18 = vadd.f32 %v1222_v28, %v5223_v21 }
 0x37f   :  { %v1243_v30 = vmul.f32 0.5, %v3985_v19  ;;  %v3987_v33 = vadd.f32 %v1181_v61, %v5218_v17  ;;  %v4019_v20 = vadd.f32 %v1224_v8, %v5232_v6  ;;  %v1253_v23 = vmul.f32 0.5, %v4017_v10 }
 0x380   :  { %4484 = vtanh.f32 %v1235_v31  ;;  %v1236_v26 = vmul.f32 0.5, %v3986_v52 }
 0x381   :  { %4486 = vtanh.f32 %v1243_v30  ;;  %v1244_v32 = vmul.f32 0.5, %v3987_v33  ;;  %v1254_v35 = vmul.f32 0.5, %v4019_v20 }
 0x382   :  { %4488 = vtanh.f32 %v1236_v26 }
 0x383   :  { %4490 = vtanh.f32 %v4016_v34 }
 0x384   :  { %4492 = vtanh.f32 %v1244_v32 }
 0x385   :  { %4494 = vtanh.f32 %v4018_v18 }
 0x386   :  { %4496 = vtanh.f32 %v1253_v23 }
 0x387   :  { %4498 = vtanh.f32 %v1254_v35 }
 0x38a   :  { %v4485_v22 = vpop.eup %4484 }
 0x38b   :  { %v4487_v9 = vpop.eup %4486  ;;  %v1239_v25 = vmul.f32 0.5, %v4485_v22 }
 0x38c   :  { %v1247_v19 = vmul.f32 0.5, %v4487_v9  ;;  %v4489_v7 = vpop.eup %4488 }
 0x38d   :  { %v1241_v31 = vadd.f32 0.5, %v1239_v25  ;;  %v4491_v52 = vpop.eup %4490  ;;  %v1240_v30 = vmul.f32 0.5, %v4489_v7 }
 0x38e   :  { %v1249_v61 = vadd.f32 0.5, %v1247_v19  ;;  %v4493_v33 = vpop.eup %4492 }
 0x38f   :  { %v1263_v28 = vmul.f32 %v4491_v52, %v1241_v31  ;;  %v1242_v24 = vadd.f32 0.5, %v1240_v30  ;;  %v1248_v26 = vmul.f32 0.5, %v4493_v33  ;;  %v4495_v8 = vpop.eup %4494 }
 0x390   :  { %v1261_v34 = vmul.f32 %v1249_v61, %v5290_v13  ;;  %v4497_v9 = vpop.eup %4496 }
 0x391   :  { %v1250_v18 = vadd.f32 0.5, %v1248_v26  ;;  %v1264_v10 = vmul.f32 %v4495_v8, %v1242_v24  ;;  %v4499_v25 = vpop.eup %4498  ;;  %v1257_v23 = vmul.f32 0.5, %v4497_v9 }
 0x392   :  { %v5344_v32 = vadd.f32 %v1263_v28, %v1261_v34  ;;  %v1258_v13 = vmul.f32 0.5, %v4499_v25 }
 0x393   :  { %v1262_v20 = vmul.f32 %v1250_v18, %v5294_v43  ;;  %v1259_v7 = vadd.f32 0.5, %v1257_v23 }
 0x394   :  { %4500 = vtanh.f32 %v5344_v32  ;;  %v1260_v35 = vadd.f32 0.5, %v1258_v13 }
 0x395   :  { %v5348_v22 = vadd.f32 %v1264_v10, %v1262_v20 }
 0x397   :  { %4502 = vtanh.f32 %v5348_v22 }
 0x39e   :  { %v4501_v19 = vpop.eup %4500 }
 0x39f   :  { %v1269_v52 = vmul.f32 %v4501_v19, %v1259_v7 }
 0x3a1   :  { %v4503_v31 = vpop.eup %4502 }
 0x3a2   :  { %v1270_v61 = vmul.f32 %v4503_v31, %v1260_v35 }
 0x3a4   :  { %v5351_v30 = vpack.c.bf16 %v1270_v61, %v1269_v52 }
 0x3a6   :  { %1316 = vmatmul.mubr.bf16.vlgmr.msra.gmra.mrb[12].mxu0 %v5351_v30  ;;  %1359 = vmatmul.mubr.bf16.vlgmr.msra.gmra.mrb[12].mxu1 %v5351_v30 }
 0x3a7   :  { %1426 = vmatpush1.bf16.msra.mxu0 %v5058_v36  ;;  %1469 = vmatpush1.bf16.msra.mxu1 %v5064_v38  ;;  %v5387_v36 = vld [vmem:[#allocation12 + $0x4] ss:$16 sps:$4 sm:$0xff]  }
 0x3a8   :  { %1427 = vmatprep.subr.bf16.mxu0 %v5062_v37  ;;  %1470 = vmatprep.subr.bf16.mxu1 %v5066_v39  ;;  %v5390_v37 = vld [vmem:[#allocation12 + $0xc] ss:$16 sps:$4 sm:$0xff]  }
 0x3a9   :  { %1457 = vmatprep.mubr.bf16.mxu0 %v4954_v0  ;;  %1500 = vmatprep.mubr.bf16.mxu1 %v4954_v0 }
 0x3ab   :  { %1428 = vmatpush1.bf16.msra.mxu0 %v5070_v40  ;;  %1471 = vmatpush1.bf16.msra.mxu1 %v5077_v42 }
 0x3ac   :  { %1429 = vmatprep.subr.bf16.mxu0 %v5074_v41  ;;  %1472 = vmatprep.subr.bf16.mxu1 %v5084_v45 }
 0x3af   :  { %1430 = vmatpush1.bf16.msra.mxu0 %v5082_v44  ;;  %1473 = vmatpush1.bf16.msra.mxu1 %v5089_v47 }
 0x3b0   :  { %1431 = vmatprep.subr.bf16.mxu0 %v5086_v46  ;;  %1474 = vmatprep.subr.bf16.mxu1 %v5091_v48 }
 0x3b3   :  { %1432 = vmatpush1.bf16.msra.mxu0 %v5097_v49  ;;  %1475 = vmatpush1.bf16.msra.mxu1 %v5103_v51 }
 0x3b4   :  { %1433 = vmatprep.subr.bf16.mxu0 %v5099_v50  ;;  %1476 = vmatprep.subr.bf16.mxu1 %v5109_v54 }
 0x3b7   :  { %1434 = vmatpush1.bf16.msra.mxu0 %v5106_v53  ;;  %1477 = vmatpush1.bf16.msra.mxu1 %v5115_v56 }
 0x3b8   :  { %1435 = vmatprep.subr.bf16.mxu0 %v5113_v55  ;;  %1478 = vmatprep.subr.bf16.mxu1 %v5117_v57 }
 0x3bb   :  { %1436 = vmatpush1.bf16.msra.mxu0 %v5119_v58  ;;  %1479 = vmatpush1.bf16.msra.mxu1 %v5125_v60 }
 0x3bc   :  { %1437 = vmatprep.subr.bf16.mxu0 %v5123_v59  ;;  %1480 = vmatprep.subr.bf16.mxu1 %v5134_v63 }
 0x3bf   :  { %1438 = vmatpush1.bf16.msra.mxu0 %v5132_v62  ;;  %1481 = vmatpush1.bf16.msra.mxu1 %v5138_v2 }
 0x3c0   :  { %1439 = vmatprep.subr.bf16.mxu0 %v5136_v1  ;;  %1482 = vmatprep.subr.bf16.mxu1 %v5141_v3 }
 0x3c3   :  { %1440 = vmatpush1.bf16.msra.mxu0 %v5145_v4  ;;  %1483 = vmatpush1.bf16.msra.mxu1 %v5149_v5 }
 0x3c4   :  { %1567 = vmatprep.subr.bf16.mxu0 %v5387_v36  ;;  %1610 = vmatprep.subr.bf16.mxu1 %v5390_v37 }
 0x479   :  { %v1317_v38 = vpop.f32.mrb[12].mxu0  ;;  %v1360_v39 = vpop.f32.mrb[12].mxu1 }
 0x47a   :  { %v3988_v40 = vadd.f32 %v1317_v38, %v5213_v15  ;;  %v1319_v41 = vpop.f32.mrb[13].mxu0  ;;  %v1362_v42 = vpop.f32.mrb[13].mxu1  ;;  %v4020_v54 = vadd.f32 %v1360_v39, %v5223_v21 }
 0x47b   :  { %v3989_v44 = vadd.f32 %v1319_v41, %v5218_v17  ;;  %v1321_v45 = vpop.f32.mrb[14].mxu0  ;;  %v1364_v46 = vpop.f32.mrb[14].mxu1  ;;  %v4021_v58 = vadd.f32 %v1362_v42, %v5232_v6 }
 0x47c   :  { %v1377_v47 = vmul.f32 0.5, %v3988_v40  ;;  %v3990_v48 = vadd.f32 %v1321_v45, %v5213_v15  ;;  %v1323_v49 = vpop.f32.mrb[15].mxu0  ;;  %v1366_v50 = vpop.f32.mrb[15].mxu1  ;;  %v4022_v57 = vadd.f32 %v1364_v46, %v5223_v21  ;;  %v5419_v45 = vld [vmem:[#allocation12 + $0x24] ss:$16 sps:$4 sm:$0xff]  }
 0x47d   :  { %v1385_v51 = vmul.f32 0.5, %v3989_v44  ;;  %v3991_v53 = vadd.f32 %v1323_v49, %v5218_v17  ;;  %v4023_v59 = vadd.f32 %v1366_v50, %v5232_v6  ;;  %v1395_v1 = vmul.f32 0.5, %v4021_v58  ;;  %v5416_v44 = vld [vmem:[#allocation12 + $0x8] ss:$16 sps:$4 sm:$0xff]   ;;  %v5422_v46 = vld [vmem:[#allocation12 + $0x2c] ss:$16 sps:$4 sm:$0xff]  }
 0x47e   :  { %4504 = vtanh.f32 %v1377_v47  ;;  %v1378_v55 = vmul.f32 0.5, %v3990_v48  ;;  %v5427_v47 = vld [vmem:[#allocation12 + $0x20] ss:$16 sps:$4 sm:$0xff]   ;;  %v5430_v48 = vld [vmem:[#allocation12 + $0x28] ss:$16 sps:$4 sm:$0xff]  }
 0x47f   :  { %4506 = vtanh.f32 %v1385_v51  ;;  %v1386_v56 = vmul.f32 0.5, %v3991_v53  ;;  %v1396_v3 = vmul.f32 0.5, %v4023_v59  ;;  %v5433_v49 = vld [vmem:[#allocation12 + $0x44] ss:$16 sps:$4 sm:$0xff]   ;;  %v5436_v50 = vld [vmem:[#allocation12 + $0x4c] ss:$16 sps:$4 sm:$0xff]  }
 0x480   :  { %4508 = vtanh.f32 %v1378_v55  ;;  %v5439_v51 = vld [vmem:[#allocation12 + $0x40] ss:$16 sps:$4 sm:$0xff]   ;;  %v5442_v53 = vld [vmem:[#allocation12 + $0x48] ss:$16 sps:$4 sm:$0xff]   ;;  %v5448_v55 = vld [vmem:[#allocation12 + $0x6c] ss:$16 sps:$4 sm:$0xff]  }
 0x481   :  { %4510 = vtanh.f32 %v4020_v54  ;;  %v5445_v54 = vld [vmem:[#allocation12 + $0x64] ss:$16 sps:$4 sm:$0xff]   ;;  %v5460_v59 = vld [vmem:[#allocation12 + $0x8c] ss:$16 sps:$4 sm:$0xff]  }
 0x482   :  { %4512 = vtanh.f32 %v1386_v56  ;;  %v5451_v56 = vld [vmem:[#allocation12 + $0x60] ss:$16 sps:$4 sm:$0xff]   ;;  %v5457_v58 = vld [vmem:[#allocation12 + $0x84] ss:$16 sps:$4 sm:$0xff]  }
 0x483   :  { %4514 = vtanh.f32 %v4022_v57  ;;  %v5454_v57 = vld [vmem:[#allocation12 + $0x68] ss:$16 sps:$4 sm:$0xff]  }
 0x484   :  { %4516 = vtanh.f32 %v1395_v1  ;;  %v5472_v1 = vld [vmem:[#allocation12 + $0xac] ss:$16 sps:$4 sm:$0xff]  }
 0x485   :  { %4518 = vtanh.f32 %v1396_v3  ;;  %v5478_v3 = vld [vmem:[#allocation12 + $0xa8] ss:$16 sps:$4 sm:$0xff]  }
 0x488   :  { %v4505_v60 = vpop.eup %4504 }
 0x489   :  { %v4507_v62 = vpop.eup %4506  ;;  %v1381_v63 = vmul.f32 0.5, %v4505_v60  ;;  %v5463_v60 = vld [vmem:[#allocation12 + $0x80] ss:$16 sps:$4 sm:$0xff]  }
 0x48a   :  { %v1389_v2 = vmul.f32 0.5, %v4507_v62  ;;  %v4509_v4 = vpop.eup %4508  ;;  %v5466_v62 = vld [vmem:[#allocation12 + $0x88] ss:$16 sps:$4 sm:$0xff]  }
 0x48b   :  { %v1383_v43 = vadd.f32 0.5, %v1381_v63  ;;  %v4511_v33 = vpop.eup %4510  ;;  %v1382_v34 = vmul.f32 0.5, %v4509_v4  ;;  %v5469_v63 = vld [vmem:[#allocation12 + $0xa4] ss:$16 sps:$4 sm:$0xff]  }
 0x48c   :  { %v1391_v28 = vadd.f32 0.5, %v1389_v2  ;;  %v4513_v24 = vpop.eup %4512  ;;  %v5475_v2 = vld [vmem:[#allocation12 + $0xa0] ss:$16 sps:$4 sm:$0xff]   ;;  %v5481_v4 = vld [vmem:[#allocation12 + $0xc4] ss:$16 sps:$4 sm:$0xff]  }
 0x48d   :  { %v1405_v26 = vmul.f32 %v4511_v33, %v1383_v43  ;;  %v1384_v18 = vadd.f32 0.5, %v1382_v34  ;;  %v1390_v10 = vmul.f32 0.5, %v4513_v24  ;;  %v4515_v20 = vpop.eup %4514  ;;  %v5484_v43 = vld [vmem:[#allocation12 + $0xcc] ss:$16 sps:$4 sm:$0xff]   ;;  %v5487_v33 = vld [vmem:[#allocation12 + $0xc0] ss:$16 sps:$4 sm:$0xff]  }
 0x48e   :  { %v1403_v8 = vmul.f32 %v1391_v28, %v5344_v32  ;;  %v4517_v7 = vpop.eup %4516  ;;  %v5490_v28 = vld [vmem:[#allocation12 + $0xc8] ss:$16 sps:$4 sm:$0xff]   ;;  %v5493_v34 = vld [vmem:[#allocation12 + $0xe4] ss:$16 sps:$4 sm:$0xff]   ;;  %v5496_v24 = vld [vmem:[#allocation12 + $0xec] ss:$16 sps:$4 sm:$0xff]  }
 0x48f   :  { %v1392_v25 = vadd.f32 0.5, %v1390_v10  ;;  %v1406_v23 = vmul.f32 %v4515_v20, %v1384_v18  ;;  %v4519_v35 = vpop.eup %4518  ;;  %v1399_v31 = vmul.f32 0.5, %v4517_v7 }
 0x490   :  { %v5402_v9 = vadd.f32 %v1405_v26, %v1403_v8  ;;  %v1400_v32 = vmul.f32 0.5, %v4519_v35  ;;  %v5499_v26 = vld [vmem:[#allocation12 + $0xe0] ss:$16 sps:$4 sm:$0xff]  }
 0x491   :  { %v1404_v13 = vmul.f32 %v1392_v25, %v5348_v22  ;;  %v1401_v61 = vadd.f32 0.5, %v1399_v31  ;;  %v5413_v22 = vld [vmem:[#allocation12] ss:$16 sps:$4 sm:$0xff]  }
 0x492   :  { %4520 = vtanh.f32 %v5402_v9  ;;  %v1402_v38 = vadd.f32 0.5, %v1400_v32 }
 0x493   :  { %v5406_v19 = vadd.f32 %v1406_v23, %v1404_v13 }
 0x495   :  { %4522 = vtanh.f32 %v5406_v19 }
 0x49c   :  { %v4521_v52 = vpop.eup %4520 }
 0x49d   :  { %v1411_v40 = vmul.f32 %v4521_v52, %v1401_v61 }
 0x49f   :  { %v4523_v39 = vpop.eup %4522 }
 0x4a0   :  { %v1412_v41 = vmul.f32 %v4523_v39, %v1402_v38 }
 0x4a2   :  { %v5409_v42 = vpack.c.bf16 %v1412_v41, %v1411_v40 }
 0x4a4   :  { %1458 = vmatmul.mubr.bf16.vlgmr.msra.gmra.mrb[16].mxu0 %v5409_v42  ;;  %1501 = vmatmul.mubr.bf16.vlgmr.msra.gmra.mrb[16].mxu1 %v5409_v42 }
 0x4a5   :  { %1568 = vmatpush1.bf16.msra.mxu0 %v5413_v22  ;;  %1611 = vmatpush1.bf16.msra.mxu1 %v5416_v44 }
 0x4a6   :  { %1569 = vmatprep.subr.bf16.mxu0 %v5419_v45  ;;  %1612 = vmatprep.subr.bf16.mxu1 %v5422_v46 }
 0x4a7   :  { %1599 = vmatprep.mubr.bf16.mxu0 %v4954_v0  ;;  %1642 = vmatprep.mubr.bf16.mxu1 %v4954_v0 }
 0x4a9   :  { %1570 = vmatpush1.bf16.msra.mxu0 %v5427_v47  ;;  %1613 = vmatpush1.bf16.msra.mxu1 %v5430_v48 }
 0x4aa   :  { %1571 = vmatprep.subr.bf16.mxu0 %v5433_v49  ;;  %1614 = vmatprep.subr.bf16.mxu1 %v5436_v50 }
 0x4ad   :  { %1572 = vmatpush1.bf16.msra.mxu0 %v5439_v51  ;;  %1615 = vmatpush1.bf16.msra.mxu1 %v5442_v53 }
 0x4ae   :  { %1573 = vmatprep.subr.bf16.mxu0 %v5445_v54  ;;  %1616 = vmatprep.subr.bf16.mxu1 %v5448_v55 }
 0x4b1   :  { %1574 = vmatpush1.bf16.msra.mxu0 %v5451_v56  ;;  %1617 = vmatpush1.bf16.msra.mxu1 %v5454_v57 }
 0x4b2   :  { %1575 = vmatprep.subr.bf16.mxu0 %v5457_v58  ;;  %1618 = vmatprep.subr.bf16.mxu1 %v5460_v59 }
 0x4b5   :  { %1576 = vmatpush1.bf16.msra.mxu0 %v5463_v60  ;;  %1619 = vmatpush1.bf16.msra.mxu1 %v5466_v62 }
 0x4b6   :  { %1577 = vmatprep.subr.bf16.mxu0 %v5469_v63  ;;  %1620 = vmatprep.subr.bf16.mxu1 %v5472_v1 }
 0x4b9   :  { %1578 = vmatpush1.bf16.msra.mxu0 %v5475_v2  ;;  %1621 = vmatpush1.bf16.msra.mxu1 %v5478_v3 }
 0x4ba   :  { %1579 = vmatprep.subr.bf16.mxu0 %v5481_v4  ;;  %1622 = vmatprep.subr.bf16.mxu1 %v5484_v43 }
 0x4bd   :  { %1580 = vmatpush1.bf16.msra.mxu0 %v5487_v33  ;;  %1623 = vmatpush1.bf16.msra.mxu1 %v5490_v28 }
 0x4be   :  { %1581 = vmatprep.subr.bf16.mxu0 %v5493_v34  ;;  %1624 = vmatprep.subr.bf16.mxu1 %v5496_v24 }
 0x4c1   :  { %1582 = vmatpush1.bf16.msra.mxu0 %v5499_v26  ;;  %1625 = vmatpush1.bf16.msra.mxu1 %v5149_v5 }
 0x4c2   :  { %1709 = vmatprep.subr.bf16.mxu0 %v5387_v36  ;;  %1752 = vmatprep.subr.bf16.mxu1 %v5390_v37 }
 0x577   :  { %v1459_v8 = vpop.f32.mrb[16].mxu0  ;;  %v1502_v18 = vpop.f32.mrb[16].mxu1 }
 0x578   :  { %v3992_v10 = vadd.f32 %v1459_v8, %v5213_v15  ;;  %v1461_v20 = vpop.f32.mrb[17].mxu0  ;;  %v1504_v25 = vpop.f32.mrb[17].mxu1  ;;  %v4024_v38 = vadd.f32 %v1502_v18, %v5223_v21 }
 0x579   :  { %v3993_v23 = vadd.f32 %v1461_v20, %v5218_v17  ;;  %v1463_v13 = vpop.f32.mrb[18].mxu0  ;;  %v1506_v7 = vpop.f32.mrb[18].mxu1  ;;  %v4025_v8 = vadd.f32 %v1504_v25, %v5232_v6 }
 0x57a   :  { %v1519_v35 = vmul.f32 0.5, %v3992_v10  ;;  %v3994_v31 = vadd.f32 %v1463_v13, %v5213_v15  ;;  %v1465_v32 = vpop.f32.mrb[19].mxu0  ;;  %v1508_v52 = vpop.f32.mrb[19].mxu1  ;;  %v4026_v41 = vadd.f32 %v1506_v7, %v5223_v21 }
 0x57b   :  { %v1527_v5 = vmul.f32 0.5, %v3993_v23  ;;  %v3995_v61 = vadd.f32 %v1465_v32, %v5218_v17  ;;  %v4027_v10 = vadd.f32 %v1508_v52, %v5232_v6  ;;  %v1537_v32 = vmul.f32 0.5, %v4025_v8 }
 0x57c   :  { %4524 = vtanh.f32 %v1519_v35  ;;  %v1520_v39 = vmul.f32 0.5, %v3994_v31 }
 0x57d   :  { %4526 = vtanh.f32 %v1527_v5  ;;  %v1528_v40 = vmul.f32 0.5, %v3995_v61  ;;  %v1538_v16 = vmul.f32 0.5, %v4027_v10 }
 0x57e   :  { %4528 = vtanh.f32 %v1520_v39 }
 0x57f   :  { %4530 = vtanh.f32 %v4024_v38 }
 0x580   :  { %4532 = vtanh.f32 %v1528_v40 }
 0x581   :  { %4534 = vtanh.f32 %v4026_v41 }
 0x582   :  { %4536 = vtanh.f32 %v1537_v32 }
 0x583   :  { %4538 = vtanh.f32 %v1538_v16 }
 0x586   :  { %v4525_v20 = vpop.eup %4524 }
 0x587   :  { %v4527_v23 = vpop.eup %4526  ;;  %v1523_v13 = vmul.f32 0.5, %v4525_v20 }
 0x588   :  { %v1531_v35 = vmul.f32 0.5, %v4527_v23  ;;  %v4529_v18 = vpop.eup %4528 }
 0x589   :  { %v1525_v31 = vadd.f32 0.5, %v1523_v13  ;;  %v4531_v5 = vpop.eup %4530  ;;  %v1524_v39 = vmul.f32 0.5, %v4529_v18 }
 0x58a   :  { %v1533_v61 = vadd.f32 0.5, %v1531_v35  ;;  %v4533_v14 = vpop.eup %4532 }
 0x58b   :  { %v1547_v7 = vmul.f32 %v4531_v5, %v1525_v31  ;;  %v1526_v25 = vadd.f32 0.5, %v1524_v39  ;;  %v1532_v40 = vmul.f32 0.5, %v4533_v14  ;;  %v4535_v52 = vpop.eup %4534 }
 0x58c   :  { %v1545_v38 = vmul.f32 %v1533_v61, %v5402_v9  ;;  %v4537_v13 = vpop.eup %4536 }
 0x58d   :  { %v1534_v20 = vadd.f32 0.5, %v1532_v40  ;;  %v1548_v8 = vmul.f32 %v4535_v52, %v1526_v25  ;;  %v4539_v32 = vpop.eup %4538  ;;  %v1541_v35 = vmul.f32 0.5, %v4537_v13 }
 0x58e   :  { %v5514_v41 = vadd.f32 %v1547_v7, %v1545_v38  ;;  %v1542_v9 = vmul.f32 0.5, %v4539_v32 }
 0x58f   :  { %v1546_v10 = vmul.f32 %v1534_v20, %v5406_v19  ;;  %v1543_v14 = vadd.f32 0.5, %v1541_v35  ;;  %v5556_v19 = vld [vmem:[#allocation12 + $0xe8] ss:$16 sps:$4 sm:$0xff]  }
 0x590   :  { %4540 = vtanh.f32 %v5514_v41  ;;  %v1544_v16 = vadd.f32 0.5, %v1542_v9 }
 0x591   :  { %v5518_v23 = vadd.f32 %v1548_v8, %v1546_v10 }
 0x593   :  { %4542 = vtanh.f32 %v5518_v23 }
 0x59a   :  { %v4541_v18 = vpop.eup %4540 }
 0x59b   :  { %v1553_v5 = vmul.f32 %v4541_v18, %v1543_v14 }
 0x59d   :  { %v4543_v31 = vpop.eup %4542 }
 0x59e   :  { %v1554_v61 = vmul.f32 %v4543_v31, %v1544_v16 }
 0x5a0   :  { %v5521_v39 = vpack.c.bf16 %v1554_v61, %v1553_v5 }
 0x5a2   :  { %1600 = vmatmul.mubr.bf16.vlgmr.msra.gmra.mrb[20].mxu0 %v5521_v39  ;;  %1643 = vmatmul.mubr.bf16.vlgmr.msra.gmra.mrb[20].mxu1 %v5521_v39 }
 0x5a3   :  { %1710 = vmatpush1.bf16.msra.mxu0 %v5413_v22  ;;  %1753 = vmatpush1.bf16.msra.mxu1 %v5416_v44 }
 0x5a4   :  { %1711 = vmatprep.subr.bf16.mxu0 %v5419_v45  ;;  %1754 = vmatprep.subr.bf16.mxu1 %v5422_v46 }
 0x5a5   :  { %1741 = vmatprep.mubr.bf16.mxu0 %v4954_v0  ;;  %1784 = vmatprep.mubr.bf16.mxu1 %v4954_v0 }
 0x5a7   :  { %1712 = vmatpush1.bf16.msra.mxu0 %v5427_v47  ;;  %1755 = vmatpush1.bf16.msra.mxu1 %v5430_v48 }
 0x5a8   :  { %1713 = vmatprep.subr.bf16.mxu0 %v5433_v49  ;;  %1756 = vmatprep.subr.bf16.mxu1 %v5436_v50 }
 0x5ab   :  { %1714 = vmatpush1.bf16.msra.mxu0 %v5439_v51  ;;  %1757 = vmatpush1.bf16.msra.mxu1 %v5442_v53 }
 0x5ac   :  { %1715 = vmatprep.subr.bf16.mxu0 %v5445_v54  ;;  %1758 = vmatprep.subr.bf16.mxu1 %v5448_v55 }
 0x5af   :  { %1716 = vmatpush1.bf16.msra.mxu0 %v5451_v56  ;;  %1759 = vmatpush1.bf16.msra.mxu1 %v5454_v57 }
 0x5b0   :  { %1717 = vmatprep.subr.bf16.mxu0 %v5457_v58  ;;  %1760 = vmatprep.subr.bf16.mxu1 %v5460_v59 }
 0x5b3   :  { %1718 = vmatpush1.bf16.msra.mxu0 %v5463_v60  ;;  %1761 = vmatpush1.bf16.msra.mxu1 %v5466_v62 }
 0x5b4   :  { %1719 = vmatprep.subr.bf16.mxu0 %v5469_v63  ;;  %1762 = vmatprep.subr.bf16.mxu1 %v5472_v1 }
 0x5b7   :  { %1720 = vmatpush1.bf16.msra.mxu0 %v5475_v2  ;;  %1763 = vmatpush1.bf16.msra.mxu1 %v5478_v3 }
 0x5b8   :  { %1721 = vmatprep.subr.bf16.mxu0 %v5481_v4  ;;  %1764 = vmatprep.subr.bf16.mxu1 %v5484_v43 }
 0x5bb   :  { %1722 = vmatpush1.bf16.msra.mxu0 %v5487_v33  ;;  %1765 = vmatpush1.bf16.msra.mxu1 %v5490_v28 }
 0x5bc   :  { %1723 = vmatprep.subr.bf16.mxu0 %v5493_v34  ;;  %1766 = vmatprep.subr.bf16.mxu1 %v5496_v24 }
 0x5bf   :  { %1724 = vmatpush1.bf16.msra.mxu0 %v5499_v26  ;;  %1767 = vmatpush1.bf16.msra.mxu1 %v5556_v19 }
 0x5c0   :  { %1851 = vmatprep.subr.bf16.mxu0 %v5387_v36  ;;  %1894 = vmatprep.subr.bf16.mxu1 %v5390_v37 }
 0x675   :  { %v1601_v7 = vpop.f32.mrb[20].mxu0  ;;  %v1644_v38 = vpop.f32.mrb[20].mxu1 }
 0x676   :  { %v3996_v25 = vadd.f32 %v1601_v7, %v5213_v15  ;;  %v1603_v40 = vpop.f32.mrb[21].mxu0  ;;  %v1646_v52 = vpop.f32.mrb[21].mxu1  ;;  %v4028_v37 = vadd.f32 %v1644_v38, %v5223_v21 }
 0x677   :  { %v3997_v20 = vadd.f32 %v1603_v40, %v5218_v17  ;;  %v1605_v8 = vpop.f32.mrb[22].mxu0  ;;  %v1648_v10 = vpop.f32.mrb[22].mxu1  ;;  %v4029_v5 = vadd.f32 %v1646_v52, %v5232_v6 }
 0x678   :  { %v1661_v13 = vmul.f32 0.5, %v3996_v25  ;;  %v3998_v32 = vadd.f32 %v1605_v8, %v5213_v15  ;;  %v1607_v35 = vpop.f32.mrb[23].mxu0  ;;  %v1650_v9 = vpop.f32.mrb[23].mxu1  ;;  %v4030_v31 = vadd.f32 %v1648_v10, %v5223_v21 }
 0x679   :  { %v1669_v18 = vmul.f32 0.5, %v3997_v20  ;;  %v3999_v36 = vadd.f32 %v1607_v35, %v5218_v17  ;;  %v4031_v61 = vadd.f32 %v1650_v9, %v5232_v6  ;;  %v1679_v20 = vmul.f32 0.5, %v4029_v5 }
 0x67a   :  { %4544 = vtanh.f32 %v1661_v13  ;;  %v1662_v14 = vmul.f32 0.5, %v3998_v32 }
 0x67b   :  { %4546 = vtanh.f32 %v1669_v18  ;;  %v1670_v16 = vmul.f32 0.5, %v3999_v36  ;;  %v1680_v13 = vmul.f32 0.5, %v4031_v61 }
 0x67c   :  { %4548 = vtanh.f32 %v1662_v14 }
 0x67d   :  { %4550 = vtanh.f32 %v4028_v37 }
 0x67e   :  { %4552 = vtanh.f32 %v1670_v16 }
 0x67f   :  { %4554 = vtanh.f32 %v4030_v31 }
 0x680   :  { %4556 = vtanh.f32 %v1679_v20 }
 0x681   :  { %4558 = vtanh.f32 %v1680_v13 }
 0x684   :  { %v4545_v7 = vpop.eup %4544 }
 0x685   :  { %v4547_v25 = vpop.eup %4546  ;;  %v1665_v40 = vmul.f32 0.5, %v4545_v7 }
 0x686   :  { %v1673_v8 = vmul.f32 0.5, %v4547_v25  ;;  %v4549_v38 = vpop.eup %4548 }
 0x687   :  { %v1667_v32 = vadd.f32 0.5, %v1665_v40  ;;  %v4551_v35 = vpop.eup %4550  ;;  %v1666_v36 = vmul.f32 0.5, %v4549_v38 }
 0x688   :  { %v1675_v18 = vadd.f32 0.5, %v1673_v8  ;;  %v4553_v14 = vpop.eup %4552 }
 0x689   :  { %v1689_v10 = vmul.f32 %v4551_v35, %v1667_v32  ;;  %v1668_v52 = vadd.f32 0.5, %v1666_v36  ;;  %v1674_v16 = vmul.f32 0.5, %v4553_v14  ;;  %v4555_v9 = vpop.eup %4554 }
 0x68a   :  { %v1687_v37 = vmul.f32 %v1675_v18, %v5514_v41  ;;  %v4557_v40 = vpop.eup %4556 }
 0x68b   :  { %v1676_v7 = vadd.f32 0.5, %v1674_v16  ;;  %v1690_v5 = vmul.f32 %v4555_v9, %v1668_v52  ;;  %v4559_v20 = vpop.eup %4558  ;;  %v1683_v8 = vmul.f32 0.5, %v4557_v40 }
 0x68c   :  { %v5570_v31 = vadd.f32 %v1689_v10, %v1687_v37  ;;  %v1684_v41 = vmul.f32 0.5, %v4559_v20 }
 0x68d   :  { %v1688_v61 = vmul.f32 %v1676_v7, %v5518_v23  ;;  %v1685_v32 = vadd.f32 0.5, %v1683_v8 }
 0x68e   :  { %4560 = vtanh.f32 %v5570_v31  ;;  %v1686_v13 = vadd.f32 0.5, %v1684_v41 }
 0x68f   :  { %v5574_v25 = vadd.f32 %v1690_v5, %v1688_v61 }
 0x691   :  { %4562 = vtanh.f32 %v5574_v25 }
 0x698   :  { %v4561_v38 = vpop.eup %4560 }
 0x699   :  { %v1695_v18 = vmul.f32 %v4561_v38, %v1685_v32 }
 0x69b   :  { %v4563_v35 = vpop.eup %4562 }
 0x69c   :  { %v1696_v36 = vmul.f32 %v4563_v35, %v1686_v13 }
 0x69e   :  { %v5577_v14 = vpack.c.bf16 %v1696_v36, %v1695_v18 }
 0x6a0   :  { %1742 = vmatmul.mubr.bf16.vlgmr.msra.gmra.mrb[24].mxu0 %v5577_v14  ;;  %1785 = vmatmul.mubr.bf16.vlgmr.msra.gmra.mrb[24].mxu1 %v5577_v14 }
 0x6a1   :  { %1852 = vmatpush1.bf16.msra.mxu0 %v5413_v22  ;;  %1895 = vmatpush1.bf16.msra.mxu1 %v5416_v44  ;;  %v4350_v22 = vld [vmem:[#allocation11 + $0x4] ss:$16 sps:$4 sm:$0xff]   ;;  %v4353_v44 = vld [vmem:[#allocation11 + $0xc] ss:$16 sps:$4 sm:$0xff]  }
 0x6a2   :  { %1853 = vmatprep.subr.bf16.mxu0 %v5419_v45  ;;  %1896 = vmatprep.subr.bf16.mxu1 %v5422_v46 }
 0x6a3   :  { %1883 = vmatprep.mubr.bf16.mxu0 %v4954_v0  ;;  %1926 = vmatprep.mubr.bf16.mxu1 %v4954_v0 }
 0x6a5   :  { %1854 = vmatpush1.bf16.msra.mxu0 %v5427_v47  ;;  %1897 = vmatpush1.bf16.msra.mxu1 %v5430_v48 }
 0x6a6   :  { %1855 = vmatprep.subr.bf16.mxu0 %v5433_v49  ;;  %1898 = vmatprep.subr.bf16.mxu1 %v5436_v50 }
 0x6a9   :  { %1856 = vmatpush1.bf16.msra.mxu0 %v5439_v51  ;;  %1899 = vmatpush1.bf16.msra.mxu1 %v5442_v53 }
 0x6aa   :  { %1857 = vmatprep.subr.bf16.mxu0 %v5445_v54  ;;  %1900 = vmatprep.subr.bf16.mxu1 %v5448_v55 }
 0x6ad   :  { %1858 = vmatpush1.bf16.msra.mxu0 %v5451_v56  ;;  %1901 = vmatpush1.bf16.msra.mxu1 %v5454_v57 }
 0x6ae   :  { %1859 = vmatprep.subr.bf16.mxu0 %v5457_v58  ;;  %1902 = vmatprep.subr.bf16.mxu1 %v5460_v59 }
 0x6b1   :  { %1860 = vmatpush1.bf16.msra.mxu0 %v5463_v60  ;;  %1903 = vmatpush1.bf16.msra.mxu1 %v5466_v62 }
 0x6b2   :  { %1861 = vmatprep.subr.bf16.mxu0 %v5469_v63  ;;  %1904 = vmatprep.subr.bf16.mxu1 %v5472_v1 }
 0x6b5   :  { %1862 = vmatpush1.bf16.msra.mxu0 %v5475_v2  ;;  %1905 = vmatpush1.bf16.msra.mxu1 %v5478_v3 }
 0x6b6   :  { %1863 = vmatprep.subr.bf16.mxu0 %v5481_v4  ;;  %1906 = vmatprep.subr.bf16.mxu1 %v5484_v43 }
 0x6b9   :  { %1864 = vmatpush1.bf16.msra.mxu0 %v5487_v33  ;;  %1907 = vmatpush1.bf16.msra.mxu1 %v5490_v28 }
 0x6ba   :  { %1865 = vmatprep.subr.bf16.mxu0 %v5493_v34  ;;  %1908 = vmatprep.subr.bf16.mxu1 %v5496_v24 }
 0x6bd   :  { %1866 = vmatpush1.bf16.msra.mxu0 %v5499_v26  ;;  %1909 = vmatpush1.bf16.msra.mxu1 %v5556_v19 }
 0x6be   :  { %2210 = vmatprep.subr.bf16.mxu0 %v4350_v22  ;;  %2323 = vmatprep.subr.bf16.mxu1 %v4353_v44 }
 0x773   :  { %v1743_v45 = vpop.f32.mrb[24].mxu0  ;;  %v1786_v46 = vpop.f32.mrb[24].mxu1 }
 0x774   :  { %v4000_v47 = vadd.f32 %v1743_v45, %v5213_v15  ;;  %v1745_v48 = vpop.f32.mrb[25].mxu0  ;;  %v1788_v49 = vpop.f32.mrb[25].mxu1  ;;  %v4032_v60 = vadd.f32 %v1786_v46, %v5223_v21 }
 0x775   :  { %v4001_v50 = vadd.f32 %v1745_v48, %v5218_v17  ;;  %v1747_v51 = vpop.f32.mrb[26].mxu0  ;;  %v1790_v53 = vpop.f32.mrb[26].mxu1  ;;  %v4033_v2 = vadd.f32 %v1788_v49, %v5232_v6  ;;  %v4351_v48 = vld [vmem:[#allocation11 + $0x8] ss:$16 sps:$4 sm:$0xff]  }
 0x776   :  { %v1803_v54 = vmul.f32 0.5, %v4000_v47  ;;  %v4002_v55 = vadd.f32 %v1747_v51, %v5213_v15  ;;  %v1749_v56 = vpop.f32.mrb[27].mxu0  ;;  %v1792_v57 = vpop.f32.mrb[27].mxu1  ;;  %v4034_v1 = vadd.f32 %v1790_v53, %v5223_v21  ;;  %v4348_v47 = vld [vmem:[#allocation11] ss:$16 sps:$4 sm:$0xff]  }
 0x777   :  { %v1811_v58 = vmul.f32 0.5, %v4001_v50  ;;  %v4003_v59 = vadd.f32 %v1749_v56, %v5218_v17  ;;  %v4035_v3 = vadd.f32 %v1792_v57, %v5232_v6  ;;  %v1821_v28 = vmul.f32 0.5, %v4033_v2  ;;  %v4359_v50 = vld [vmem:[#allocation11 + $0x2c] ss:$16 sps:$4 sm:$0xff]   ;;  %v4354_v51 = vld [vmem:[#allocation11 + $0x20] ss:$16 sps:$4 sm:$0xff]  }
 0x778   :  { %4564 = vtanh.f32 %v1803_v54  ;;  %v1804_v62 = vmul.f32 0.5, %v4002_v55  ;;  %v4357_v53 = vld [vmem:[#allocation11 + $0x28] ss:$16 sps:$4 sm:$0xff]   ;;  %v4362_v54 = vld [vmem:[#allocation11 + $0x44] ss:$16 sps:$4 sm:$0xff]  }
 0x779   :  { %4566 = vtanh.f32 %v1811_v58  ;;  %v1812_v63 = vmul.f32 0.5, %v4003_v59  ;;  %v1822_v24 = vmul.f32 0.5, %v4035_v3  ;;  %v4365_v55 = vld [vmem:[#allocation11 + $0x4c] ss:$16 sps:$4 sm:$0xff]   ;;  %v4360_v56 = vld [vmem:[#allocation11 + $0x40] ss:$16 sps:$4 sm:$0xff]  }
 0x77a   :  { %4568 = vtanh.f32 %v1804_v62  ;;  %v4363_v57 = vld [vmem:[#allocation11 + $0x48] ss:$16 sps:$4 sm:$0xff]   ;;  %v4368_v58 = vld [vmem:[#allocation11 + $0x64] ss:$16 sps:$4 sm:$0xff]   ;;  %v4371_v59 = vld [vmem:[#allocation11 + $0x6c] ss:$16 sps:$4 sm:$0xff]  }
 0x77b   :  { %4570 = vtanh.f32 %v4032_v60  ;;  %v4366_v60 = vld [vmem:[#allocation11 + $0x60] ss:$16 sps:$4 sm:$0xff]   ;;  %v4369_v62 = vld [vmem:[#allocation11 + $0x68] ss:$16 sps:$4 sm:$0xff]  }
 0x77c   :  { %4572 = vtanh.f32 %v1812_v63  ;;  %v4374_v63 = vld [vmem:[#allocation11 + $0x84] ss:$16 sps:$4 sm:$0xff]   ;;  %v4372_v2 = vld [vmem:[#allocation11 + $0x80] ss:$16 sps:$4 sm:$0xff]   ;;  %v4375_v3 = vld [vmem:[#allocation11 + $0x88] ss:$16 sps:$4 sm:$0xff]  }
 0x77d   :  { %4574 = vtanh.f32 %v4034_v1  ;;  %v4377_v1 = vld [vmem:[#allocation11 + $0x8c] ss:$16 sps:$4 sm:$0xff]  }
 0x77e   :  { %4576 = vtanh.f32 %v1821_v28  ;;  %v4381_v28 = vld [vmem:[#allocation11 + $0xa8] ss:$16 sps:$4 sm:$0xff]  }
 0x77f   :  { %4578 = vtanh.f32 %v1822_v24  ;;  %v4389_v24 = vld [vmem:[#allocation11 + $0xcc] ss:$16 sps:$4 sm:$0xff]  }
 0x782   :  { %v4565_v4 = vpop.eup %4564 }
 0x783   :  { %v4567_v43 = vpop.eup %4566  ;;  %v1807_v33 = vmul.f32 0.5, %v4565_v4  ;;  %v4380_v4 = vld [vmem:[#allocation11 + $0xa4] ss:$16 sps:$4 sm:$0xff]  }
 0x784   :  { %v1815_v34 = vmul.f32 0.5, %v4567_v43  ;;  %v4569_v26 = vpop.eup %4568  ;;  %v4383_v43 = vld [vmem:[#allocation11 + $0xac] ss:$16 sps:$4 sm:$0xff]  }
 0x785   :  { %v1809_v23 = vadd.f32 0.5, %v1807_v33  ;;  %v4571_v19 = vpop.eup %4570  ;;  %v1808_v37 = vmul.f32 0.5, %v4569_v26  ;;  %v4378_v33 = vld [vmem:[#allocation11 + $0xa0] ss:$16 sps:$4 sm:$0xff]  }
 0x786   :  { %v1817_v10 = vadd.f32 0.5, %v1815_v34  ;;  %v4573_v52 = vpop.eup %4572  ;;  %v4386_v34 = vld [vmem:[#allocation11 + $0xc4] ss:$16 sps:$4 sm:$0xff]   ;;  %v4384_v26 = vld [vmem:[#allocation11 + $0xc0] ss:$16 sps:$4 sm:$0xff]  }
 0x787   :  { %v1831_v16 = vmul.f32 %v4571_v19, %v1809_v23  ;;  %v1810_v7 = vadd.f32 0.5, %v1808_v37  ;;  %v1816_v5 = vmul.f32 0.5, %v4573_v52  ;;  %v4575_v61 = vpop.eup %4574  ;;  %v4387_v23 = vld [vmem:[#allocation11 + $0xc8] ss:$16 sps:$4 sm:$0xff]   ;;  %v4392_v19 = vld [vmem:[#allocation11 + $0xe4] ss:$16 sps:$4 sm:$0xff]  }
 0x788   :  { %v1829_v9 = vmul.f32 %v1817_v10, %v5570_v31  ;;  %v4577_v32 = vpop.eup %4576  ;;  %v4395_v10 = vld [vmem:[#allocation11 + $0xec] ss:$16 sps:$4 sm:$0xff]   ;;  %v4390_v37 = vld [vmem:[#allocation11 + $0xe0] ss:$16 sps:$4 sm:$0xff]   ;;  %v4393_v52 = vld [vmem:[#allocation11 + $0xe8] ss:$16 sps:$4 sm:$0xff]  }
 0x789   :  { %v1818_v20 = vadd.f32 0.5, %v1816_v5  ;;  %v1832_v8 = vmul.f32 %v4575_v61, %v1810_v7  ;;  %v4579_v13 = vpop.eup %4578  ;;  %v1825_v35 = vmul.f32 0.5, %v4577_v32  ;;  %v5640_v7 = vld [vmem:[#allocation12 + $0x100] ss:$16 sps:$4 sm:$0xff]   ;;  %v5643_v5 = vld [vmem:[#allocation12 + $0x108] ss:$16 sps:$4 sm:$0xff]  }
 0x78a   :  { %v5622_v40 = vadd.f32 %v1831_v16, %v1829_v9  ;;  %v1826_v31 = vmul.f32 0.5, %v4579_v13  ;;  %v5635_v16 = vld [vmem:[#allocation12 + $0x104] ss:$16 sps:$4 sm:$0xff]   ;;  %v5637_v9 = vld [vmem:[#allocation12 + $0x10c] ss:$16 sps:$4 sm:$0xff]  }
 0x78b   :  { %v1830_v41 = vmul.f32 %v1818_v20, %v5574_v25  ;;  %v1827_v36 = vadd.f32 0.5, %v1825_v35  ;;  %v4356_v25 = vld [vmem:[#allocation11 + $0x24] ss:$16 sps:$4 sm:$0xff]   ;;  %v5653_v20 = vld [vmem:[#allocation12 + $0x120] ss:$16 sps:$4 sm:$0xff]  }
 0x78c   :  { %4580 = vtanh.f32 %v5622_v40  ;;  %v1828_v22 = vadd.f32 0.5, %v1826_v31  ;;  %v5645_v61 = vld [vmem:[#allocation12 + $0x124] ss:$16 sps:$4 sm:$0xff]   ;;  %v5703_v32 = vld [vmem:[#allocation12 + $0x160] ss:$16 sps:$4 sm:$0xff]  }
 0x78d   :  { %v5626_v38 = vadd.f32 %v1832_v8, %v1830_v41  ;;  %v5696_v8 = vld [vmem:[#allocation12 + $0x148] ss:$16 sps:$4 sm:$0xff]   ;;  %v5699_v41 = vld [vmem:[#allocation12 + $0x16c] ss:$16 sps:$4 sm:$0xff]   ;;  %v5709_v35 = vld [vmem:[#allocation12 + $0x184] ss:$16 sps:$4 sm:$0xff]  }
 0x78e   :  { %v5705_v13 = vld [vmem:[#allocation12 + $0x168] ss:$16 sps:$4 sm:$0xff]   ;;  %v5711_v31 = vld [vmem:[#allocation12 + $0x18c] ss:$16 sps:$4 sm:$0xff]  }
 0x78f   :  { %4582 = vtanh.f32 %v5626_v38 }
 0x796   :  { %v4581_v18 = vpop.eup %4580 }
 0x797   :  { %v1837_v45 = vmul.f32 %v4581_v18, %v1827_v36  ;;  %v5715_v18 = vld [vmem:[#allocation12 + $0x180] ss:$16 sps:$4 sm:$0xff]   ;;  %v5717_v36 = vld [vmem:[#allocation12 + $0x188] ss:$16 sps:$4 sm:$0xff]  }
 0x799   :  { %v4583_v44 = vpop.eup %4582 }
 0x79a   :  { %v1838_v46 = vmul.f32 %v4583_v44, %v1828_v22  ;;  %v5721_v22 = vld [vmem:[#allocation12 + $0x1a4] ss:$16 sps:$4 sm:$0xff]   ;;  %v5723_v44 = vld [vmem:[#allocation12 + $0x1ac] ss:$16 sps:$4 sm:$0xff]  }
 0x79c   :  { %v5629_v49 = vpack.c.bf16 %v1838_v46, %v1837_v45  ;;  %v5727_v45 = vld [vmem:[#allocation12 + $0x1a0] ss:$16 sps:$4 sm:$0xff]   ;;  %v5729_v46 = vld [vmem:[#allocation12 + $0x1a8] ss:$16 sps:$4 sm:$0xff]  }
 0x79e   :  { %1884 = vmatmul.mubr.bf16.vlgmr.msra.gmra.mrb[28].mxu0 %v5629_v49  ;;  %1927 = vmatmul.mubr.bf16.vlgmr.msra.gmra.mrb[28].mxu1 %v5629_v49 }
 0x79f   :  { %2211 = vmatpush1.bf16.msra.mxu0 %v4348_v47  ;;  %2324 = vmatpush1.bf16.msra.mxu1 %v4351_v48  ;;  %v5733_v47 = vld [vmem:[#allocation12 + $0x1c4] ss:$16 sps:$4 sm:$0xff]   ;;  %v5735_v48 = vld [vmem:[#allocation12 + $0x1cc] ss:$16 sps:$4 sm:$0xff]  }
 0x7a0   :  { %2212 = vmatprep.subr.bf16.mxu0 %v4356_v25  ;;  %2325 = vmatprep.subr.bf16.mxu1 %v4359_v50  ;;  %v5743_v25 = vld [vmem:[#allocation12 + $0x1e4] ss:$16 sps:$4 sm:$0xff]   ;;  %v5745_v50 = vld [vmem:[#allocation12 + $0x1c8] ss:$16 sps:$4 sm:$0xff]  }
 0x7a1   :  { %2242 = vmatprep.mubr.bf16.mxu0 %v4954_v0  ;;  %2355 = vmatprep.mubr.bf16.mxu1 %v4954_v0 }
 0x7a3   :  { %2213 = vmatpush1.bf16.msra.mxu0 %v4354_v51  ;;  %2326 = vmatpush1.bf16.msra.mxu1 %v4357_v53  ;;  %v5747_v51 = vld [vmem:[#allocation12 + $0x1ec] ss:$16 sps:$4 sm:$0xff]   ;;  %v5751_v53 = vld [vmem:[#allocation12 + $0x1e0] ss:$16 sps:$4 sm:$0xff]  }
 0x7a4   :  { %2214 = vmatprep.subr.bf16.mxu0 %v4362_v54  ;;  %2327 = vmatprep.subr.bf16.mxu1 %v4365_v55  ;;  %v5753_v54 = vld [vmem:[#allocation12 + $0x1e8] ss:$16 sps:$4 sm:$0xff]  }
 0x7a7   :  { %2215 = vmatpush1.bf16.msra.mxu0 %v4360_v56  ;;  %2328 = vmatpush1.bf16.msra.mxu1 %v4363_v57 }
 0x7a8   :  { %2216 = vmatprep.subr.bf16.mxu0 %v4368_v58  ;;  %2329 = vmatprep.subr.bf16.mxu1 %v4371_v59 }
 0x7ab   :  { %2217 = vmatpush1.bf16.msra.mxu0 %v4366_v60  ;;  %2330 = vmatpush1.bf16.msra.mxu1 %v4369_v62 }
 0x7ac   :  { %2218 = vmatprep.subr.bf16.mxu0 %v4374_v63  ;;  %2331 = vmatprep.subr.bf16.mxu1 %v4377_v1 }
 0x7af   :  { %2219 = vmatpush1.bf16.msra.mxu0 %v4372_v2  ;;  %2332 = vmatpush1.bf16.msra.mxu1 %v4375_v3 }
 0x7b0   :  { %2220 = vmatprep.subr.bf16.mxu0 %v4380_v4  ;;  %2333 = vmatprep.subr.bf16.mxu1 %v4383_v43 }
 0x7b3   :  { %2221 = vmatpush1.bf16.msra.mxu0 %v4378_v33  ;;  %2334 = vmatpush1.bf16.msra.mxu1 %v4381_v28 }
 0x7b4   :  { %2222 = vmatprep.subr.bf16.mxu0 %v4386_v34  ;;  %2335 = vmatprep.subr.bf16.mxu1 %v4389_v24 }
 0x7b7   :  { %2223 = vmatpush1.bf16.msra.mxu0 %v4384_v26  ;;  %2336 = vmatpush1.bf16.msra.mxu1 %v4387_v23 }
 0x7b8   :  { %2224 = vmatprep.subr.bf16.mxu0 %v4392_v19  ;;  %2337 = vmatprep.subr.bf16.mxu1 %v4395_v10 }
 0x7bb   :  { %2225 = vmatpush1.bf16.msra.mxu0 %v4390_v37  ;;  %2338 = vmatpush1.bf16.msra.mxu1 %v4393_v52 }
 0x7bc   :  { %2706 = vmatprep.subr.bf16.mxu0 %v5635_v16  ;;  %2749 = vmatprep.subr.bf16.mxu1 %v5637_v9 }
 0x7be   :  { %2243 = vmatmul.mubr.bf16.vlgmr.msra.gmra.mrb[32].mxu0 %v5243_v29  ;;  %2356 = vmatmul.mubr.bf16.vlgmr.msra.gmra.mrb[32].mxu1 %v5243_v29  ;;  %v5681_v29 = vld [vmem:[#allocation12 + $0x12c] ss:$16 sps:$4 sm:$0xff]  }
 0x7bf   :  { %2252 = vmatprep.mubr.bf16.mxu0 %v4954_v0  ;;  %2365 = vmatprep.mubr.bf16.mxu1 %v4954_v0 }
 0x7c0   :  { %2707 = vmatpush1.bf16.msra.mxu0 %v5640_v7  ;;  %2750 = vmatpush1.bf16.msra.mxu1 %v5643_v5 }
 0x7c1   :  { %2708 = vmatprep.subr.bf16.mxu0 %v5645_v61  ;;  %2751 = vmatprep.subr.bf16.mxu1 %v5681_v29 }
 0x7c4   :  { %2709 = vmatpush1.bf16.msra.mxu0 %v5653_v20 }
 0x7c6   :  { %2253 = vmatmul.mubr.bf16.gmra.mrb[36].mxu0 %v5297_v27  ;;  %2366 = vmatmul.mubr.bf16.gmra.mrb[36].mxu1 %v5297_v27  ;;  %v5684_v27 = vld [vmem:[#allocation12 + $0x144] ss:$16 sps:$4 sm:$0xff]  }
 0x7c7   :  { %2262 = vmatprep.mubr.bf16.mxu0 %v4954_v0  ;;  %2375 = vmatprep.mubr.bf16.mxu1 %v4954_v0 }
 0x7c8   :  { %2710 = vmatprep.subr.bf16.mxu0 %v5684_v27 }
 0x7ce   :  { %2263 = vmatmul.mubr.bf16.gmra.mrb[40].mxu0 %v5351_v30  ;;  %2376 = vmatmul.mubr.bf16.gmra.mrb[40].mxu1 %v5351_v30  ;;  %v5686_v30 = vld [vmem:[#allocation12 + $0x128] ss:$16 sps:$4 sm:$0xff]  }
 0x7cf   :  { %2272 = vmatprep.mubr.bf16.mxu0 %v4954_v0  ;;  %2385 = vmatprep.mubr.bf16.mxu1 %v4954_v0 }
 0x7d0   :  { %2752 = vmatpush1.bf16.msra.mxu1 %v5686_v30 }
 0x7d6   :  { %2273 = vmatmul.mubr.bf16.gmra.mrb[44].mxu0 %v5409_v42  ;;  %2386 = vmatmul.mubr.bf16.gmra.mrb[44].mxu1 %v5409_v42  ;;  %v5690_v42 = vld [vmem:[#allocation12 + $0x14c] ss:$16 sps:$4 sm:$0xff]  }
 0x7d7   :  { %2282 = vmatprep.mubr.bf16.mxu0 %v4954_v0  ;;  %2395 = vmatprep.mubr.bf16.mxu1 %v4954_v0 }
 0x7d8   :  { %2753 = vmatprep.subr.bf16.mxu1 %v5690_v42 }
 0x7d9   :  { %2754 = vmatpush1.bf16.msra.mxu1 %v5696_v8 }
 0x7da   :  { %2755 = vmatprep.subr.bf16.mxu1 %v5699_v41 }
 0x7dd   :  { %2756 = vmatpush1.bf16.msra.mxu1 %v5705_v13 }
 0x7de   :  { %2283 = vmatmul.mubr.bf16.gmra.mrb[48].mxu0 %v5521_v39  ;;  %2396 = vmatmul.mubr.bf16.gmra.mrb[48].mxu1 %v5521_v39  ;;  %v5692_v39 = vld [vmem:[#allocation12 + $0x140] ss:$16 sps:$4 sm:$0xff]  }
 0x7df   :  { %2292 = vmatprep.mubr.bf16.mxu0 %v4954_v0  ;;  %2405 = vmatprep.mubr.bf16.mxu1 %v4954_v0 }
 0x7e0   :  { %2711 = vmatpush1.bf16.msra.mxu0 %v5692_v39  ;;  %2757 = vmatprep.subr.bf16.mxu1 %v5711_v31 }
 0x7e1   :  { %2758 = vmatpush1.bf16.msra.mxu1 %v5717_v36 }
 0x7e2   :  { %2759 = vmatprep.subr.bf16.mxu1 %v5723_v44 }
 0x7e5   :  { %2760 = vmatpush1.bf16.msra.mxu1 %v5729_v46 }
 0x7e6   :  { %2293 = vmatmul.mubr.bf16.gmra.mrb[52].mxu0 %v5577_v14  ;;  %2406 = vmatmul.mubr.bf16.gmra.mrb[52].mxu1 %v5577_v14  ;;  %v5694_v14 = vld [vmem:[#allocation12 + $0x164] ss:$16 sps:$4 sm:$0xff]  }
 0x7e7   :  { %2302 = vmatprep.mubr.bf16.mxu0 %v4954_v0  ;;  %2415 = vmatprep.mubr.bf16.mxu1 %v4954_v0 }
 0x7e8   :  { %2712 = vmatprep.subr.bf16.mxu0 %v5694_v14  ;;  %2761 = vmatprep.subr.bf16.mxu1 %v5735_v48 }
 0x7e9   :  { %2713 = vmatpush1.bf16.msra.mxu0 %v5703_v32  ;;  %2762 = vmatpush1.bf16.msra.mxu1 %v5745_v50 }
 0x7ea   :  { %2714 = vmatprep.subr.bf16.mxu0 %v5709_v35  ;;  %2763 = vmatprep.subr.bf16.mxu1 %v5747_v51 }
 0x7ed   :  { %2715 = vmatpush1.bf16.msra.mxu0 %v5715_v18  ;;  %2764 = vmatpush1.bf16.msra.mxu1 %v5753_v54 }
 0x7ee   :  { %2303 = vmatmul.mubr.bf16.gmra.mrb[56].mxu0 %v5629_v49  ;;  %2416 = vmatmul.mubr.bf16.gmra.mrb[56].mxu1 %v5629_v49  ;;  %v5739_v49 = vld [vmem:[#allocation12 + $0x1c0] ss:$16 sps:$4 sm:$0xff]  }
 0x7ef   :  { %2312 = vmatprep.mubr.bf16.mxu0 %v4954_v0  ;;  %2425 = vmatprep.mubr.bf16.mxu1 %v4954_v0 }
 0x7f0   :  { %2716 = vmatprep.subr.bf16.mxu0 %v5721_v22  ;;  %2888 = vmatprep.subr.bf16.mxu1 %v5637_v9 }
 0x7f1   :  { %2717 = vmatpush1.bf16.msra.mxu0 %v5727_v45 }
 0x7f2   :  { %2718 = vmatprep.subr.bf16.mxu0 %v5733_v47 }
 0x7f5   :  { %2719 = vmatpush1.bf16.msra.mxu0 %v5739_v49 }
 0x7f6   :  { %2720 = vmatprep.subr.bf16.mxu0 %v5743_v25 }
 0x7f9   :  { %2721 = vmatpush1.bf16.msra.mxu0 %v5751_v53 }
 0x7fa   :  { %2845 = vmatprep.subr.bf16.mxu0 %v5635_v16 }
 0x871   :  { %v1885_v55 = vpop.f32.mrb[28].mxu0  ;;  %v1928_v56 = vpop.f32.mrb[28].mxu1 }
 0x872   :  { %v4004_v57 = vadd.f32 %v1885_v55, %v5213_v15  ;;  %v1887_v58 = vpop.f32.mrb[29].mxu0  ;;  %v1930_v59 = vpop.f32.mrb[29].mxu1  ;;  %v4036_v28 = vadd.f32 %v1928_v56, %v5223_v21 }
 0x873   :  { %v4005_v60 = vadd.f32 %v1887_v58, %v5218_v17  ;;  %v1889_v62 = vpop.f32.mrb[30].mxu0  ;;  %v1932_v63 = vpop.f32.mrb[30].mxu1  ;;  %v4037_v23 = vadd.f32 %v1930_v59, %v5232_v6 }
 0x874   :  { %v1945_v1 = vmul.f32 0.5, %v4004_v57  ;;  %v4006_v2 = vadd.f32 %v1889_v62, %v5213_v15  ;;  %v1891_v3 = vpop.f32.mrb[31].mxu0  ;;  %v1934_v4 = vpop.f32.mrb[31].mxu1  ;;  %v4038_v26 = vadd.f32 %v1932_v63, %v5223_v21 }
 0x875   :  { %v1953_v43 = vmul.f32 0.5, %v4005_v60  ;;  %v4007_v33 = vadd.f32 %v1891_v3, %v5218_v17  ;;  %v1963_v15 = vmul.f32 0.5, %v4037_v23  ;;  %v4039_v19 = vadd.f32 %v1934_v4, %v5232_v6 }
 0x876   :  { %4584 = vtanh.f32 %v1945_v1  ;;  %v1946_v34 = vmul.f32 0.5, %v4006_v2 }
 0x877   :  { %4586 = vtanh.f32 %v1953_v43  ;;  %v1954_v24 = vmul.f32 0.5, %v4007_v33  ;;  %v1964_v55 = vmul.f32 0.5, %v4039_v19 }
 0x878   :  { %4588 = vtanh.f32 %v1946_v34 }
 0x879   :  { %4590 = vtanh.f32 %v4036_v28 }
 0x87a   :  { %4592 = vtanh.f32 %v1954_v24 }
 0x87b   :  { %4594 = vtanh.f32 %v4038_v26 }
 0x87c   :  { %4596 = vtanh.f32 %v1963_v15 }
 0x87d   :  { %4598 = vtanh.f32 %v1964_v55 }
 0x880   :  { %v4585_v10 = vpop.eup %4584 }
 0x881   :  { %v4587_v37 = vpop.eup %4586  ;;  %v1949_v17 = vmul.f32 0.5, %v4585_v10 }
 0x882   :  { %v1957_v52 = vmul.f32 0.5, %v4587_v37  ;;  %v4589_v56 = vpop.eup %4588 }
 0x883   :  { %v1951_v57 = vadd.f32 0.5, %v1949_v17  ;;  %v4591_v58 = vpop.eup %4590  ;;  %v1950_v62 = vmul.f32 0.5, %v4589_v56  ;;  %v6231_v56 = vsub.s32 1, %v5204_v11 }
 0x884   :  { %v1959_v60 = vadd.f32 0.5, %v1957_v52  ;;  %v4593_v21 = vpop.eup %4592 }
 0x885   :  { %v1973_v63 = vmul.f32 %v4591_v58, %v1951_v57  ;;  %v1952_v1 = vadd.f32 0.5, %v1950_v62  ;;  %v1958_v2 = vmul.f32 0.5, %v4593_v21  ;;  %v4595_v3 = vpop.eup %4594  ;;  %v6232_v21 = vsub.s32 2, %v5204_v11 }
 0x886   :  { %v1971_v59 = vmul.f32 %v1959_v60, %v5622_v40  ;;  %v4597_v28 = vpop.eup %4596 }
 0x887   :  { %v1960_v4 = vadd.f32 0.5, %v1958_v2  ;;  %v1974_v43 = vmul.f32 %v4595_v3, %v1952_v1  ;;  %v1967_v24 = vmul.f32 0.5, %v4597_v28  ;;  %v4599_v26 = vpop.eup %4598 }
 0x888   :  { %v1975_v6 = vadd.f32 %v1973_v63, %v1971_v59  ;;  %v1968_v15 = vmul.f32 0.5, %v4599_v26 }
 0x889   :  { %v1972_v33 = vmul.f32 %v1960_v4, %v5626_v38  ;;  %v1969_v23 = vadd.f32 0.5, %v1967_v24  ;;  %v3911_v38 = vld [vmem:[%s6226_s4 + $0x4] sm:$0xf]  ;;  %s4955_s4 = smov [#allocation14]  }
 0x88a   :  { %4600 = vtanh.f32 %v1975_v6  ;;  %v1970_v40 = vadd.f32 0.5, %v1968_v15  ;;  %v5814_v55 = vrot.slane %v3911_v38, %v139_v12  ;;  %v5818_v57 = vrot.slane %v3911_v38, %v6231_v56  ;;  %s3825_s19 = sshll.u32 %s4955_s4, 4  ;;  %s3826_s19 = int_to_ptr.vmem [resolvable:$true] %s3825_s19 }
 0x88b   :  { %v1976_v34 = vadd.f32 %v1974_v43, %v1972_v33  ;;  %v5823_v63 = vrot.slane %v3911_v38, %v6232_v21  ;;  %v6233_v15 = vsub.s32 3, %v5204_v11  ;;  %s4916_s20 = scalar_lea.vmem %s3826_s19, 256  ;;  %p4921_p5 = scmp.lt.s32.totalorder %s3826_s19, %s3826_s19 }
 0x88c   :  { %p4917_p4 = scmp.ne.s32.totalorder %s3826_s19, %s4916_s20  ;;  %p4922_p6 = scmp.lt.s32.totalorder %s4916_s20, %s4916_s20 }
 0x88d   :  { %4602 = vtanh.f32 %v1976_v34 }
 0x88e   :  { %p4923_p7 = por %p4922_p6, %p4921_p5 }
 0x890   :  { %p4924_p8 = pnand %p4923_p7, %p4917_p4 }
 0x894   :  { %v4601_v19 = vpop.eup %4600 }
 0x895   :  { %v1979_v10 = vmul.f32 %v4601_v19, %v1969_v23  ;;  %v5831_v19 = vrot.slane %v3911_v38, %v6233_v15 }
 0x897   :  { %v4603_v37 = vpop.eup %4602 }
 0x898   :  { %v1980_v17 = vmul.f32 %v4603_v37, %v1970_v40 }
 0x89a   :  { %v1981_v52 = vpack.c.bf16 %v1980_v17, %v1979_v10 }
 0x89c   :  { %2313 = vmatmul.mubr.bf16.gmra.mrb[60].mxu0 %v1981_v52  ;;  %2426 = vmatmul.mubr.bf16.gmra.mrb[60].mxu1 %v1981_v52 }
 0x89d   :  { %2738 = vmatprep.mubr.bf16.mxu0 %v4954_v0  ;;  %2781 = vmatprep.mubr.bf16.mxu1 %v4954_v0 }
 0x8a4   :  { %2739 = vmatmul.mubr.bf16.vlgmr.msra.gmra.mrb[32].mxu0 %v4954_v0  ;;  %2782 = vmatmul.mubr.bf16.vlgmr.msra.gmra.mrb[32].mxu1 %v4954_v0 }
 0x8a5   :  { %2846 = vmatpush1.bf16.msra.mxu0 %v5640_v7  ;;  %2889 = vmatpush1.bf16.msra.mxu1 %v5643_v5 }
 0x8a6   :  { %2847 = vmatprep.subr.bf16.mxu0 %v5645_v61  ;;  %2890 = vmatprep.subr.bf16.mxu1 %v5681_v29 }
 0x8a7   :  { %2877 = vmatprep.mubr.bf16.mxu0 %v4954_v0  ;;  %2920 = vmatprep.mubr.bf16.mxu1 %v4954_v0 }
 0x8a9   :  { %2848 = vmatpush1.bf16.msra.mxu0 %v5653_v20  ;;  %2891 = vmatpush1.bf16.msra.mxu1 %v5686_v30 }
 0x8aa   :  { %2849 = vmatprep.subr.bf16.mxu0 %v5684_v27  ;;  %2892 = vmatprep.subr.bf16.mxu1 %v5690_v42 }
 0x8ad   :  { %2850 = vmatpush1.bf16.msra.mxu0 %v5692_v39  ;;  %2893 = vmatpush1.bf16.msra.mxu1 %v5696_v8 }
 0x8ae   :  { %2851 = vmatprep.subr.bf16.mxu0 %v5694_v14  ;;  %2894 = vmatprep.subr.bf16.mxu1 %v5699_v41 }
 0x8b1   :  { %2852 = vmatpush1.bf16.msra.mxu0 %v5703_v32  ;;  %2895 = vmatpush1.bf16.msra.mxu1 %v5705_v13 }
 0x8b2   :  { %2853 = vmatprep.subr.bf16.mxu0 %v5709_v35  ;;  %2896 = vmatprep.subr.bf16.mxu1 %v5711_v31 }
 0x8b5   :  { %2854 = vmatpush1.bf16.msra.mxu0 %v5715_v18  ;;  %2897 = vmatpush1.bf16.msra.mxu1 %v5717_v36 }
 0x8b6   :  { %2855 = vmatprep.subr.bf16.mxu0 %v5721_v22  ;;  %2898 = vmatprep.subr.bf16.mxu1 %v5723_v44 }
 0x8b9   :  { %2856 = vmatpush1.bf16.msra.mxu0 %v5727_v45  ;;  %2899 = vmatpush1.bf16.msra.mxu1 %v5729_v46 }
 0x8ba   :  { %2857 = vmatprep.subr.bf16.mxu0 %v5733_v47  ;;  %2900 = vmatprep.subr.bf16.mxu1 %v5735_v48 }
 0x8bd   :  { %2858 = vmatpush1.bf16.msra.mxu0 %v5739_v49  ;;  %2901 = vmatpush1.bf16.msra.mxu1 %v5745_v50 }
 0x8be   :  { %2859 = vmatprep.subr.bf16.mxu0 %v5743_v25  ;;  %2902 = vmatprep.subr.bf16.mxu1 %v5747_v51 }
 0x8c1   :  { %2860 = vmatpush1.bf16.msra.mxu0 %v5751_v53  ;;  %2903 = vmatpush1.bf16.msra.mxu1 %v5753_v54 }
 0x8c2   :  { %2984 = vmatprep.subr.bf16.mxu0 %v5635_v16  ;;  %3027 = vmatprep.subr.bf16.mxu1 %v5637_v9 }
 0x977   :  { %v2740_v58 = vpop.f32.mrb[32].mxu0  ;;  %v2783_v60 = vpop.f32.mrb[32].mxu1 }
 0x978   :  { %v4040_v62 = vadd.f32 %v2740_v58, %v5814_v55  ;;  %v2742_v59 = vpop.f32.mrb[33].mxu0  ;;  %v2785_v1 = vpop.f32.mrb[33].mxu1  ;;  %v4072_v24 = vadd.f32 %v2783_v60, %v5823_v63 }
 0x979   :  { %v4041_v2 = vadd.f32 %v2742_v59, %v5818_v57  ;;  %v2744_v3 = vpop.f32.mrb[34].mxu0  ;;  %v2787_v6 = vpop.f32.mrb[34].mxu1  ;;  %v4073_v40 = vadd.f32 %v2785_v1, %v5831_v19 }
 0x97a   :  { %v2800_v12 = vmul.f32 0.5, %v4040_v62  ;;  %v4042_v4 = vadd.f32 %v2744_v3, %v5814_v55  ;;  %v2746_v43 = vpop.f32.mrb[35].mxu0  ;;  %v2789_v33 = vpop.f32.mrb[35].mxu1  ;;  %v4074_v10 = vadd.f32 %v2787_v6, %v5823_v63 }
 0x97b   :  { %v2808_v28 = vmul.f32 0.5, %v4041_v2  ;;  %v4043_v34 = vadd.f32 %v2746_v43, %v5818_v57  ;;  %v4075_v37 = vadd.f32 %v2789_v33, %v5831_v19  ;;  %v2818_v58 = vmul.f32 0.5, %v4073_v40 }
 0x97c   :  { %4604 = vtanh.f32 %v2800_v12  ;;  %v2801_v26 = vmul.f32 0.5, %v4042_v4 }
 0x97d   :  { %4606 = vtanh.f32 %v2808_v28  ;;  %v2809_v23 = vmul.f32 0.5, %v4043_v34  ;;  %v2819_v62 = vmul.f32 0.5, %v4075_v37 }
 0x97e   :  { %4608 = vtanh.f32 %v2801_v26 }
 0x97f   :  { %4610 = vtanh.f32 %v4072_v24 }
 0x980   :  { %4612 = vtanh.f32 %v2809_v23 }
 0x981   :  { %4614 = vtanh.f32 %v4074_v10 }
 0x982   :  { %4616 = vtanh.f32 %v2818_v58 }
 0x983   :  { %4618 = vtanh.f32 %v2819_v62 }
 0x986   :  { %v4605_v17 = vpop.eup %4604 }
 0x987   :  { %v4607_v52 = vpop.eup %4606  ;;  %v2804_v56 = vmul.f32 0.5, %v4605_v17 }
 0x988   :  { %v2812_v60 = vmul.f32 0.5, %v4607_v52  ;;  %v4609_v21 = vpop.eup %4608 }
 0x989   :  { %v2806_v11 = vadd.f32 0.5, %v2804_v56  ;;  %v4611_v38 = vpop.eup %4610  ;;  %v2805_v2 = vmul.f32 0.5, %v4609_v21 }
 0x98a   :  { %v2814_v59 = vadd.f32 0.5, %v2812_v60  ;;  %v4613_v3 = vpop.eup %4612 }
 0x98b   :  { %v2828_v6 = vmul.f32 %v4611_v38, %v2806_v11  ;;  %v2807_v4 = vadd.f32 0.5, %v2805_v2  ;;  %v2813_v1 = vmul.f32 0.5, %v4613_v3  ;;  %v4615_v43 = vpop.eup %4614 }
 0x98c   :  { %v2826_v12 = vmul.f32 0.0, %v2814_v59  ;;  %v4617_v23 = vpop.eup %4616 }
 0x98d   :  { %v2815_v28 = vadd.f32 0.5, %v2813_v1  ;;  %v2829_v34 = vmul.f32 %v4615_v43, %v2807_v4  ;;  %v4619_v15 = vpop.eup %4618  ;;  %v2822_v10 = vmul.f32 0.5, %v4617_v23 }
 0x98e   :  { %v5836_v33 = vadd.f32 %v2828_v6, %v2826_v12  ;;  %v2823_v40 = vmul.f32 0.5, %v4619_v15 }
 0x98f   :  { %v2827_v24 = vmul.f32 0.0, %v2815_v28  ;;  %v2824_v17 = vadd.f32 0.5, %v2822_v10 }
 0x990   :  { %4620 = vtanh.f32 %v5836_v33  ;;  %v2825_v52 = vadd.f32 0.5, %v2823_v40 }
 0x991   :  { %v5839_v26 = vadd.f32 %v2829_v34, %v2827_v24 }
 0x993   :  { %4622 = vtanh.f32 %v5839_v26 }
 0x99a   :  { %v4621_v37 = vpop.eup %4620 }
 0x99b   :  { %v2834_v58 = vmul.f32 %v4621_v37, %v2824_v17 }
 0x99d   :  { %v4623_v56 = vpop.eup %4622 }
 0x99e   :  { %v2835_v60 = vmul.f32 %v4623_v56, %v2825_v52 }
 0x9a0   :  { %v2836_v62 = vpack.c.bf16 %v2835_v60, %v2834_v58 }
 0x9a2   :  { %2878 = vmatmul.mubr.bf16.vlgmr.msra.gmra.mrb[36].mxu0 %v2836_v62  ;;  %2921 = vmatmul.mubr.bf16.vlgmr.msra.gmra.mrb[36].mxu1 %v2836_v62 }
 0x9a3   :  { %2985 = vmatpush1.bf16.msra.mxu0 %v5640_v7  ;;  %3028 = vmatpush1.bf16.msra.mxu1 %v5643_v5 }
 0x9a4   :  { %2986 = vmatprep.subr.bf16.mxu0 %v5645_v61  ;;  %3029 = vmatprep.subr.bf16.mxu1 %v5681_v29 }
 0x9a5   :  { %3016 = vmatprep.mubr.bf16.mxu0 %v4954_v0  ;;  %3059 = vmatprep.mubr.bf16.mxu1 %v4954_v0 }
 0x9a7   :  { %2987 = vmatpush1.bf16.msra.mxu0 %v5653_v20  ;;  %3030 = vmatpush1.bf16.msra.mxu1 %v5686_v30 }
 0x9a8   :  { %2988 = vmatprep.subr.bf16.mxu0 %v5684_v27  ;;  %3031 = vmatprep.subr.bf16.mxu1 %v5690_v42 }
 0x9ab   :  { %2989 = vmatpush1.bf16.msra.mxu0 %v5692_v39  ;;  %3032 = vmatpush1.bf16.msra.mxu1 %v5696_v8 }
 0x9ac   :  { %2990 = vmatprep.subr.bf16.mxu0 %v5694_v14  ;;  %3033 = vmatprep.subr.bf16.mxu1 %v5699_v41 }
 0x9af   :  { %2991 = vmatpush1.bf16.msra.mxu0 %v5703_v32  ;;  %3034 = vmatpush1.bf16.msra.mxu1 %v5705_v13 }
 0x9b0   :  { %2992 = vmatprep.subr.bf16.mxu0 %v5709_v35  ;;  %3035 = vmatprep.subr.bf16.mxu1 %v5711_v31 }
 0x9b3   :  { %2993 = vmatpush1.bf16.msra.mxu0 %v5715_v18  ;;  %3036 = vmatpush1.bf16.msra.mxu1 %v5717_v36 }
 0x9b4   :  { %2994 = vmatprep.subr.bf16.mxu0 %v5721_v22  ;;  %3037 = vmatprep.subr.bf16.mxu1 %v5723_v44 }
 0x9b7   :  { %2995 = vmatpush1.bf16.msra.mxu0 %v5727_v45  ;;  %3038 = vmatpush1.bf16.msra.mxu1 %v5729_v46 }
 0x9b8   :  { %2996 = vmatprep.subr.bf16.mxu0 %v5733_v47  ;;  %3039 = vmatprep.subr.bf16.mxu1 %v5735_v48 }
 0x9bb   :  { %2997 = vmatpush1.bf16.msra.mxu0 %v5739_v49  ;;  %3040 = vmatpush1.bf16.msra.mxu1 %v5745_v50 }
 0x9bc   :  { %2998 = vmatprep.subr.bf16.mxu0 %v5743_v25  ;;  %3041 = vmatprep.subr.bf16.mxu1 %v5747_v51 }
 0x9bf   :  { %2999 = vmatpush1.bf16.msra.mxu0 %v5751_v53  ;;  %3042 = vmatpush1.bf16.msra.mxu1 %v5753_v54 }
 0x9c0   :  { %3123 = vmatprep.subr.bf16.mxu0 %v5635_v16  ;;  %3166 = vmatprep.subr.bf16.mxu1 %v5637_v9 }
 0xa75   :  { %v2879_v21 = vpop.f32.mrb[36].mxu0  ;;  %v2922_v11 = vpop.f32.mrb[36].mxu1 }
 0xa76   :  { %v4044_v38 = vadd.f32 %v2879_v21, %v5814_v55  ;;  %v2881_v59 = vpop.f32.mrb[37].mxu0  ;;  %v2924_v2 = vpop.f32.mrb[37].mxu1  ;;  %v4076_v23 = vadd.f32 %v2922_v11, %v5823_v63 }
 0xa77   :  { %v4045_v3 = vadd.f32 %v2881_v59, %v5818_v57  ;;  %v2883_v6 = vpop.f32.mrb[38].mxu0  ;;  %v2926_v12 = vpop.f32.mrb[38].mxu1  ;;  %v4077_v37 = vadd.f32 %v2924_v2, %v5831_v19 }
 0xa78   :  { %v2939_v4 = vmul.f32 0.5, %v4044_v38  ;;  %v4046_v1 = vadd.f32 %v2883_v6, %v5814_v55  ;;  %v2885_v43 = vpop.f32.mrb[39].mxu0  ;;  %v2928_v28 = vpop.f32.mrb[39].mxu1  ;;  %v4078_v40 = vadd.f32 %v2926_v12, %v5823_v63 }
 0xa79   :  { %v2947_v34 = vmul.f32 0.5, %v4045_v3  ;;  %v4047_v24 = vadd.f32 %v2885_v43, %v5818_v57  ;;  %v4079_v17 = vadd.f32 %v2928_v28, %v5831_v19  ;;  %v2957_v60 = vmul.f32 0.5, %v4077_v37 }
 0xa7a   :  { %4624 = vtanh.f32 %v2939_v4  ;;  %v2940_v15 = vmul.f32 0.5, %v4046_v1 }
 0xa7b   :  { %4626 = vtanh.f32 %v2947_v34  ;;  %v2948_v10 = vmul.f32 0.5, %v4047_v24  ;;  %v2958_v21 = vmul.f32 0.5, %v4079_v17 }
 0xa7c   :  { %4628 = vtanh.f32 %v2940_v15 }
 0xa7d   :  { %4630 = vtanh.f32 %v4076_v23 }
 0xa7e   :  { %4632 = vtanh.f32 %v2948_v10 }
 0xa7f   :  { %4634 = vtanh.f32 %v4078_v40 }
 0xa80   :  { %4636 = vtanh.f32 %v2957_v60 }
 0xa81   :  { %4638 = vtanh.f32 %v2958_v21 }
 0xa84   :  { %v4625_v52 = vpop.eup %4624 }
 0xa85   :  { %v4627_v56 = vpop.eup %4626  ;;  %v2943_v58 = vmul.f32 0.5, %v4625_v52 }
 0xa86   :  { %v2951_v62 = vmul.f32 0.5, %v4627_v56  ;;  %v4629_v11 = vpop.eup %4628 }
 0xa87   :  { %v2945_v38 = vadd.f32 0.5, %v2943_v58  ;;  %v4631_v59 = vpop.eup %4630  ;;  %v2944_v6 = vmul.f32 0.5, %v4629_v11 }
 0xa88   :  { %v2953_v3 = vadd.f32 0.5, %v2951_v62  ;;  %v4633_v4 = vpop.eup %4632 }
 0xa89   :  { %v2967_v12 = vmul.f32 %v4631_v59, %v2945_v38  ;;  %v2946_v2 = vadd.f32 0.5, %v2944_v6  ;;  %v2952_v43 = vmul.f32 0.5, %v4633_v4  ;;  %v4635_v28 = vpop.eup %4634 }
 0xa8a   :  { %v2965_v1 = vmul.f32 %v2953_v3, %v5836_v33  ;;  %v4637_v40 = vpop.eup %4636 }
 0xa8b   :  { %v2954_v24 = vadd.f32 0.5, %v2952_v43  ;;  %v2968_v23 = vmul.f32 %v4635_v28, %v2946_v2  ;;  %v4639_v37 = vpop.eup %4638  ;;  %v2961_v17 = vmul.f32 0.5, %v4637_v40 }
 0xa8c   :  { %v5885_v34 = vadd.f32 %v2967_v12, %v2965_v1  ;;  %v2962_v33 = vmul.f32 0.5, %v4639_v37 }
 0xa8d   :  { %v2966_v15 = vmul.f32 %v2954_v24, %v5839_v26  ;;  %v2963_v56 = vadd.f32 0.5, %v2961_v17 }
 0xa8e   :  { %4640 = vtanh.f32 %v5885_v34  ;;  %v2964_v58 = vadd.f32 0.5, %v2962_v33 }
 0xa8f   :  { %v5889_v10 = vadd.f32 %v2968_v23, %v2966_v15 }
 0xa91   :  { %4642 = vtanh.f32 %v5889_v10 }
 0xa98   :  { %v4641_v52 = vpop.eup %4640 }
 0xa99   :  { %v2973_v62 = vmul.f32 %v4641_v52, %v2963_v56 }
 0xa9b   :  { %v4643_v60 = vpop.eup %4642 }
 0xa9c   :  { %v2974_v21 = vmul.f32 %v4643_v60, %v2964_v58 }
 0xa9e   :  { %v2975_v11 = vpack.c.bf16 %v2974_v21, %v2973_v62 }
 0xaa0   :  { %3017 = vmatmul.mubr.bf16.vlgmr.msra.gmra.mrb[40].mxu0 %v2975_v11  ;;  %3060 = vmatmul.mubr.bf16.vlgmr.msra.gmra.mrb[40].mxu1 %v2975_v11 }
 0xaa1   :  { %3124 = vmatpush1.bf16.msra.mxu0 %v5640_v7  ;;  %3167 = vmatpush1.bf16.msra.mxu1 %v5643_v5 }
 0xaa2   :  { %3125 = vmatprep.subr.bf16.mxu0 %v5645_v61  ;;  %3168 = vmatprep.subr.bf16.mxu1 %v5681_v29 }
 0xaa3   :  { %3155 = vmatprep.mubr.bf16.mxu0 %v4954_v0  ;;  %3198 = vmatprep.mubr.bf16.mxu1 %v4954_v0 }
 0xaa5   :  { %3126 = vmatpush1.bf16.msra.mxu0 %v5653_v20  ;;  %3169 = vmatpush1.bf16.msra.mxu1 %v5686_v30 }
 0xaa6   :  { %3127 = vmatprep.subr.bf16.mxu0 %v5684_v27  ;;  %3170 = vmatprep.subr.bf16.mxu1 %v5690_v42 }
 0xaa9   :  { %3128 = vmatpush1.bf16.msra.mxu0 %v5692_v39  ;;  %3171 = vmatpush1.bf16.msra.mxu1 %v5696_v8 }
 0xaaa   :  { %3129 = vmatprep.subr.bf16.mxu0 %v5694_v14  ;;  %3172 = vmatprep.subr.bf16.mxu1 %v5699_v41 }
 0xaad   :  { %3130 = vmatpush1.bf16.msra.mxu0 %v5703_v32  ;;  %3173 = vmatpush1.bf16.msra.mxu1 %v5705_v13 }
 0xaae   :  { %3131 = vmatprep.subr.bf16.mxu0 %v5709_v35  ;;  %3174 = vmatprep.subr.bf16.mxu1 %v5711_v31 }
 0xab1   :  { %3132 = vmatpush1.bf16.msra.mxu0 %v5715_v18  ;;  %3175 = vmatpush1.bf16.msra.mxu1 %v5717_v36 }
 0xab2   :  { %3133 = vmatprep.subr.bf16.mxu0 %v5721_v22  ;;  %3176 = vmatprep.subr.bf16.mxu1 %v5723_v44 }
 0xab5   :  { %3134 = vmatpush1.bf16.msra.mxu0 %v5727_v45  ;;  %3177 = vmatpush1.bf16.msra.mxu1 %v5729_v46 }
 0xab6   :  { %3135 = vmatprep.subr.bf16.mxu0 %v5733_v47  ;;  %3178 = vmatprep.subr.bf16.mxu1 %v5735_v48 }
 0xab9   :  { %3136 = vmatpush1.bf16.msra.mxu0 %v5739_v49  ;;  %3179 = vmatpush1.bf16.msra.mxu1 %v5745_v50 }
 0xaba   :  { %3137 = vmatprep.subr.bf16.mxu0 %v5743_v25  ;;  %3180 = vmatprep.subr.bf16.mxu1 %v5747_v51 }
 0xabd   :  { %3138 = vmatpush1.bf16.msra.mxu0 %v5751_v53  ;;  %3181 = vmatpush1.bf16.msra.mxu1 %v5753_v54 }
 0xabe   :  { %3262 = vmatprep.subr.bf16.mxu0 %v5635_v16  ;;  %3305 = vmatprep.subr.bf16.mxu1 %v5637_v9 }
 0xb73   :  { %v3018_v26 = vpop.f32.mrb[40].mxu0  ;;  %v3061_v38 = vpop.f32.mrb[40].mxu1 }
 0xb74   :  { %v4048_v59 = vadd.f32 %v3018_v26, %v5814_v55  ;;  %v3020_v3 = vpop.f32.mrb[41].mxu0  ;;  %v3063_v6 = vpop.f32.mrb[41].mxu1  ;;  %v4080_v40 = vadd.f32 %v3061_v38, %v5823_v63 }
 0xb75   :  { %v4049_v4 = vadd.f32 %v3020_v3, %v5818_v57  ;;  %v3022_v12 = vpop.f32.mrb[42].mxu0  ;;  %v3065_v1 = vpop.f32.mrb[42].mxu1  ;;  %v4081_v52 = vadd.f32 %v3063_v6, %v5831_v19 }
 0xb76   :  { %v3078_v2 = vmul.f32 0.5, %v4048_v59  ;;  %v4050_v43 = vadd.f32 %v3022_v12, %v5814_v55  ;;  %v3024_v28 = vpop.f32.mrb[43].mxu0  ;;  %v3067_v24 = vpop.f32.mrb[43].mxu1  ;;  %v4082_v33 = vadd.f32 %v3065_v1, %v5823_v63 }
 0xb77   :  { %v3086_v23 = vmul.f32 0.5, %v4049_v4  ;;  %v4051_v15 = vadd.f32 %v3024_v28, %v5818_v57  ;;  %v4083_v56 = vadd.f32 %v3067_v24, %v5831_v19  ;;  %v3096_v21 = vmul.f32 0.5, %v4081_v52 }
 0xb78   :  { %4644 = vtanh.f32 %v3078_v2  ;;  %v3079_v37 = vmul.f32 0.5, %v4050_v43 }
 0xb79   :  { %4646 = vtanh.f32 %v3086_v23  ;;  %v3087_v17 = vmul.f32 0.5, %v4051_v15  ;;  %v3097_v26 = vmul.f32 0.5, %v4083_v56 }
 0xb7a   :  { %4648 = vtanh.f32 %v3079_v37 }
 0xb7b   :  { %4650 = vtanh.f32 %v4080_v40 }
 0xb7c   :  { %4652 = vtanh.f32 %v3087_v17 }
 0xb7d   :  { %4654 = vtanh.f32 %v4082_v33 }
 0xb7e   :  { %4656 = vtanh.f32 %v3096_v21 }
 0xb7f   :  { %4658 = vtanh.f32 %v3097_v26 }
 0xb82   :  { %v4645_v58 = vpop.eup %4644 }
 0xb83   :  { %v4647_v60 = vpop.eup %4646  ;;  %v3082_v62 = vmul.f32 0.5, %v4645_v58 }
 0xb84   :  { %v3090_v11 = vmul.f32 0.5, %v4647_v60  ;;  %v4649_v38 = vpop.eup %4648 }
 0xb85   :  { %v3084_v59 = vadd.f32 0.5, %v3082_v62  ;;  %v4651_v3 = vpop.eup %4650  ;;  %v3083_v12 = vmul.f32 0.5, %v4649_v38 }
 0xb86   :  { %v3092_v4 = vadd.f32 0.5, %v3090_v11  ;;  %v4653_v2 = vpop.eup %4652 }
 0xb87   :  { %v3106_v1 = vmul.f32 %v4651_v3, %v3084_v59  ;;  %v3085_v6 = vadd.f32 0.5, %v3083_v12  ;;  %v3091_v28 = vmul.f32 0.5, %v4653_v2  ;;  %v4655_v24 = vpop.eup %4654 }
 0xb88   :  { %v3104_v43 = vmul.f32 %v3092_v4, %v5885_v34  ;;  %v4657_v33 = vpop.eup %4656 }
 0xb89   :  { %v3093_v15 = vadd.f32 0.5, %v3091_v28  ;;  %v3107_v40 = vmul.f32 %v4655_v24, %v3085_v6  ;;  %v4659_v52 = vpop.eup %4658  ;;  %v3100_v56 = vmul.f32 0.5, %v4657_v33 }
 0xb8a   :  { %v5935_v23 = vadd.f32 %v3106_v1, %v3104_v43  ;;  %v3101_v34 = vmul.f32 0.5, %v4659_v52 }
 0xb8b   :  { %v3105_v37 = vmul.f32 %v3093_v15, %v5889_v10  ;;  %v3102_v60 = vadd.f32 0.5, %v3100_v56 }
 0xb8c   :  { %4660 = vtanh.f32 %v5935_v23  ;;  %v3103_v62 = vadd.f32 0.5, %v3101_v34 }
 0xb8d   :  { %v5939_v17 = vadd.f32 %v3107_v40, %v3105_v37 }
 0xb8f   :  { %4662 = vtanh.f32 %v5939_v17 }
 0xb96   :  { %v4661_v58 = vpop.eup %4660 }
 0xb97   :  { %v3112_v11 = vmul.f32 %v4661_v58, %v3102_v60 }
 0xb99   :  { %v4663_v21 = vpop.eup %4662 }
 0xb9a   :  { %v3113_v26 = vmul.f32 %v4663_v21, %v3103_v62 }
 0xb9c   :  { %v3114_v38 = vpack.c.bf16 %v3113_v26, %v3112_v11 }
 0xb9e   :  { %3156 = vmatmul.mubr.bf16.vlgmr.msra.gmra.mrb[44].mxu0 %v3114_v38  ;;  %3199 = vmatmul.mubr.bf16.vlgmr.msra.gmra.mrb[44].mxu1 %v3114_v38 }
 0xb9f   :  { %3263 = vmatpush1.bf16.msra.mxu0 %v5640_v7  ;;  %3306 = vmatpush1.bf16.msra.mxu1 %v5643_v5 }
 0xba0   :  { %3264 = vmatprep.subr.bf16.mxu0 %v5645_v61  ;;  %3307 = vmatprep.subr.bf16.mxu1 %v5681_v29 }
 0xba1   :  { %3294 = vmatprep.mubr.bf16.mxu0 %v4954_v0  ;;  %3337 = vmatprep.mubr.bf16.mxu1 %v4954_v0 }
 0xba3   :  { %3265 = vmatpush1.bf16.msra.mxu0 %v5653_v20  ;;  %3308 = vmatpush1.bf16.msra.mxu1 %v5686_v30 }
 0xba4   :  { %3266 = vmatprep.subr.bf16.mxu0 %v5684_v27  ;;  %3309 = vmatprep.subr.bf16.mxu1 %v5690_v42 }
 0xba7   :  { %3267 = vmatpush1.bf16.msra.mxu0 %v5692_v39  ;;  %3310 = vmatpush1.bf16.msra.mxu1 %v5696_v8 }
 0xba8   :  { %3268 = vmatprep.subr.bf16.mxu0 %v5694_v14  ;;  %3311 = vmatprep.subr.bf16.mxu1 %v5699_v41 }
 0xbab   :  { %3269 = vmatpush1.bf16.msra.mxu0 %v5703_v32  ;;  %3312 = vmatpush1.bf16.msra.mxu1 %v5705_v13 }
 0xbac   :  { %3270 = vmatprep.subr.bf16.mxu0 %v5709_v35  ;;  %3313 = vmatprep.subr.bf16.mxu1 %v5711_v31 }
 0xbaf   :  { %3271 = vmatpush1.bf16.msra.mxu0 %v5715_v18  ;;  %3314 = vmatpush1.bf16.msra.mxu1 %v5717_v36 }
 0xbb0   :  { %3272 = vmatprep.subr.bf16.mxu0 %v5721_v22  ;;  %3315 = vmatprep.subr.bf16.mxu1 %v5723_v44 }
 0xbb3   :  { %3273 = vmatpush1.bf16.msra.mxu0 %v5727_v45  ;;  %3316 = vmatpush1.bf16.msra.mxu1 %v5729_v46 }
 0xbb4   :  { %3274 = vmatprep.subr.bf16.mxu0 %v5733_v47  ;;  %3317 = vmatprep.subr.bf16.mxu1 %v5735_v48 }
 0xbb7   :  { %3275 = vmatpush1.bf16.msra.mxu0 %v5739_v49  ;;  %3318 = vmatpush1.bf16.msra.mxu1 %v5745_v50 }
 0xbb8   :  { %3276 = vmatprep.subr.bf16.mxu0 %v5743_v25  ;;  %3319 = vmatprep.subr.bf16.mxu1 %v5747_v51 }
 0xbbb   :  { %3277 = vmatpush1.bf16.msra.mxu0 %v5751_v53  ;;  %3320 = vmatpush1.bf16.msra.mxu1 %v5753_v54 }
 0xbbc   :  { %3401 = vmatprep.subr.bf16.mxu0 %v5635_v16  ;;  %3444 = vmatprep.subr.bf16.mxu1 %v5637_v9 }
 0xc71   :  { %v3157_v7 = vpop.f32.mrb[44].mxu0  ;;  %v3200_v5 = vpop.f32.mrb[44].mxu1 }
 0xc72   :  { %v4052_v61 = vadd.f32 %v3157_v7, %v5814_v55  ;;  %v3159_v20 = vpop.f32.mrb[45].mxu0  ;;  %v3202_v29 = vpop.f32.mrb[45].mxu1  ;;  %v4084_v9 = vadd.f32 %v3200_v5, %v5823_v63  ;;  %v5995_v7 = vld [vmem:[#allocation12 + $0x108] ss:$16 sps:$4 sm:$0xff]   ;;  %v5998_v5 = vld [vmem:[#allocation12 + $0x124] ss:$16 sps:$4 sm:$0xff]  }
 0xc73   :  { %v4053_v27 = vadd.f32 %v3159_v20, %v5818_v57  ;;  %v3161_v30 = vpop.f32.mrb[46].mxu0  ;;  %v3204_v42 = vpop.f32.mrb[46].mxu1  ;;  %v4085_v18 = vadd.f32 %v3202_v29, %v5831_v19  ;;  %v6006_v20 = vld [vmem:[#allocation12 + $0x120] ss:$16 sps:$4 sm:$0xff]   ;;  %v6009_v29 = vld [vmem:[#allocation12 + $0x128] ss:$16 sps:$4 sm:$0xff]  }
 0xc74   :  { %v3217_v39 = vmul.f32 0.5, %v4052_v61  ;;  %v4054_v14 = vadd.f32 %v3161_v30, %v5814_v55  ;;  %v3163_v8 = vpop.f32.mrb[47].mxu0  ;;  %v3206_v41 = vpop.f32.mrb[47].mxu1  ;;  %v4086_v31 = vadd.f32 %v3204_v42, %v5823_v63  ;;  %v6001_v61 = vld [vmem:[#allocation12 + $0x12c] ss:$16 sps:$4 sm:$0xff]  }
 0xc75   :  { %v3225_v32 = vmul.f32 0.5, %v4053_v27  ;;  %v4055_v16 = vadd.f32 %v3163_v8, %v5818_v57  ;;  %v4087_v36 = vadd.f32 %v3206_v41, %v5831_v19  ;;  %v3235_v46 = vmul.f32 0.5, %v4085_v18  ;;  %v6012_v27 = vld [vmem:[#allocation12 + $0x144] ss:$16 sps:$4 sm:$0xff]   ;;  %v6015_v30 = vld [vmem:[#allocation12 + $0x14c] ss:$16 sps:$4 sm:$0xff]  }
 0xc76   :  { %4664 = vtanh.f32 %v3217_v39  ;;  %v3218_v13 = vmul.f32 0.5, %v4054_v14  ;;  %v6018_v42 = vld [vmem:[#allocation12 + $0x140] ss:$16 sps:$4 sm:$0xff]   ;;  %v6021_v39 = vld [vmem:[#allocation12 + $0x148] ss:$16 sps:$4 sm:$0xff]  }
 0xc77   :  { %4666 = vtanh.f32 %v3225_v32  ;;  %v3226_v35 = vmul.f32 0.5, %v4055_v16  ;;  %v3236_v48 = vmul.f32 0.5, %v4087_v36  ;;  %v6024_v14 = vld [vmem:[#allocation12 + $0x164] ss:$16 sps:$4 sm:$0xff]   ;;  %v6027_v8 = vld [vmem:[#allocation12 + $0x16c] ss:$16 sps:$4 sm:$0xff]  }
 0xc78   :  { %4668 = vtanh.f32 %v3218_v13  ;;  %v6030_v41 = vld [vmem:[#allocation12 + $0x160] ss:$16 sps:$4 sm:$0xff]   ;;  %v6033_v32 = vld [vmem:[#allocation12 + $0x168] ss:$16 sps:$4 sm:$0xff]   ;;  %v6036_v16 = vld [vmem:[#allocation12 + $0x184] ss:$16 sps:$4 sm:$0xff]  }
 0xc79   :  { %4670 = vtanh.f32 %v4084_v9  ;;  %v6039_v9 = vld [vmem:[#allocation12 + $0x18c] ss:$16 sps:$4 sm:$0xff]   ;;  %v6042_v13 = vld [vmem:[#allocation12 + $0x180] ss:$16 sps:$4 sm:$0xff]  }
 0xc7a   :  { %4672 = vtanh.f32 %v3226_v35  ;;  %v6045_v35 = vld [vmem:[#allocation12 + $0x188] ss:$16 sps:$4 sm:$0xff]   ;;  %v6051_v18 = vld [vmem:[#allocation12 + $0x1ac] ss:$16 sps:$4 sm:$0xff]   ;;  %v6054_v36 = vld [vmem:[#allocation12 + $0x1a0] ss:$16 sps:$4 sm:$0xff]  }
 0xc7b   :  { %4674 = vtanh.f32 %v4086_v31  ;;  %v6048_v31 = vld [vmem:[#allocation12 + $0x1a4] ss:$16 sps:$4 sm:$0xff]  }
 0xc7c   :  { %4676 = vtanh.f32 %v3235_v46  ;;  %v6066_v46 = vld [vmem:[#allocation12 + $0x1c0] ss:$16 sps:$4 sm:$0xff]  }
 0xc7d   :  { %4678 = vtanh.f32 %v3236_v48  ;;  %v6077_v48 = vld [vmem:[#allocation12 + $0x10c] ss:$16 sps:$4 sm:$0xff]  }
 0xc80   :  { %v4665_v22 = vpop.eup %4664 }
 0xc81   :  { %v4667_v44 = vpop.eup %4666  ;;  %v3221_v45 = vmul.f32 0.5, %v4665_v22  ;;  %v6057_v22 = vld [vmem:[#allocation12 + $0x1a8] ss:$16 sps:$4 sm:$0xff]  }
 0xc82   :  { %v3229_v47 = vmul.f32 0.5, %v4667_v44  ;;  %v4669_v49 = vpop.eup %4668  ;;  %v6060_v44 = vld [vmem:[#allocation12 + $0x1c4] ss:$16 sps:$4 sm:$0xff]  }
 0xc83   :  { %v3223_v10 = vadd.f32 0.5, %v3221_v45  ;;  %v4671_v59 = vpop.eup %4670  ;;  %v3222_v4 = vmul.f32 0.5, %v4669_v49  ;;  %v6063_v45 = vld [vmem:[#allocation12 + $0x1cc] ss:$16 sps:$4 sm:$0xff]  }
 0xc84   :  { %v3231_v3 = vadd.f32 0.5, %v3229_v47  ;;  %v4673_v12 = vpop.eup %4672  ;;  %v6074_v47 = vld [vmem:[#allocation12 + $0x104] ss:$16 sps:$4 sm:$0xff]  }
 0xc85   :  { %v3245_v2 = vmul.f32 %v4671_v59, %v3223_v10  ;;  %v3224_v43 = vadd.f32 0.5, %v3222_v4  ;;  %v3230_v6 = vmul.f32 0.5, %v4673_v12  ;;  %v4675_v28 = vpop.eup %4674 }
 0xc86   :  { %v3243_v1 = vmul.f32 %v3231_v3, %v5935_v23  ;;  %v4677_v52 = vpop.eup %4676 }
 0xc87   :  { %v3232_v15 = vadd.f32 0.5, %v3230_v6  ;;  %v3246_v40 = vmul.f32 %v4675_v28, %v3224_v43  ;;  %v4679_v56 = vpop.eup %4678  ;;  %v3239_v34 = vmul.f32 0.5, %v4677_v52 }
 0xc88   :  { %v5985_v24 = vadd.f32 %v3245_v2, %v3243_v1  ;;  %v3240_v23 = vmul.f32 0.5, %v4679_v56 }
 0xc89   :  { %v3244_v37 = vmul.f32 %v3232_v15, %v5939_v17  ;;  %v3241_v60 = vadd.f32 0.5, %v3239_v34  ;;  %v5992_v17 = vld [vmem:[#allocation12 + $0x100] ss:$16 sps:$4 sm:$0xff]  }
 0xc8a   :  { %4680 = vtanh.f32 %v5985_v24  ;;  %v3242_v62 = vadd.f32 0.5, %v3240_v23 }
 0xc8b   :  { %v5989_v33 = vadd.f32 %v3246_v40, %v3244_v37 }
 0xc8d   :  { %4682 = vtanh.f32 %v5989_v33 }
 0xc94   :  { %v4681_v58 = vpop.eup %4680 }
 0xc95   :  { %v3251_v11 = vmul.f32 %v4681_v58, %v3241_v60 }
 0xc97   :  { %v4683_v21 = vpop.eup %4682 }
 0xc98   :  { %v3252_v26 = vmul.f32 %v4683_v21, %v3242_v62 }
 0xc9a   :  { %v3253_v38 = vpack.c.bf16 %v3252_v26, %v3251_v11 }
 0xc9c   :  { %3295 = vmatmul.mubr.bf16.vlgmr.msra.gmra.mrb[48].mxu0 %v3253_v38  ;;  %3338 = vmatmul.mubr.bf16.vlgmr.msra.gmra.mrb[48].mxu1 %v3253_v38 }
 0xc9d   :  { %3402 = vmatpush1.bf16.msra.mxu0 %v5992_v17  ;;  %3445 = vmatpush1.bf16.msra.mxu1 %v5995_v7 }
 0xc9e   :  { %3403 = vmatprep.subr.bf16.mxu0 %v5998_v5  ;;  %3446 = vmatprep.subr.bf16.mxu1 %v6001_v61 }
 0xc9f   :  { %3433 = vmatprep.mubr.bf16.mxu0 %v4954_v0  ;;  %3476 = vmatprep.mubr.bf16.mxu1 %v4954_v0 }
 0xca1   :  { %3404 = vmatpush1.bf16.msra.mxu0 %v6006_v20  ;;  %3447 = vmatpush1.bf16.msra.mxu1 %v6009_v29 }
 0xca2   :  { %3405 = vmatprep.subr.bf16.mxu0 %v6012_v27  ;;  %3448 = vmatprep.subr.bf16.mxu1 %v6015_v30 }
 0xca5   :  { %3406 = vmatpush1.bf16.msra.mxu0 %v6018_v42  ;;  %3449 = vmatpush1.bf16.msra.mxu1 %v6021_v39 }
 0xca6   :  { %3407 = vmatprep.subr.bf16.mxu0 %v6024_v14  ;;  %3450 = vmatprep.subr.bf16.mxu1 %v6027_v8 }
 0xca9   :  { %3408 = vmatpush1.bf16.msra.mxu0 %v6030_v41  ;;  %3451 = vmatpush1.bf16.msra.mxu1 %v6033_v32 }
 0xcaa   :  { %3409 = vmatprep.subr.bf16.mxu0 %v6036_v16  ;;  %3452 = vmatprep.subr.bf16.mxu1 %v6039_v9 }
 0xcad   :  { %3410 = vmatpush1.bf16.msra.mxu0 %v6042_v13  ;;  %3453 = vmatpush1.bf16.msra.mxu1 %v6045_v35 }
 0xcae   :  { %3411 = vmatprep.subr.bf16.mxu0 %v6048_v31  ;;  %3454 = vmatprep.subr.bf16.mxu1 %v6051_v18 }
 0xcb1   :  { %3412 = vmatpush1.bf16.msra.mxu0 %v6054_v36  ;;  %3455 = vmatpush1.bf16.msra.mxu1 %v6057_v22 }
 0xcb2   :  { %3413 = vmatprep.subr.bf16.mxu0 %v6060_v44  ;;  %3456 = vmatprep.subr.bf16.mxu1 %v6063_v45 }
 0xcb5   :  { %3414 = vmatpush1.bf16.msra.mxu0 %v6066_v46  ;;  %3457 = vmatpush1.bf16.msra.mxu1 %v5745_v50 }
 0xcb6   :  { %3415 = vmatprep.subr.bf16.mxu0 %v5743_v25  ;;  %3458 = vmatprep.subr.bf16.mxu1 %v5747_v51 }
 0xcb9   :  { %3416 = vmatpush1.bf16.msra.mxu0 %v5751_v53  ;;  %3459 = vmatpush1.bf16.msra.mxu1 %v5753_v54 }
 0xcba   :  { %3540 = vmatprep.subr.bf16.mxu0 %v6074_v47  ;;  %3583 = vmatprep.subr.bf16.mxu1 %v6077_v48 }
 0xd6f   :  { %v3296_v49 = vpop.f32.mrb[48].mxu0  ;;  %v3339_v10 = vpop.f32.mrb[48].mxu1 }
 0xd70   :  { %v4056_v50 = vadd.f32 %v3296_v49, %v5814_v55  ;;  %v3298_v59 = vpop.f32.mrb[49].mxu0  ;;  %v3341_v25 = vpop.f32.mrb[49].mxu1  ;;  %v4088_v6 = vadd.f32 %v3339_v10, %v5823_v63 }
 0xd71   :  { %v4057_v51 = vadd.f32 %v3298_v59, %v5818_v57  ;;  %v3300_v3 = vpop.f32.mrb[50].mxu0  ;;  %v3343_v53 = vpop.f32.mrb[50].mxu1  ;;  %v4089_v37 = vadd.f32 %v3341_v25, %v5831_v19 }
 0xd72   :  { %v3356_v4 = vmul.f32 0.5, %v4056_v50  ;;  %v4058_v54 = vadd.f32 %v3300_v3, %v5814_v55  ;;  %v3302_v12 = vpop.f32.mrb[51].mxu0  ;;  %v3345_v2 = vpop.f32.mrb[51].mxu1  ;;  %v4090_v40 = vadd.f32 %v3343_v53, %v5823_v63 }
 0xd73   :  { %v3364_v1 = vmul.f32 0.5, %v4057_v51  ;;  %v4059_v43 = vadd.f32 %v3302_v12, %v5818_v57  ;;  %v4091_v52 = vadd.f32 %v3345_v2, %v5831_v19  ;;  %v3374_v58 = vmul.f32 0.5, %v4089_v37 }
 0xd74   :  { %4684 = vtanh.f32 %v3356_v4  ;;  %v3357_v28 = vmul.f32 0.5, %v4058_v54 }
 0xd75   :  { %4686 = vtanh.f32 %v3364_v1  ;;  %v3365_v15 = vmul.f32 0.5, %v4059_v43  ;;  %v3375_v62 = vmul.f32 0.5, %v4091_v52 }
 0xd76   :  { %4688 = vtanh.f32 %v3357_v28 }
 0xd77   :  { %4690 = vtanh.f32 %v4088_v6 }
 0xd78   :  { %4692 = vtanh.f32 %v3365_v15 }
 0xd79   :  { %4694 = vtanh.f32 %v4090_v40 }
 0xd7a   :  { %4696 = vtanh.f32 %v3374_v58  ;;  %v6129_v58 = vld [vmem:[#allocation12 + $0x1ec] ss:$16 sps:$4 sm:$0xff]  }
 0xd7b   :  { %4698 = vtanh.f32 %v3375_v62  ;;  %v6135_v62 = vld [vmem:[#allocation12 + $0x1e8] ss:$16 sps:$4 sm:$0xff]  }
 0xd7e   :  { %v4685_v56 = vpop.eup %4684 }
 0xd7f   :  { %v4687_v34 = vpop.eup %4686  ;;  %v3360_v23 = vmul.f32 0.5, %v4685_v56 }
 0xd80   :  { %v3368_v60 = vmul.f32 0.5, %v4687_v34  ;;  %v4689_v21 = vpop.eup %4688 }
 0xd81   :  { %v3362_v11 = vadd.f32 0.5, %v3360_v23  ;;  %v4691_v26 = vpop.eup %4690  ;;  %v3361_v49 = vmul.f32 0.5, %v4689_v21  ;;  %v6126_v23 = vld [vmem:[#allocation12 + $0x1e4] ss:$16 sps:$4 sm:$0xff]  }
 0xd82   :  { %v3370_v38 = vadd.f32 0.5, %v3368_v60  ;;  %v4693_v10 = vpop.eup %4692  ;;  %v6132_v60 = vld [vmem:[#allocation12 + $0x1e0] ss:$16 sps:$4 sm:$0xff]  }
 0xd83   :  { %v3384_v50 = vmul.f32 %v4691_v26, %v3362_v11  ;;  %v3363_v25 = vadd.f32 0.5, %v3361_v49  ;;  %v3369_v51 = vmul.f32 0.5, %v4693_v10  ;;  %v4695_v3 = vpop.eup %4694 }
 0xd84   :  { %v3382_v59 = vmul.f32 %v3370_v38, %v5985_v24  ;;  %v4697_v1 = vpop.eup %4696 }
 0xd85   :  { %v3371_v4 = vadd.f32 0.5, %v3369_v51  ;;  %v3385_v54 = vmul.f32 %v4695_v3, %v3363_v25  ;;  %v4699_v43 = vpop.eup %4698  ;;  %v3378_v6 = vmul.f32 0.5, %v4697_v1 }
 0xd86   :  { %v6089_v53 = vadd.f32 %v3384_v50, %v3382_v59  ;;  %v3379_v24 = vmul.f32 0.5, %v4699_v43 }
 0xd87   :  { %v3383_v12 = vmul.f32 %v3371_v4, %v5989_v33  ;;  %v3380_v15 = vadd.f32 0.5, %v3378_v6  ;;  %v6123_v33 = vld [vmem:[#allocation12 + $0x1c8] ss:$16 sps:$4 sm:$0xff]  }
 0xd88   :  { %4700 = vtanh.f32 %v6089_v53  ;;  %v3381_v40 = vadd.f32 0.5, %v3379_v24 }
 0xd89   :  { %v6093_v2 = vadd.f32 %v3385_v54, %v3383_v12 }
 0xd8b   :  { %4702 = vtanh.f32 %v6093_v2 }
 0xd92   :  { %v4701_v28 = vpop.eup %4700 }
 0xd93   :  { %v3390_v52 = vmul.f32 %v4701_v28, %v3380_v15 }
 0xd95   :  { %v4703_v37 = vpop.eup %4702 }
 0xd96   :  { %v3391_v56 = vmul.f32 %v4703_v37, %v3381_v40 }
 0xd98   :  { %v3392_v34 = vpack.c.bf16 %v3391_v56, %v3390_v52 }
 0xd9a   :  { %3434 = vmatmul.mubr.bf16.vlgmr.msra.gmra.mrb[52].mxu0 %v3392_v34  ;;  %3477 = vmatmul.mubr.bf16.vlgmr.msra.gmra.mrb[52].mxu1 %v3392_v34 }
 0xd9b   :  { %3541 = vmatpush1.bf16.msra.mxu0 %v5992_v17  ;;  %3584 = vmatpush1.bf16.msra.mxu1 %v5995_v7 }
 0xd9c   :  { %3542 = vmatprep.subr.bf16.mxu0 %v5998_v5  ;;  %3585 = vmatprep.subr.bf16.mxu1 %v6001_v61 }
 0xd9d   :  { %3572 = vmatprep.mubr.bf16.mxu0 %v4954_v0  ;;  %3615 = vmatprep.mubr.bf16.mxu1 %v4954_v0 }
 0xd9f   :  { %3543 = vmatpush1.bf16.msra.mxu0 %v6006_v20  ;;  %3586 = vmatpush1.bf16.msra.mxu1 %v6009_v29 }
 0xda0   :  { %3544 = vmatprep.subr.bf16.mxu0 %v6012_v27  ;;  %3587 = vmatprep.subr.bf16.mxu1 %v6015_v30 }
 0xda3   :  { %3545 = vmatpush1.bf16.msra.mxu0 %v6018_v42  ;;  %3588 = vmatpush1.bf16.msra.mxu1 %v6021_v39 }
 0xda4   :  { %3546 = vmatprep.subr.bf16.mxu0 %v6024_v14  ;;  %3589 = vmatprep.subr.bf16.mxu1 %v6027_v8 }
 0xda7   :  { %3547 = vmatpush1.bf16.msra.mxu0 %v6030_v41  ;;  %3590 = vmatpush1.bf16.msra.mxu1 %v6033_v32 }
 0xda8   :  { %3548 = vmatprep.subr.bf16.mxu0 %v6036_v16  ;;  %3591 = vmatprep.subr.bf16.mxu1 %v6039_v9 }
 0xdab   :  { %3549 = vmatpush1.bf16.msra.mxu0 %v6042_v13  ;;  %3592 = vmatpush1.bf16.msra.mxu1 %v6045_v35 }
 0xdac   :  { %3550 = vmatprep.subr.bf16.mxu0 %v6048_v31  ;;  %3593 = vmatprep.subr.bf16.mxu1 %v6051_v18 }
 0xdaf   :  { %3551 = vmatpush1.bf16.msra.mxu0 %v6054_v36  ;;  %3594 = vmatpush1.bf16.msra.mxu1 %v6057_v22 }
 0xdb0   :  { %3552 = vmatprep.subr.bf16.mxu0 %v6060_v44  ;;  %3595 = vmatprep.subr.bf16.mxu1 %v6063_v45 }
 0xdb3   :  { %3553 = vmatpush1.bf16.msra.mxu0 %v6066_v46  ;;  %3596 = vmatpush1.bf16.msra.mxu1 %v6123_v33 }
 0xdb4   :  { %3554 = vmatprep.subr.bf16.mxu0 %v6126_v23  ;;  %3597 = vmatprep.subr.bf16.mxu1 %v6129_v58 }
 0xdb7   :  { %3555 = vmatpush1.bf16.msra.mxu0 %v6132_v60  ;;  %3598 = vmatpush1.bf16.msra.mxu1 %v6135_v62 }
 0xdb8   :  { %3679 = vmatprep.subr.bf16.mxu0 %v6074_v47  ;;  %3722 = vmatprep.subr.bf16.mxu1 %v6077_v48 }
 0xe6d   :  { %v3435_v21 = vpop.f32.mrb[52].mxu0  ;;  %v3478_v11 = vpop.f32.mrb[52].mxu1 }
 0xe6e   :  { %v4060_v26 = vadd.f32 %v3435_v21, %v5814_v55  ;;  %v3437_v38 = vpop.f32.mrb[53].mxu0  ;;  %v3480_v49 = vpop.f32.mrb[53].mxu1  ;;  %v4092_v48 = vadd.f32 %v3478_v11, %v5823_v63 }
 0xe6f   :  { %v4061_v10 = vadd.f32 %v3437_v38, %v5818_v57  ;;  %v3439_v50 = vpop.f32.mrb[54].mxu0  ;;  %v3482_v59 = vpop.f32.mrb[54].mxu1  ;;  %v4093_v6 = vadd.f32 %v3480_v49, %v5831_v19 }
 0xe70   :  { %v3495_v25 = vmul.f32 0.5, %v4060_v26  ;;  %v4062_v51 = vadd.f32 %v3439_v50, %v5814_v55  ;;  %v3441_v3 = vpop.f32.mrb[55].mxu0  ;;  %v3484_v4 = vpop.f32.mrb[55].mxu1  ;;  %v4094_v43 = vadd.f32 %v3482_v59, %v5823_v63 }
 0xe71   :  { %v3503_v54 = vmul.f32 0.5, %v4061_v10  ;;  %v4063_v47 = vadd.f32 %v3441_v3, %v5818_v57  ;;  %v4095_v24 = vadd.f32 %v3484_v4, %v5831_v19  ;;  %v3513_v37 = vmul.f32 0.5, %v4093_v6 }
 0xe72   :  { %4704 = vtanh.f32 %v3495_v25  ;;  %v3496_v12 = vmul.f32 0.5, %v4062_v51 }
 0xe73   :  { %4706 = vtanh.f32 %v3503_v54  ;;  %v3504_v1 = vmul.f32 0.5, %v4063_v47  ;;  %v3514_v56 = vmul.f32 0.5, %v4095_v24 }
 0xe74   :  { %4708 = vtanh.f32 %v3496_v12 }
 0xe75   :  { %4710 = vtanh.f32 %v4092_v48 }
 0xe76   :  { %4712 = vtanh.f32 %v3504_v1 }
 0xe77   :  { %4714 = vtanh.f32 %v4094_v43 }
 0xe78   :  { %4716 = vtanh.f32 %v3513_v37 }
 0xe79   :  { %4718 = vtanh.f32 %v3514_v56 }
 0xe7c   :  { %v4705_v28 = vpop.eup %4704 }
 0xe7d   :  { %v4707_v15 = vpop.eup %4706  ;;  %v3499_v40 = vmul.f32 0.5, %v4705_v28 }
 0xe7e   :  { %v3507_v52 = vmul.f32 0.5, %v4707_v15  ;;  %v4709_v34 = vpop.eup %4708 }
 0xe7f   :  { %v3501_v21 = vadd.f32 0.5, %v3499_v40  ;;  %v4711_v11 = vpop.eup %4710  ;;  %v3500_v38 = vmul.f32 0.5, %v4709_v34 }
 0xe80   :  { %v3509_v26 = vadd.f32 0.5, %v3507_v52  ;;  %v4713_v10 = vpop.eup %4712 }
 0xe81   :  { %v3523_v50 = vmul.f32 %v4711_v11, %v3501_v21  ;;  %v3502_v49 = vadd.f32 0.5, %v3500_v38  ;;  %v3508_v25 = vmul.f32 0.5, %v4713_v10  ;;  %v4715_v51 = vpop.eup %4714 }
 0xe82   :  { %v3521_v59 = vmul.f32 %v3509_v26, %v6089_v53  ;;  %v4717_v12 = vpop.eup %4716 }
 0xe83   :  { %v3510_v4 = vadd.f32 0.5, %v3508_v25  ;;  %v3524_v54 = vmul.f32 %v4715_v51, %v3502_v49  ;;  %v4719_v1 = vpop.eup %4718  ;;  %v3517_v43 = vmul.f32 0.5, %v4717_v12 }
 0xe84   :  { %v6149_v3 = vadd.f32 %v3523_v50, %v3521_v59  ;;  %v3518_v53 = vmul.f32 0.5, %v4719_v1 }
 0xe85   :  { %v3522_v47 = vmul.f32 %v3510_v4, %v6093_v2  ;;  %v3519_v24 = vadd.f32 0.5, %v3517_v43 }
 0xe86   :  { %4720 = vtanh.f32 %v6149_v3  ;;  %v3520_v28 = vadd.f32 0.5, %v3518_v53 }
 0xe87   :  { %v6153_v48 = vadd.f32 %v3524_v54, %v3522_v47 }
 0xe89   :  { %4722 = vtanh.f32 %v6153_v48 }
 0xe90   :  { %v4721_v6 = vpop.eup %4720 }
 0xe91   :  { %v3529_v40 = vmul.f32 %v4721_v6, %v3519_v24 }
 0xe93   :  { %v4723_v15 = vpop.eup %4722 }
 0xe94   :  { %v3530_v37 = vmul.f32 %v4723_v15, %v3520_v28 }
 0xe96   :  { %v3531_v52 = vpack.c.bf16 %v3530_v37, %v3529_v40 }
 0xe98   :  { %3573 = vmatmul.mubr.bf16.vlgmr.msra.gmra.mrb[56].mxu0 %v3531_v52  ;;  %3616 = vmatmul.mubr.bf16.vlgmr.msra.gmra.mrb[56].mxu1 %v3531_v52 }
 0xe99   :  { %3680 = vmatpush1.bf16.msra.mxu0 %v5992_v17  ;;  %3723 = vmatpush1.bf16.msra.mxu1 %v5995_v7 }
 0xe9a   :  { %3681 = vmatprep.subr.bf16.mxu0 %v5998_v5  ;;  %3724 = vmatprep.subr.bf16.mxu1 %v6001_v61 }
 0xe9b   :  { %3711 = vmatprep.mubr.bf16.mxu0 %v4954_v0  ;;  %3754 = vmatprep.mubr.bf16.mxu1 %v4954_v0 }
 0xe9d   :  { %3682 = vmatpush1.bf16.msra.mxu0 %v6006_v20  ;;  %3725 = vmatpush1.bf16.msra.mxu1 %v6009_v29 }
 0xe9e   :  { %3683 = vmatprep.subr.bf16.mxu0 %v6012_v27  ;;  %3726 = vmatprep.subr.bf16.mxu1 %v6015_v30 }
 0xea1   :  { %3684 = vmatpush1.bf16.msra.mxu0 %v6018_v42  ;;  %3727 = vmatpush1.bf16.msra.mxu1 %v6021_v39 }
 0xea2   :  { %3685 = vmatprep.subr.bf16.mxu0 %v6024_v14  ;;  %3728 = vmatprep.subr.bf16.mxu1 %v6027_v8 }
 0xea5   :  { %3686 = vmatpush1.bf16.msra.mxu0 %v6030_v41  ;;  %3729 = vmatpush1.bf16.msra.mxu1 %v6033_v32 }
 0xea6   :  { %3687 = vmatprep.subr.bf16.mxu0 %v6036_v16  ;;  %3730 = vmatprep.subr.bf16.mxu1 %v6039_v9 }
 0xea9   :  { %3688 = vmatpush1.bf16.msra.mxu0 %v6042_v13  ;;  %3731 = vmatpush1.bf16.msra.mxu1 %v6045_v35 }
 0xeaa   :  { %3689 = vmatprep.subr.bf16.mxu0 %v6048_v31  ;;  %3732 = vmatprep.subr.bf16.mxu1 %v6051_v18 }
 0xead   :  { %3690 = vmatpush1.bf16.msra.mxu0 %v6054_v36  ;;  %3733 = vmatpush1.bf16.msra.mxu1 %v6057_v22 }
 0xeae   :  { %3691 = vmatprep.subr.bf16.mxu0 %v6060_v44  ;;  %3734 = vmatprep.subr.bf16.mxu1 %v6063_v45 }
 0xeb1   :  { %3692 = vmatpush1.bf16.msra.mxu0 %v6066_v46  ;;  %3735 = vmatpush1.bf16.msra.mxu1 %v6123_v33 }
 0xeb2   :  { %3693 = vmatprep.subr.bf16.mxu0 %v6126_v23  ;;  %3736 = vmatprep.subr.bf16.mxu1 %v6129_v58 }
 0xeb5   :  { %3694 = vmatpush1.bf16.msra.mxu0 %v6132_v60  ;;  %3737 = vmatpush1.bf16.msra.mxu1 %v6135_v62 }
 0xf6b   :  { %v3574_v0 = vpop.f32.mrb[56].mxu0  ;;  %v3617_v17 = vpop.f32.mrb[56].mxu1 }
 0xf6c   :  { %v4064_v7 = vadd.f32 %v3574_v0, %v5814_v55  ;;  %v3576_v5 = vpop.f32.mrb[57].mxu0  ;;  %v3619_v61 = vpop.f32.mrb[57].mxu1  ;;  %v4096_v32 = vadd.f32 %v3617_v17, %v5823_v63 }
 0xf6d   :  { %v4065_v20 = vadd.f32 %v3576_v5, %v5818_v57  ;;  %v3578_v29 = vpop.f32.mrb[58].mxu0  ;;  %v3621_v27 = vpop.f32.mrb[58].mxu1  ;;  %v4097_v35 = vadd.f32 %v3619_v61, %v5831_v19 }
 0xf6e   :  { %v3634_v30 = vmul.f32 0.5, %v4064_v7  ;;  %v4066_v42 = vadd.f32 %v3578_v29, %v5814_v55  ;;  %v3580_v39 = vpop.f32.mrb[59].mxu0  ;;  %v3623_v14 = vpop.f32.mrb[59].mxu1  ;;  %v4098_v13 = vadd.f32 %v3621_v27, %v5823_v63 }
 0xf6f   :  { %v3642_v8 = vmul.f32 0.5, %v4065_v20  ;;  %v4067_v41 = vadd.f32 %v3580_v39, %v5818_v57  ;;  %v4099_v31 = vadd.f32 %v3623_v14, %v5831_v19  ;;  %v3652_v44 = vmul.f32 0.5, %v4097_v35 }
 0xf70   :  { %4724 = vtanh.f32 %v3634_v30  ;;  %v3635_v16 = vmul.f32 0.5, %v4066_v42 }
 0xf71   :  { %4726 = vtanh.f32 %v3642_v8  ;;  %v3643_v9 = vmul.f32 0.5, %v4067_v41  ;;  %v3653_v46 = vmul.f32 0.5, %v4099_v31 }
 0xf72   :  { %4728 = vtanh.f32 %v3635_v16 }
 0xf73   :  { %4730 = vtanh.f32 %v4096_v32 }
 0xf74   :  { %4732 = vtanh.f32 %v3643_v9 }
 0xf75   :  { %4734 = vtanh.f32 %v4098_v13 }
 0xf76   :  { %4736 = vtanh.f32 %v3652_v44 }
 0xf77   :  { %4738 = vtanh.f32 %v3653_v46 }
 0xf7a   :  { %v4725_v18 = vpop.eup %4724 }
 0xf7b   :  { %v4727_v36 = vpop.eup %4726  ;;  %v3638_v22 = vmul.f32 0.5, %v4725_v18 }
 0xf7c   :  { %v3646_v45 = vmul.f32 0.5, %v4727_v36  ;;  %v4729_v2 = vpop.eup %4728 }
 0xf7d   :  { %v3640_v33 = vadd.f32 0.5, %v3638_v22  ;;  %v4731_v23 = vpop.eup %4730  ;;  %v3639_v60 = vmul.f32 0.5, %v4729_v2 }
 0xf7e   :  { %v3648_v58 = vadd.f32 0.5, %v3646_v45  ;;  %v4733_v62 = vpop.eup %4732 }
 0xf7f   :  { %v3662_v56 = vmul.f32 %v4731_v23, %v3640_v33  ;;  %v3641_v21 = vadd.f32 0.5, %v3639_v60  ;;  %v3647_v11 = vmul.f32 0.5, %v4733_v62  ;;  %v4735_v26 = vpop.eup %4734 }
 0xf80   :  { %v3660_v34 = vmul.f32 %v3648_v58, %v6149_v3  ;;  %v4737_v25 = vpop.eup %4736 }
 0xf81   :  { %v3649_v10 = vadd.f32 0.5, %v3647_v11  ;;  %v3663_v50 = vmul.f32 %v4735_v26, %v3641_v21  ;;  %v4739_v51 = vpop.eup %4738  ;;  %v3656_v4 = vmul.f32 0.5, %v4737_v25 }
 0xf82   :  { %v3664_v38 = vadd.f32 %v3662_v56, %v3660_v34  ;;  %v3657_v54 = vmul.f32 0.5, %v4739_v51 }
 0xf83   :  { %v3661_v59 = vmul.f32 %v3649_v10, %v6153_v48  ;;  %v3658_v3 = vadd.f32 0.5, %v3656_v4 }
 0xf84   :  { %4740 = vtanh.f32 %v3664_v38  ;;  %v3659_v12 = vadd.f32 0.5, %v3657_v54 }
 0xf85   :  { %v6198_v49 = vadd.f32 %v3663_v50, %v3661_v59 }
 0xf87   :  { %4742 = vtanh.f32 %v6198_v49 }
 0xf8e   :  { %v4741_v47 = vpop.eup %4740 }
 0xf8f   :  { %v3668_v43 = vmul.f32 %v4741_v47, %v3658_v3 }
 0xf91   :  { %v4743_v1 = vpop.eup %4742 }
 0xf92   :  { %v3669_v53 = vmul.f32 %v4743_v1, %v3659_v12 }
 0xf94   :  { %v3670_v6 = vpack.c.bf16 %v3669_v53, %v3668_v43 }
 0xf96   :  { %3712 = vmatmul.mubr.bf16.vlgmr.msra.gmra.mrb[60].mxu0 %v3670_v6  ;;  %3755 = vmatmul.mubr.bf16.vlgmr.msra.gmra.mrb[60].mxu1 %v3670_v6 }
0x1069   :  { %v3713_v24 = vpop.f32.mrb[60].mxu0  ;;  %v3756_v48 = vpop.f32.mrb[60].mxu1 }
0x106a   :  { %v4068_v28 = vadd.f32 %v3713_v24, %v5814_v55  ;;  %v3715_v15 = vpop.f32.mrb[61].mxu0  ;;  %v3758_v40 = vpop.f32.mrb[61].mxu1  ;;  %v4100_v27 = vadd.f32 %v3756_v48, %v5823_v63 }
0x106b   :  { %v4069_v37 = vadd.f32 %v3715_v15, %v5818_v57  ;;  %v3717_v52 = vpop.f32.mrb[62].mxu0  ;;  %v3760_v0 = vpop.f32.mrb[62].mxu1  ;;  %v4101_v14 = vadd.f32 %v3758_v40, %v5831_v19 }
0x106c   :  { %v3773_v17 = vmul.f32 0.5, %v4068_v28  ;;  %v4070_v7 = vadd.f32 %v3717_v52, %v5814_v55  ;;  %v3719_v5 = vpop.f32.mrb[63].mxu0  ;;  %v3762_v61 = vpop.f32.mrb[63].mxu1  ;;  %v4102_v39 = vadd.f32 %v3760_v0, %v5823_v63 }
0x106d   :  { %v3781_v20 = vmul.f32 0.5, %v4069_v37  ;;  %v4071_v29 = vadd.f32 %v3719_v5, %v5818_v57  ;;  %v3791_v55 = vmul.f32 0.5, %v4101_v14  ;;  %v4103_v8 = vadd.f32 %v3762_v61, %v5831_v19 }
0x106e   :  { %4744 = vtanh.f32 %v3773_v17  ;;  %v3774_v30 = vmul.f32 0.5, %v4070_v7 }
0x106f   :  { %4746 = vtanh.f32 %v3781_v20  ;;  %v3782_v42 = vmul.f32 0.5, %v4071_v29  ;;  %v3792_v9 = vmul.f32 0.5, %v4103_v8 }
0x1070   :  { %4748 = vtanh.f32 %v3774_v30 }
0x1071   :  { %4750 = vtanh.f32 %v4100_v27 }
0x1072   :  { %4752 = vtanh.f32 %v3782_v42 }
0x1073   :  { %4754 = vtanh.f32 %v4102_v39 }
0x1074   :  { %4756 = vtanh.f32 %v3791_v55 }
0x1075   :  { %4758 = vtanh.f32 %v3792_v9 }
0x1078   :  { %v4745_v41 = vpop.eup %4744 }
0x1079   :  { %v4747_v32 = vpop.eup %4746  ;;  %v3777_v57 = vmul.f32 0.5, %v4745_v41 }
0x107a   :  { %v3785_v16 = vmul.f32 0.5, %v4747_v32  ;;  %v4749_v13 = vpop.eup %4748 }
0x107b   :  { %v3779_v35 = vadd.f32 0.5, %v3777_v57  ;;  %v4751_v31 = vpop.eup %4750  ;;  %v3778_v36 = vmul.f32 0.5, %v4749_v13 }
0x107c   :  { %v3787_v18 = vadd.f32 0.5, %v3785_v16  ;;  %v4753_v63 = vpop.eup %4752 }
0x107d   :  { %v3801_v22 = vmul.f32 %v4751_v31, %v3779_v35  ;;  %v3780_v45 = vadd.f32 0.5, %v3778_v36  ;;  %v3786_v46 = vmul.f32 0.5, %v4753_v63  ;;  %v4755_v2 = vpop.eup %4754 }
0x107e   :  { %v3799_v44 = vmul.f32 %v3787_v18, %v3664_v38  ;;  %v4757_v60 = vpop.eup %4756 }
0x107f   :  { %v3788_v19 = vadd.f32 0.5, %v3786_v46  ;;  %v3802_v23 = vmul.f32 %v4755_v2, %v3780_v45  ;;  %v3795_v56 = vmul.f32 0.5, %v4757_v60  ;;  %v4759_v34 = vpop.eup %4758 }
0x1080   :  { %v3803_v33 = vadd.f32 %v3801_v22, %v3799_v44  ;;  %v3796_v11 = vmul.f32 0.5, %v4759_v34 }
0x1081   :  { %v3800_v58 = vmul.f32 %v3788_v19, %v6198_v49  ;;  %v3797_v21 = vadd.f32 0.5, %v3795_v56 }
0x1082   :  { %4760 = vtanh.f32 %v3803_v33  ;;  %v3798_v38 = vadd.f32 0.5, %v3796_v11 }
0x1083   :  { %v3804_v62 = vadd.f32 %v3802_v23, %v3800_v58 }
0x1085   :  { %4762 = vtanh.f32 %v3804_v62 }
0x108c   :  { %v4761_v26 = vpop.eup %4760 }
0x108d   :  { %v3807_v10 = vmul.f32 %v4761_v26, %v3797_v21 }
0x108f   :  { %v4763_v50 = vpop.eup %4762 }
0x1090   :  { %v3808_v59 = vmul.f32 %v4763_v50, %v3798_v38 }
0x1092   :  { %v3809_v25 = vpack.c.bf16 %v3808_v59, %v3807_v10 }
0x1094   :  { %v3816_v51 = vunpack.c.l.bf16 %v3809_v25  ;;  %v3817_v4 = vunpack.c.h.bf16 %v3809_v25 }
0x1096   :  { %3818 = vst [vmem:[#allocation14] sm:$0xff] %v3816_v51  ;;  %3819 = vst [vmem:[#allocation14 + $0x8] sm:$0xff] %v3817_v4 }
0x1097   :  { %4927 = shalt.err (!%p4924_p8)
}
0x1098   :  { %s4928_s23 = scalar_lea.hbm %s6227_s5, 256 }
0x1099   :  { %p4929_p9 = scmp.ne.s32.totalorder %s6227_s5, %s4928_s23  ;;  %p4932_p10 = scmp.lt.u32.totalorder %s4928_s23, %s6227_s5 }
0x109b   :  { %p4934_p11 = pnand %p4932_p10, %p4929_p9 }
0x109d   :  { %4937 = shalt.err (!%p4934_p11)
}
0x109e   :  { %s4956_s30 = smov 128   ;;  %s4957_s6 = smov 8  }
0x109f   :  { %3831 = dma.vmem_to_hbm [thread:$0]  %s3826_s19, 256, %s6227_s5, [#allocation8], %s4956_s30, %s4956_s30, %s4957_s6  }
0x10a0   :  { %4944 = dma.done.wait [#allocation8], 256  }
0x10a1   :  { %4945 = vsyncadd [#allocation8], 4294967040 }
0x10a2   :  { %3835 = vsyncpa [#allocation7], 1 }
0x10a3   :  { %3836 = vsyncpa [#allocation10], 1 }
0x10a4   :  { %3837 = vsyncpa [#allocation13], 1 }
0x10a5   :  { %3838 = vsyncpa [#allocation8], 1 }

</bundles_post_ra>
